<compile_context>
chip_gen: v7x
topology: tpu7x:2x2x1
jax: 0.10.0
libtpu: 0.0.40
codegen_flags: <defaults>
</compile_context>

<pallas_src>
import functools
import math

import numpy as np
import jax
import jax.numpy as jnp
from jax import lax
from jax.experimental import pallas as pl
from jax.experimental.pallas import tpu as pltpu


def _layer_norm(v, g, b, eps=1e-5):
  mu = jnp.mean(v, axis=-1, keepdims=True)
  var = jnp.mean(jnp.square(v - mu), axis=-1, keepdims=True)
  return (v - mu) * lax.rsqrt(var + eps) * g + b


def decoder_layer_kernel(
    x_ref, k_ref, v_ref, src_pad_ref, tgt_pad_ref,
    ln1_g_ref, ln1_b_ref, ln2_g_ref, ln2_b_ref,
    wq_ref, bq_ref, wo_ref, bo_ref, w1_ref, b1_ref, w2_ref, b2_ref,
    out_ref, attn_ref,
    q_scr, acc_ref,
    *, heads, head_chunk, ctx_pad):
  qt = pl.program_id(1)
  tq = x_ref.shape[1]
  D = x_ref.shape[2]
  dh = k_ref.shape[3]
  T = tgt_pad_ref.shape[2]
  n_chunks = heads // head_chunk
  cdh = head_chunk * dh

  # ---- Q projection (scale already folded into wq/bq by the wrapper) ----------
  xq = x_ref[0]                                                      # (tq, D) f32
  xn = _layer_norm(xq, ln1_g_ref[...], ln1_b_ref[...])
  q = jnp.dot(xn.astype(jnp.bfloat16), wq_ref[...],
              preferred_element_type=jnp.float32) + bq_ref[...]      # (tq, D) f32
  q_scr[...] = jnp.transpose(q.reshape(tq, heads, dh),
                             (1, 0, 2)).astype(jnp.bfloat16)         # (H, tq, dh)

  # ---- additive mask (0 / -1e9), built once per tile; 128-aligned ctx boundary
  ctx_bias = jnp.broadcast_to(
      jnp.where(src_pad_ref[0] > 0.5, -1e9, 0.0), (tq, ctx_pad))
  row = lax.broadcasted_iota(jnp.int32, (tq, T), 0) + qt * tq
  col = lax.broadcasted_iota(jnp.int32, (tq, T), 1)
  self_masked = jnp.logical_or(
      col > row, jnp.broadcast_to(tgt_pad_ref[0] > 0.5, (tq, T)))
  self_bias = jnp.where(self_masked, -1e9, 0.0)
  bias = jnp.concatenate([ctx_bias, self_bias], axis=-1)             # (tq, Lp) f32

  acc_ref[...] = jnp.zeros_like(acc_ref)
  attn_ref[...] = jnp.zeros_like(attn_ref)

  # ---- head-chunked joint-softmax attention (bounds the (Hc, tq, Lp) live set)
  @pl.loop(0, n_chunks)
  def _(c):
    h0 = pl.multiple_of(c * head_chunk, head_chunk)
    qh = q_scr[pl.ds(h0, head_chunk)]                 # (Hc, tq, dh) bf16
    Kc = k_ref[0, pl.ds(h0, head_chunk)]              # (Hc, Lp, dh) bf16
    Vc = v_ref[0, pl.ds(h0, head_chunk)]
    s = jnp.einsum("htd,hld->htl", qh, Kc,
                   preferred_element_type=jnp.float32) + bias[None, :, :]
    mx = jnp.max(s, axis=-1, keepdims=True)
    e = jnp.exp(s - mx)                               # f32 (v5e-safe)
    p = e * pl.reciprocal(jnp.sum(e, axis=-1, keepdims=True), approx=True)
    ctx = jnp.einsum("htl,hld->htd", p.astype(jnp.bfloat16), Vc,
                     preferred_element_type=jnp.float32)  # (Hc, tq, dh) f32
    ctx_m = jnp.transpose(ctx, (1, 0, 2)).reshape(tq, cdh).astype(jnp.bfloat16)
    r0 = pl.multiple_of(c * cdh, cdh)
    wo_c = wo_ref[pl.ds(r0, cdh), :]                  # (Hc*dh, D) bf16
    acc_ref[...] += jnp.dot(ctx_m, wo_c, preferred_element_type=jnp.float32)
    attn_ref[0] += jnp.sum(p[:, :, :ctx_pad], axis=0)

  # ---- output projection bias, residual, layer_norm_2 + GPT MLP ---------------
  attn_out = acc_ref[...] + bo_ref[...]
  qres = attn_out + xq                                # dropout = identity (eval)

  qn = _layer_norm(qres, ln2_g_ref[...], ln2_b_ref[...])
  h1 = jnp.dot(qn.astype(jnp.bfloat16), w1_ref[...],
               preferred_element_type=jnp.float32) + b1_ref[...]
  h1 = jax.nn.gelu(h1, approximate=True)
  h2 = jnp.dot(h1.astype(jnp.bfloat16), w2_ref[...],
               preferred_element_type=jnp.float32) + b2_ref[...]
  out_ref[0] = (h2 + qres).astype(out_ref.dtype)

  # head-averaged attention over context columns (padded lanes are exactly 0)
  attn_ref[0] = attn_ref[0] * (1.0 / heads)


def _round_up(x, m):
  return ((x + m - 1) // m) * m


def _pick_tq(T, cap=256):
  """Largest divisor of T <= cap, preferring multiples of 128, else of 8."""
  if T <= cap:
    return T
  best = None
  for cand in range(min(cap, T), 7, -1):
    if T % cand:
      continue
    if cand % 128 == 0:
      return cand
    if best is None and cand % 8 == 0:
      best = cand
  return best if best is not None else T


def _pick_head_chunk(heads, dh, tq, Lp, budget_bytes):
  """Largest divisor of `heads` whose ~3 live (Hc, tq, Lp) f32 copies fit budget.
  Requires (Hc*dh) % 16 == 0 (bf16 sublane-aligned W_o row slices) unless Hc==heads."""
  cands = [hc for hc in range(heads, 0, -1)
           if heads % hc == 0 and (hc == heads or (hc * dh) % 16 == 0)]
  for hc in cands:
    if 3 * hc * tq * Lp * 4 <= budget_bytes:
      return hc
  return cands[-1]


def _vmem_limit_bytes():
  try:
    cap = int(pltpu.get_tpu_info().vmem_capacity_bytes)
    return int(cap * 0.8)          # ~51 MiB on v7x, ~102 MiB on v5e/v6e
  except Exception:
    return 64 * 1024 * 1024


def transformer_gpt_decoder_layer_psa(inputs, memory_bank, src_pad_mask,
                                      tgt_pad_mask, params, *, heads, num_src,
                                      tq=None):
  """inputs: (B,T,D) f32, memory_bank: (B,num_src,S,D) f32,
     src_pad_mask: (B,num_src,S) bool (True=pad),
     tgt_pad_mask: (B,1,T)       bool (True=pad).  step=None training path."""
  B, T, D = inputs.shape
  S = memory_bank.shape[2]
  dh = D // heads
  CTX = num_src * S
  CTX_pad = _round_up(CTX, 128)
  Lp = CTX_pad + T
  if tq is None:
    tq = _pick_tq(T)
  assert T % tq == 0
  QT = T // tq
  scale = 1.0 / math.sqrt(dh)

  vmem_limit = _vmem_limit_bytes()
  head_chunk = _pick_head_chunk(heads, dh, tq, Lp, vmem_limit // 4)

  # ---- joint K/V projection hoisted out of the attention kernel (XLA einsums) --
  xn = _layer_norm(inputs, params["ln1_g"][0], params["ln1_b"][0])
  k_self = xn @ params["wks"] + params["bks"]
  v_self = xn @ params["wvs"] + params["bvs"]
  kc = jnp.einsum("bnsd,nde->bnse", memory_bank, params["wkc"]) \
      + params["bkc"][None, :, None, :]
  vc = jnp.einsum("bnsd,nde->bnse", memory_bank, params["wvc"]) \
      + params["bvc"][None, :, None, :]

  def joint_heads(ctx_part, self_part):
    c = ctx_part.reshape(B, CTX, D)
    if CTX_pad > CTX:
      c = jnp.concatenate(
          [c, jnp.zeros((B, CTX_pad - CTX, D), c.dtype)], axis=1)
    j = jnp.concatenate([c, self_part], axis=1)                      # (B, Lp, D)
    return j.reshape(B, Lp, heads, dh).transpose(0, 2, 1, 3).astype(jnp.bfloat16)

  k_h = joint_heads(kc, k_self)                                      # (B,H,Lp,dh)
  v_h = joint_heads(vc, v_self)

  # compact pad masks (padded ctx lanes forced to "pad" -> -1e9 -> prob 0)
  src_pad_f = src_pad_mask.reshape(B, 1, CTX).astype(jnp.float32)
  if CTX_pad > CTX:
    src_pad_f = jnp.concatenate(
        [src_pad_f, jnp.ones((B, 1, CTX_pad - CTX), jnp.float32)], axis=-1)
  tgt_pad_f = tgt_pad_mask.reshape(B, 1, T).astype(jnp.float32)

  bf16 = lambda w: w.astype(jnp.bfloat16)
  weights = [
      params["ln1_g"], params["ln1_b"], params["ln2_g"], params["ln2_b"],
      bf16(params["wq"] * scale), params["bq"] * scale,
      bf16(params["wo"]), params["bo"],
      bf16(params["w1"]), params["b1"],
      bf16(params["w2"]), params["b2"],
  ]

  out_shape = (
      jax.ShapeDtypeStruct((B, T, D), jnp.float32),
      jax.ShapeDtypeStruct((B, T, CTX_pad), jnp.float32),
  )
  out_specs = (
      pl.BlockSpec((1, tq, D), lambda b, q: (b, q, 0)),
      pl.BlockSpec((1, tq, CTX_pad), lambda b, q: (b, q, 0)),
  )
  data_specs = [
      pl.BlockSpec((1, tq, D), lambda b, q: (b, q, 0)),              # x query tile
      pl.BlockSpec((1, heads, Lp, dh), lambda b, q: (b, 0, 0, 0)),   # joint K
      pl.BlockSpec((1, heads, Lp, dh), lambda b, q: (b, 0, 0, 0)),   # joint V
      pl.BlockSpec((1, 1, CTX_pad), lambda b, q: (b, 0, 0)),         # src pad mask
      pl.BlockSpec((1, 1, T), lambda b, q: (b, 0, 0)),               # tgt pad mask
  ]

  kernel = functools.partial(decoder_layer_kernel, heads=heads,
                             head_chunk=head_chunk, ctx_pad=CTX_pad)

  def run(single_buffer_weights):
    def w_spec(w):
      nd = w.ndim
      idx = lambda b, q, _nd=nd: (0,) * _nd
      if single_buffer_weights:
        # constant-index weight blocks: single buffer (no pointless double-buffer)
        return pl.BlockSpec(w.shape, idx, pipeline_mode=pl.Buffered(1))
      return pl.BlockSpec(w.shape, idx)

    call = pl.pallas_call(
        kernel,
        out_shape=out_shape,
        grid_spec=pltpu.PrefetchScalarGridSpec(
            num_scalar_prefetch=0,
            grid=(B, QT),
            in_specs=data_specs + [w_spec(w) for w in weights],
            out_specs=out_specs,
            scratch_shapes=[
                pltpu.VMEM((heads, tq, dh), jnp.bfloat16),  # head-major Q
                pltpu.VMEM((tq, D), jnp.float32),           # W_o projection acc
            ]),
        compiler_params=pltpu.CompilerParams(
            # K/V build is hoisted -> no cross-step carry -> both axes parallel
            dimension_semantics=("parallel", "parallel"),
            vmem_limit_bytes=vmem_limit),
    )
    return call(inputs, k_h, v_h, src_pad_f, tgt_pad_f, *weights)

  try:
    out, attn = run(True)
    jax.block_until_ready((out, attn))
  except Exception:
    # TODO(synk): pl.Buffered(1) (single-buffered constant weight blocks) rejected
    # by this jax/Mosaic version; falling back to default double buffering.
    out, attn = run(False)
  return out, attn[:, :, :CTX]


def init_params(key, d_model, num_src):
  d_ff = 4 * d_model
  ks = jax.random.split(key, 20)

  def w(k, shape):
    return (0.02 * jax.random.normal(k, shape)).astype(jnp.float32)

  return dict(
      ln1_g=(1.0 + 0.01 * jax.random.normal(ks[0], (1, d_model))).astype(jnp.float32),
      ln1_b=w(ks[1], (1, d_model)),
      ln2_g=(1.0 + 0.01 * jax.random.normal(ks[2], (1, d_model))).astype(jnp.float32),
      ln2_b=w(ks[3], (1, d_model)),
      wq=w(ks[4], (d_model, d_model)), bq=w(ks[5], (1, d_model)),
      wks=w(ks[6], (d_model, d_model)), bks=w(ks[7], (1, d_model)),
      wvs=w(ks[8], (d_model, d_model)), bvs=w(ks[9], (1, d_model)),
      wkc=w(ks[10], (num_src, d_model, d_model)), bkc=w(ks[11], (num_src, d_model)),
      wvc=w(ks[12], (num_src, d_model, d_model)), bvc=w(ks[13], (num_src, d_model)),
      wo=w(ks[14], (d_model, d_model)), bo=w(ks[15], (1, d_model)),
      w1=w(ks[16], (d_model, d_ff)), b1=w(ks[17], (1, d_ff)),
      w2=w(ks[18], (d_ff, d_model)), b2=w(ks[19], (1, d_model)),
  )


def reference_forward(inputs, memory_bank, src_pad_mask, tgt_pad_mask, params,
                      *, heads, num_src):
  B, T, D = inputs.shape
  S = memory_bank.shape[2]
  dh = D // heads
  CTX = num_src * S
  future = jnp.triu(jnp.ones((T, T), jnp.int32), k=1)[None]
  dec_mask = (tgt_pad_mask.astype(jnp.int32) + future) > 0
  ctx_mask = jnp.broadcast_to(src_pad_mask.reshape(B, 1, CTX), (B, T, CTX))
  bias = jnp.where(jnp.concatenate([ctx_mask, dec_mask], axis=-1), -1e9, 0.0)

  def ln(v, g, b):
    mu = v.mean(-1, keepdims=True)
    var = ((v - mu) ** 2).mean(-1, keepdims=True)
    return (v - mu) / jnp.sqrt(var + 1e-5) * g + b

  xn = ln(inputs, params["ln1_g"][0], params["ln1_b"][0])
  q = xn @ params["wq"] + params["bq"][0]
  ksf = xn @ params["wks"] + params["bks"][0]
  vsf = xn @ params["wvs"] + params["bvs"][0]
  Ks = [memory_bank[:, s] @ params["wkc"][s] + params["bkc"][s] for s in range(num_src)]
  Vs = [memory_bank[:, s] @ params["wvc"][s] + params["bvc"][s] for s in range(num_src)]
  K = jnp.concatenate(Ks + [ksf], axis=1)
  V = jnp.concatenate(Vs + [vsf], axis=1)
  qh = q.reshape(B, T, heads, dh).transpose(0, 2, 1, 3)
  kh = K.reshape(B, -1, heads, dh).transpose(0, 2, 1, 3)
  vh = V.reshape(B, -1, heads, dh).transpose(0, 2, 1, 3)
  sc = jnp.einsum("bhtd,bhld->bhtl", qh, kh) / math.sqrt(dh) + bias[:, None]
  p = jax.nn.softmax(sc, axis=-1)
  ctx = jnp.einsum("bhtl,bhld->bhtd", p, vh).transpose(0, 2, 1, 3).reshape(B, T, D)
  attn_out = ctx @ params["wo"] + params["bo"][0]
  qres = attn_out + inputs
  qn = ln(qres, params["ln2_g"][0], params["ln2_b"][0])
  h = jax.nn.gelu(qn @ params["w1"] + params["b1"][0], approximate=True)
  out = h @ params["w2"] + params["b2"][0] + qres
  return out, p.mean(axis=1)[:, :, :CTX]


if __name__ == "__main__":
  B, T, S, D, H, NSRC = 2, 8, 16, 32, 4, 2
  key = jax.random.PRNGKey(0)
  k_in, k_mem, k_p = jax.random.split(key, 3)

  inputs = jax.random.normal(k_in, (B, T, D), jnp.float32)
  memory_bank = jax.random.normal(k_mem, (B, NSRC, S, D), jnp.float32)
  src_pad_mask = jnp.zeros((B, NSRC, S), jnp.bool_).at[1, 1, -4:].set(True)
  tgt_pad_mask = jnp.zeros((B, 1, T), jnp.bool_)
  params = init_params(k_p, D, NSRC)

  out, attn = transformer_gpt_decoder_layer_psa(
      inputs, memory_bank, src_pad_mask, tgt_pad_mask, params,
      heads=H, num_src=NSRC)
  jax.block_until_ready((out, attn))

  ref_out, ref_attn = reference_forward(
      inputs, memory_bank, src_pad_mask, tgt_pad_mask, params,
      heads=H, num_src=NSRC)
  # tolerances loosened vs. pure f32: matmul inputs are bf16 and the softmax
  # denominator uses the EUP approximate reciprocal.
  np.testing.assert_allclose(np.asarray(out), np.asarray(ref_out),
                             rtol=2e-2, atol=2e-2)
  np.testing.assert_allclose(np.asarray(attn), np.asarray(ref_attn),
                             rtol=2e-2, atol=5e-3)

  print("KERNEL_OK")
</pallas_src>

<mosaic_0001>
module attributes {stable_mosaic.version = 11 : i64} {
  func.func @decoder_layer_kernel(%arg0: i32, %arg1: i32, %arg2: memref<1x8x32xf32, #tpu.memory_space<vmem>>, %arg3: memref<1x4x136x8xbf16, #tpu.memory_space<vmem>>, %arg4: memref<1x4x136x8xbf16, #tpu.memory_space<vmem>>, %arg5: memref<1x1x128xf32, #tpu.memory_space<vmem>>, %arg6: memref<1x1x8xf32, #tpu.memory_space<vmem>>, %arg7: memref<1x32xf32, #tpu.memory_space<vmem>>, %arg8: memref<1x32xf32, #tpu.memory_space<vmem>>, %arg9: memref<1x32xf32, #tpu.memory_space<vmem>>, %arg10: memref<1x32xf32, #tpu.memory_space<vmem>>, %arg11: memref<32x32xbf16, #tpu.memory_space<vmem>>, %arg12: memref<1x32xf32, #tpu.memory_space<vmem>>, %arg13: memref<32x32xbf16, #tpu.memory_space<vmem>>, %arg14: memref<1x32xf32, #tpu.memory_space<vmem>>, %arg15: memref<32x128xbf16, #tpu.memory_space<vmem>>, %arg16: memref<1x128xf32, #tpu.memory_space<vmem>>, %arg17: memref<128x32xbf16, #tpu.memory_space<vmem>>, %arg18: memref<1x32xf32, #tpu.memory_space<vmem>>, %arg19: memref<1x8x32xf32, #tpu.memory_space<vmem>>, %arg20: memref<1x8x128xf32, #tpu.memory_space<vmem>>, %arg21: memref<4x8x8xbf16, #tpu.memory_space<vmem>>, %arg22: memref<8x32xf32, #tpu.memory_space<vmem>>) attributes {dimension_semantics = [#tpu.dimension_semantics<parallel>, #tpu.dimension_semantics<parallel>], iteration_bounds = array<i64: 2, 1>, scalar_prefetch = 0 : i64, scratch_operands = 2 : i64, tpu.core_type = #tpu.core_type<tc>, window_params = [{transform_indices = @transform_0, window_bounds = array<i64: 1, 8, 32>}, {transform_indices = @transform_1, window_bounds = array<i64: 1, 4, 136, 8>}, {transform_indices = @transform_2, window_bounds = array<i64: 1, 4, 136, 8>}, {transform_indices = @transform_3, window_bounds = array<i64: 1, 1, 128>}, {transform_indices = @transform_4, window_bounds = array<i64: 1, 1, 8>}, {pipeline_mode = #tpu.pipeline_mode<synchronous>, transform_indices = @transform_5, window_bounds = array<i64: 1, 32>}, {pipeline_mode = #tpu.pipeline_mode<synchronous>, transform_indices = @transform_6, window_bounds = array<i64: 1, 32>}, {pipeline_mode = #tpu.pipeline_mode<synchronous>, transform_indices = @transform_7, window_bounds = array<i64: 1, 32>}, {pipeline_mode = #tpu.pipeline_mode<synchronous>, transform_indices = @transform_8, window_bounds = array<i64: 1, 32>}, {pipeline_mode = #tpu.pipeline_mode<synchronous>, transform_indices = @transform_9, window_bounds = array<i64: 32, 32>}, {pipeline_mode = #tpu.pipeline_mode<synchronous>, transform_indices = @transform_10, window_bounds = array<i64: 1, 32>}, {pipeline_mode = #tpu.pipeline_mode<synchronous>, transform_indices = @transform_11, window_bounds = array<i64: 32, 32>}, {pipeline_mode = #tpu.pipeline_mode<synchronous>, transform_indices = @transform_12, window_bounds = array<i64: 1, 32>}, {pipeline_mode = #tpu.pipeline_mode<synchronous>, transform_indices = @transform_13, window_bounds = array<i64: 32, 128>}, {pipeline_mode = #tpu.pipeline_mode<synchronous>, transform_indices = @transform_14, window_bounds = array<i64: 1, 128>}, {pipeline_mode = #tpu.pipeline_mode<synchronous>, transform_indices = @transform_15, window_bounds = array<i64: 128, 32>}, {pipeline_mode = #tpu.pipeline_mode<synchronous>, transform_indices = @transform_16, window_bounds = array<i64: 1, 32>}, {transform_indices = @transform_17, window_bounds = array<i64: 1, 8, 32>}, {transform_indices = @transform_18, window_bounds = array<i64: 1, 8, 128>}]} {
    %c0 = arith.constant 0 : index
    %c0_0 = arith.constant 0 : index
    %c0_1 = arith.constant 0 : index
    %0 = vector.load %arg2[%c0, %c0_0, %c0_1] : memref<1x8x32xf32, #tpu.memory_space<vmem>>, vector<1x8x32xf32>
    %1 = vector.shape_cast %0 : vector<1x8x32xf32> to vector<8x32xf32>
    %c0_2 = arith.constant 0 : index
    %c0_3 = arith.constant 0 : index
    %2 = vector.load %arg7[%c0_2, %c0_3] : memref<1x32xf32, #tpu.memory_space<vmem>>, vector<1x32xf32>
    %c0_4 = arith.constant 0 : index
    %c0_5 = arith.constant 0 : index
    %3 = vector.load %arg8[%c0_4, %c0_5] : memref<1x32xf32, #tpu.memory_space<vmem>>, vector<1x32xf32>
    %cst = arith.constant dense<0.000000e+00> : vector<8xf32>
    %4 = vector.multi_reduction <add>, %1, %cst [1] : vector<8x32xf32> to vector<8xf32>
    %5 = vector.shape_cast %4 : vector<8xf32> to vector<8x1xf32>
    %cst_6 = arith.constant 3.200000e+01 : f32
    %6 = vector.broadcast %cst_6 : f32 to vector<8x1xf32>
    %7 = arith.divf %5, %6 : vector<8x1xf32>
    %8 = vector.broadcast %7 : vector<8x1xf32> to vector<8x32xf32>
    %9 = arith.subf %1, %8 : vector<8x32xf32>
    %10 = arith.mulf %9, %9 : vector<8x32xf32>
    %cst_7 = arith.constant dense<0.000000e+00> : vector<8xf32>
    %11 = vector.multi_reduction <add>, %10, %cst_7 [1] : vector<8x32xf32> to vector<8xf32>
    %12 = vector.shape_cast %11 : vector<8xf32> to vector<8x1xf32>
    %cst_8 = arith.constant 3.200000e+01 : f32
    %13 = vector.broadcast %cst_8 : f32 to vector<8x1xf32>
    %14 = arith.divf %12, %13 : vector<8x1xf32>
    %15 = vector.broadcast %7 : vector<8x1xf32> to vector<8x32xf32>
    %16 = arith.subf %1, %15 : vector<8x32xf32>
    %cst_9 = arith.constant 9.99999974E-6 : f32
    %17 = vector.broadcast %cst_9 : f32 to vector<8x1xf32>
    %18 = arith.addf %14, %17 : vector<8x1xf32>
    %19 = math.rsqrt %18 : vector<8x1xf32>
    %20 = vector.broadcast %19 : vector<8x1xf32> to vector<8x32xf32>
    %21 = arith.mulf %16, %20 : vector<8x32xf32>
    %22 = vector.broadcast %2 : vector<1x32xf32> to vector<8x32xf32>
    %23 = arith.mulf %21, %22 : vector<8x32xf32>
    %24 = vector.broadcast %3 : vector<1x32xf32> to vector<8x32xf32>
    %25 = arith.addf %23, %24 : vector<8x32xf32>
    %26 = arith.truncf %25 : vector<8x32xf32> to vector<8x32xbf16>
    %c0_10 = arith.constant 0 : index
    %c0_11 = arith.constant 0 : index
    %27 = vector.load %arg11[%c0_10, %c0_11] : memref<32x32xbf16, #tpu.memory_space<vmem>>, vector<32x32xbf16>
    %cst_12 = arith.constant dense<0.000000e+00> : vector<8x32xf32>
    %28 = tpu.matmul %26, %27, %cst_12 {dimension_numbers = #tpu.dot_dimension_numbers<[1], [0], [0], [1], [0, 0, 1, 1], [], []>} : vector<8x32xbf16>, vector<32x32xbf16>, vector<8x32xf32> -> vector<8x32xf32>
    %c0_13 = arith.constant 0 : index
    %c0_14 = arith.constant 0 : index
    %29 = vector.load %arg12[%c0_13, %c0_14] : memref<1x32xf32, #tpu.memory_space<vmem>>, vector<1x32xf32>
    %30 = vector.broadcast %29 : vector<1x32xf32> to vector<8x32xf32>
    %31 = arith.addf %28, %30 : vector<8x32xf32>
    %32 = vector.shape_cast %31 : vector<8x32xf32> to vector<8x4x8xf32>
    %33 = tpu.transpose %32, [1, 0, 2] : vector<8x4x8xf32> -> vector<4x8x8xf32>
    %34 = arith.truncf %33 : vector<4x8x8xf32> to vector<4x8x8xbf16>
    %c0_15 = arith.constant 0 : index
    %c0_16 = arith.constant 0 : index
    %c0_17 = arith.constant 0 : index
    %35 = vector.load %arg21[%c0_15, %c0_16, %c0_17] : memref<4x8x8xbf16, #tpu.memory_space<vmem>>, vector<4x8x8xbf16>
    tpu.vector_store %arg21[%c0_15, %c0_16, %c0_17], %34 {strides = array<i32>} : memref<4x8x8xbf16, #tpu.memory_space<vmem>>, vector<4x8x8xbf16>,
    %c0_18 = arith.constant 0 : index
    %c0_19 = arith.constant 0 : index
    %c0_20 = arith.constant 0 : index
    %36 = vector.load %arg5[%c0_18, %c0_19, %c0_20] : memref<1x1x128xf32, #tpu.memory_space<vmem>>, vector<1x1x128xf32>
    %37 = vector.shape_cast %36 : vector<1x1x128xf32> to vector<1x128xf32>
    %cst_21 = arith.constant 5.000000e-01 : f32
    %38 = vector.broadcast %cst_21 : f32 to vector<1x128xf32>
    %39 = arith.cmpf ogt, %37, %38 : vector<1x128xf32>
    %cst_22 = arith.constant -1.000000e+09 : f32
    %cst_23 = arith.constant 0.000000e+00 : f32
    %40 = vector.broadcast %cst_22 : f32 to vector<1x128xf32>
    %41 = vector.broadcast %cst_23 : f32 to vector<1x128xf32>
    %42 = arith.select %39, %40, %41 : vector<1x128xi1>, vector<1x128xf32>
    %43 = vector.shape_cast %42 : vector<1x128xf32> to vector<1x128xf32>
    %44 = vector.broadcast %43 : vector<1x128xf32> to vector<8x128xf32>
    %45 = tpu.iota {dimensions = array<i32: 0>} : vector<8x8xi32>
    %c8_i32 = arith.constant 8 : i32
    %46 = arith.muli %arg1, %c8_i32 : i32
    %47 = vector.broadcast %46 : i32 to vector<8x8xi32>
    %48 = arith.addi %45, %47 : vector<8x8xi32>
    %49 = tpu.iota {dimensions = array<i32: 1>} : vector<8x8xi32>
    %50 = arith.cmpi sgt, %49, %48 : vector<8x8xi32>
    %c0_24 = arith.constant 0 : index
    %c0_25 = arith.constant 0 : index
    %c0_26 = arith.constant 0 : index
    %51 = vector.load %arg6[%c0_24, %c0_25, %c0_26] : memref<1x1x8xf32, #tpu.memory_space<vmem>>, vector<1x1x8xf32>
    %52 = vector.shape_cast %51 : vector<1x1x8xf32> to vector<1x8xf32>
    %cst_27 = arith.constant 5.000000e-01 : f32
    %53 = vector.broadcast %cst_27 : f32 to vector<1x8xf32>
    %54 = arith.cmpf ogt, %52, %53 : vector<1x8xf32>
    %55 = vector.shape_cast %54 : vector<1x8xi1> to vector<1x8xi1>
    %56 = vector.broadcast %55 : vector<1x8xi1> to vector<8x8xi1>
    %57 = arith.ori %50, %56 : vector<8x8xi1>
    %cst_28 = arith.constant -1.000000e+09 : f32
    %cst_29 = arith.constant 0.000000e+00 : f32
    %58 = vector.broadcast %cst_28 : f32 to vector<8x8xf32>
    %59 = vector.broadcast %cst_29 : f32 to vector<8x8xf32>
    %60 = arith.select %57, %58, %59 : vector<8x8xi1>, vector<8x8xf32>
    %61 = tpu.concatenate %44, %60 in 1 : vector<8x128xf32>, vector<8x8xf32> -> vector<8x136xf32>
    %cst_30 = arith.constant 0.000000e+00 : f32
    %62 = vector.broadcast %cst_30 : f32 to vector<8x32xf32>
    %c0_31 = arith.constant 0 : index
    %c0_32 = arith.constant 0 : index
    %63 = vector.load %arg22[%c0_31, %c0_32] : memref<8x32xf32, #tpu.memory_space<vmem>>, vector<8x32xf32>
    tpu.vector_store %arg22[%c0_31, %c0_32], %62 {strides = array<i32>} : memref<8x32xf32, #tpu.memory_space<vmem>>, vector<8x32xf32>,
    %cst_33 = arith.constant 0.000000e+00 : f32
    %64 = vector.broadcast %cst_33 : f32 to vector<1x8x128xf32>
    %c0_34 = arith.constant 0 : index
    %c0_35 = arith.constant 0 : index
    %c0_36 = arith.constant 0 : index
    %65 = vector.load %arg20[%c0_34, %c0_35, %c0_36] : memref<1x8x128xf32, #tpu.memory_space<vmem>>, vector<1x8x128xf32>
    tpu.vector_store %arg20[%c0_34, %c0_35, %c0_36], %64 {strides = array<i32>} : memref<1x8x128xf32, #tpu.memory_space<vmem>>, vector<1x8x128xf32>,
    %c0_i32 = arith.constant 0 : i32
    %c1_i32 = arith.constant 1 : i32
    %66 = arith.muli %c0_i32, %c1_i32 : i32
    %c0_i32_37 = arith.constant 0 : i32
    %67 = arith.addi %c0_i32_37, %66 : i32
    %c4_i32 = arith.constant 4 : i32
    %68 = arith.muli %67, %c4_i32 : i32
    %69 = tpu.assume_multiple %68, 4 : i32
    %70 = arith.index_cast %69 : i32 to index
    %c0_38 = arith.constant 0 : index
    %c0_39 = arith.constant 0 : index
    %71 = vector.load %arg21[%70, %c0_38, %c0_39] : memref<4x8x8xbf16, #tpu.memory_space<vmem>>, vector<4x8x8xbf16>
    %c0_40 = arith.constant 0 : index
    %72 = arith.index_cast %69 : i32 to index
    %c0_41 = arith.constant 0 : index
    %c0_42 = arith.constant 0 : index
    %73 = vector.load %arg3[%c0_40, %72, %c0_41, %c0_42] : memref<1x4x136x8xbf16, #tpu.memory_space<vmem>>, vector<1x4x136x8xbf16>
    %74 = vector.shape_cast %73 : vector<1x4x136x8xbf16> to vector<4x136x8xbf16>
    %c0_43 = arith.constant 0 : index
    %75 = arith.index_cast %69 : i32 to index
    %c0_44 = arith.constant 0 : index
    %c0_45 = arith.constant 0 : index
    %76 = vector.load %arg4[%c0_43, %75, %c0_44, %c0_45] : memref<1x4x136x8xbf16, #tpu.memory_space<vmem>>, vector<1x4x136x8xbf16>
    %77 = vector.shape_cast %76 : vector<1x4x136x8xbf16> to vector<4x136x8xbf16>
    "tpu.trace_start"() <{level = 10 : i32, message = "htd,hld->htl"}> : () -> ()
    %cst_46 = arith.constant dense<0.000000e+00> : vector<4x8x136xf32>
    %78 = tpu.matmul %71, %74, %cst_46 {dimension_numbers = #tpu.dot_dimension_numbers<[2], [2], [1], [1], [0, 0, 0, 1, 1, 1], [0], [0]>} : vector<4x8x8xbf16>, vector<4x136x8xbf16>, vector<4x8x136xf32> -> vector<4x8x136xf32>
    "tpu.trace_stop"() : () -> ()
    %79 = vector.shape_cast %61 : vector<8x136xf32> to vector<1x8x136xf32>
    %80 = vector.broadcast %79 : vector<1x8x136xf32> to vector<4x8x136xf32>
    %81 = arith.addf %78, %80 : vector<4x8x136xf32>
    %cst_47 = arith.constant dense<0xFF800000> : vector<4x8xf32>
    %82 = vector.multi_reduction <maximumf>, %81, %cst_47 [2] : vector<4x8x136xf32> to vector<4x8xf32>
    %83 = vector.shape_cast %82 : vector<4x8xf32> to vector<4x8x1xf32>
    %84 = vector.broadcast %83 : vector<4x8x1xf32> to vector<4x8x136xf32>
    %85 = arith.subf %81, %84 : vector<4x8x136xf32>
    %86 = math.exp %85 : vector<4x8x136xf32>
    %cst_48 = arith.constant dense<0.000000e+00> : vector<4x8xf32>
    %87 = vector.multi_reduction <add>, %86, %cst_48 [2] : vector<4x8x136xf32> to vector<4x8xf32>
    %88 = vector.shape_cast %87 : vector<4x8xf32> to vector<4x8x1xf32>
    %89 = tpu.reciprocal %88 {approx = true} : vector<4x8x1xf32> -> vector<4x8x1xf32>
    %90 = vector.broadcast %89 : vector<4x8x1xf32> to vector<4x8x136xf32>
    %91 = arith.mulf %86, %90 : vector<4x8x136xf32>
    %92 = arith.truncf %91 : vector<4x8x136xf32> to vector<4x8x136xbf16>
    "tpu.trace_start"() <{level = 10 : i32, message = "htl,hld->htd"}> : () -> ()
    %cst_49 = arith.constant dense<0.000000e+00> : vector<4x8x8xf32>
    %93 = tpu.matmul %92, %77, %cst_49 {dimension_numbers = #tpu.dot_dimension_numbers<[2], [1], [1], [2], [0, 0, 0, 1, 1, 2], [0], [0]>} : vector<4x8x136xbf16>, vector<4x136x8xbf16>, vector<4x8x8xf32> -> vector<4x8x8xf32>
    "tpu.trace_stop"() : () -> ()
    %94 = tpu.transpose %93, [1, 0, 2] : vector<4x8x8xf32> -> vector<8x4x8xf32>
    %95 = vector.shape_cast %94 : vector<8x4x8xf32> to vector<8x32xf32>
    %96 = arith.truncf %95 : vector<8x32xf32> to vector<8x32xbf16>
    %c32_i32 = arith.constant 32 : i32
    %97 = arith.muli %67, %c32_i32 : i32
    %98 = tpu.assume_multiple %97, 32 : i32
    %99 = arith.index_cast %98 : i32 to index
    %c0_50 = arith.constant 0 : index
    %100 = vector.load %arg13[%99, %c0_50] : memref<32x32xbf16, #tpu.memory_space<vmem>>, vector<32x32xbf16>
    %c0_51 = arith.constant 0 : index
    %c0_52 = arith.constant 0 : index
    %101 = vector.load %arg22[%c0_51, %c0_52] : memref<8x32xf32, #tpu.memory_space<vmem>>, vector<8x32xf32>
    %cst_53 = arith.constant dense<0.000000e+00> : vector<8x32xf32>
    %102 = tpu.matmul %96, %100, %cst_53 {dimension_numbers = #tpu.dot_dimension_numbers<[1], [0], [0], [1], [0, 0, 1, 1], [], []>} : vector<8x32xbf16>, vector<32x32xbf16>, vector<8x32xf32> -> vector<8x32xf32>
    %103 = arith.addf %101, %102 : vector<8x32xf32>
    %c0_54 = arith.constant 0 : index
    %c0_55 = arith.constant 0 : index
    %104 = vector.load %arg22[%c0_54, %c0_55] : memref<8x32xf32, #tpu.memory_space<vmem>>, vector<8x32xf32>
    tpu.vector_store %arg22[%c0_54, %c0_55], %103 {strides = array<i32>} : memref<8x32xf32, #tpu.memory_space<vmem>>, vector<8x32xf32>,
    %c0_56 = arith.constant 0 : index
    %c0_57 = arith.constant 0 : index
    %c0_58 = arith.constant 0 : index
    %105 = vector.load %arg20[%c0_56, %c0_57, %c0_58] : memref<1x8x128xf32, #tpu.memory_space<vmem>>, vector<1x8x128xf32>
    %106 = vector.shape_cast %105 : vector<1x8x128xf32> to vector<8x128xf32>
    %107 = vector.extract_strided_slice %91 {offsets = [0, 0, 0], sizes = [4, 8, 128], strides = [1, 1, 1]} : vector<4x8x136xf32> to vector<4x8x128xf32>
    %cst_59 = arith.constant dense<0.000000e+00> : vector<8x128xf32>
    %108 = vector.multi_reduction <add>, %107, %cst_59 [0] : vector<4x8x128xf32> to vector<8x128xf32>
    %109 = arith.addf %106, %108 : vector<8x128xf32>
    %c0_60 = arith.constant 0 : index
    %c0_61 = arith.constant 0 : index
    %c0_62 = arith.constant 0 : index
    %110 = vector.load %arg20[%c0_60, %c0_61, %c0_62] : memref<1x8x128xf32, #tpu.memory_space<vmem>>, vector<1x8x128xf32>
    %111 = vector.shape_cast %110 : vector<1x8x128xf32> to vector<8x128xf32>
    %112 = vector.shape_cast %109 : vector<8x128xf32> to vector<1x8x128xf32>
    tpu.vector_store %arg20[%c0_60, %c0_61, %c0_62], %112 {strides = array<i32>} : memref<1x8x128xf32, #tpu.memory_space<vmem>>, vector<1x8x128xf32>,
    %c1_i32_63 = arith.constant 1 : i32
    %c0_64 = arith.constant 0 : index
    %c0_65 = arith.constant 0 : index
    %113 = vector.load %arg22[%c0_64, %c0_65] : memref<8x32xf32, #tpu.memory_space<vmem>>, vector<8x32xf32>
    %c0_66 = arith.constant 0 : index
    %c0_67 = arith.constant 0 : index
    %114 = vector.load %arg14[%c0_66, %c0_67] : memref<1x32xf32, #tpu.memory_space<vmem>>, vector<1x32xf32>
    %115 = vector.broadcast %114 : vector<1x32xf32> to vector<8x32xf32>
    %116 = arith.addf %113, %115 : vector<8x32xf32>
    %117 = arith.addf %116, %1 : vector<8x32xf32>
    %c0_68 = arith.constant 0 : index
    %c0_69 = arith.constant 0 : index
    %118 = vector.load %arg9[%c0_68, %c0_69] : memref<1x32xf32, #tpu.memory_space<vmem>>, vector<1x32xf32>
    %c0_70 = arith.constant 0 : index
    %c0_71 = arith.constant 0 : index
    %119 = vector.load %arg10[%c0_70, %c0_71] : memref<1x32xf32, #tpu.memory_space<vmem>>, vector<1x32xf32>
    %cst_72 = arith.constant dense<0.000000e+00> : vector<8xf32>
    %120 = vector.multi_reduction <add>, %117, %cst_72 [1] : vector<8x32xf32> to vector<8xf32>
    %121 = vector.shape_cast %120 : vector<8xf32> to vector<8x1xf32>
    %cst_73 = arith.constant 3.200000e+01 : f32
    %122 = vector.broadcast %cst_73 : f32 to vector<8x1xf32>
    %123 = arith.divf %121, %122 : vector<8x1xf32>
    %124 = vector.broadcast %123 : vector<8x1xf32> to vector<8x32xf32>
    %125 = arith.subf %117, %124 : vector<8x32xf32>
    %126 = arith.mulf %125, %125 : vector<8x32xf32>
    %cst_74 = arith.constant dense<0.000000e+00> : vector<8xf32>
    %127 = vector.multi_reduction <add>, %126, %cst_74 [1] : vector<8x32xf32> to vector<8xf32>
    %128 = vector.shape_cast %127 : vector<8xf32> to vector<8x1xf32>
    %cst_75 = arith.constant 3.200000e+01 : f32
    %129 = vector.broadcast %cst_75 : f32 to vector<8x1xf32>
    %130 = arith.divf %128, %129 : vector<8x1xf32>
    %131 = vector.broadcast %123 : vector<8x1xf32> to vector<8x32xf32>
    %132 = arith.subf %117, %131 : vector<8x32xf32>
    %cst_76 = arith.constant 9.99999974E-6 : f32
    %133 = vector.broadcast %cst_76 : f32 to vector<8x1xf32>
    %134 = arith.addf %130, %133 : vector<8x1xf32>
    %135 = math.rsqrt %134 : vector<8x1xf32>
    %136 = vector.broadcast %135 : vector<8x1xf32> to vector<8x32xf32>
    %137 = arith.mulf %132, %136 : vector<8x32xf32>
    %138 = vector.broadcast %118 : vector<1x32xf32> to vector<8x32xf32>
    %139 = arith.mulf %137, %138 : vector<8x32xf32>
    %140 = vector.broadcast %119 : vector<1x32xf32> to vector<8x32xf32>
    %141 = arith.addf %139, %140 : vector<8x32xf32>
    %142 = arith.truncf %141 : vector<8x32xf32> to vector<8x32xbf16>
    %c0_77 = arith.constant 0 : index
    %c0_78 = arith.constant 0 : index
    %143 = vector.load %arg15[%c0_77, %c0_78] : memref<32x128xbf16, #tpu.memory_space<vmem>>, vector<32x128xbf16>
    %cst_79 = arith.constant dense<0.000000e+00> : vector<8x128xf32>
    %144 = tpu.matmul %142, %143, %cst_79 {dimension_numbers = #tpu.dot_dimension_numbers<[1], [0], [0], [1], [0, 0, 1, 1], [], []>} : vector<8x32xbf16>, vector<32x128xbf16>, vector<8x128xf32> -> vector<8x128xf32>
    %c0_80 = arith.constant 0 : index
    %c0_81 = arith.constant 0 : index
    %145 = vector.load %arg16[%c0_80, %c0_81] : memref<1x128xf32, #tpu.memory_space<vmem>>, vector<1x128xf32>
    %146 = vector.broadcast %145 : vector<1x128xf32> to vector<8x128xf32>
    %147 = arith.addf %144, %146 : vector<8x128xf32>
    %148 = arith.mulf %147, %147 : vector<8x128xf32>
    %149 = arith.mulf %147, %148 : vector<8x128xf32>
    %cst_82 = arith.constant 4.471500e-02 : f32
    %150 = vector.broadcast %cst_82 : f32 to vector<8x128xf32>
    %151 = arith.mulf %150, %149 : vector<8x128xf32>
    %152 = arith.addf %147, %151 : vector<8x128xf32>
    %cst_83 = arith.constant 0.797884583 : f32
    %153 = vector.broadcast %cst_83 : f32 to vector<8x128xf32>
    %154 = arith.mulf %153, %152 : vector<8x128xf32>
    %155 = math.tanh %154 : vector<8x128xf32>
    %cst_84 = arith.constant 1.000000e+00 : f32
    %156 = vector.broadcast %cst_84 : f32 to vector<8x128xf32>
    %157 = arith.addf %156, %155 : vector<8x128xf32>
    %cst_85 = arith.constant 5.000000e-01 : f32
    %158 = vector.broadcast %cst_85 : f32 to vector<8x128xf32>
    %159 = arith.mulf %158, %157 : vector<8x128xf32>
    %160 = arith.mulf %147, %159 : vector<8x128xf32>
    %161 = arith.truncf %160 : vector<8x128xf32> to vector<8x128xbf16>
    %c0_86 = arith.constant 0 : index
    %c0_87 = arith.constant 0 : index
    %162 = vector.load %arg17[%c0_86, %c0_87] : memref<128x32xbf16, #tpu.memory_space<vmem>>, vector<128x32xbf16>
    %cst_88 = arith.constant dense<0.000000e+00> : vector<8x32xf32>
    %163 = tpu.matmul %161, %162, %cst_88 {dimension_numbers = #tpu.dot_dimension_numbers<[1], [0], [0], [1], [0, 0, 1, 1], [], []>} : vector<8x128xbf16>, vector<128x32xbf16>, vector<8x32xf32> -> vector<8x32xf32>
    %c0_89 = arith.constant 0 : index
    %c0_90 = arith.constant 0 : index
    %164 = vector.load %arg18[%c0_89, %c0_90] : memref<1x32xf32, #tpu.memory_space<vmem>>, vector<1x32xf32>
    %165 = vector.broadcast %164 : vector<1x32xf32> to vector<8x32xf32>
    %166 = arith.addf %163, %165 : vector<8x32xf32>
    %167 = arith.addf %166, %117 : vector<8x32xf32>
    %c0_91 = arith.constant 0 : index
    %c0_92 = arith.constant 0 : index
    %c0_93 = arith.constant 0 : index
    %168 = vector.load %arg19[%c0_91, %c0_92, %c0_93] : memref<1x8x32xf32, #tpu.memory_space<vmem>>, vector<1x8x32xf32>
    %169 = vector.shape_cast %168 : vector<1x8x32xf32> to vector<8x32xf32>
    %170 = vector.shape_cast %167 : vector<8x32xf32> to vector<1x8x32xf32>
    tpu.vector_store %arg19[%c0_91, %c0_92, %c0_93], %170 {strides = array<i32>} : memref<1x8x32xf32, #tpu.memory_space<vmem>>, vector<1x8x32xf32>,
    %c0_94 = arith.constant 0 : index
    %c0_95 = arith.constant 0 : index
    %c0_96 = arith.constant 0 : index
    %171 = vector.load %arg20[%c0_94, %c0_95, %c0_96] : memref<1x8x128xf32, #tpu.memory_space<vmem>>, vector<1x8x128xf32>
    %172 = vector.shape_cast %171 : vector<1x8x128xf32> to vector<8x128xf32>
    %cst_97 = arith.constant 2.500000e-01 : f32
    %173 = vector.broadcast %cst_97 : f32 to vector<8x128xf32>
    %174 = arith.mulf %172, %173 : vector<8x128xf32>
    %c0_98 = arith.constant 0 : index
    %c0_99 = arith.constant 0 : index
    %c0_100 = arith.constant 0 : index
    %175 = vector.load %arg20[%c0_98, %c0_99, %c0_100] : memref<1x8x128xf32, #tpu.memory_space<vmem>>, vector<1x8x128xf32>
    %176 = vector.shape_cast %175 : vector<1x8x128xf32> to vector<8x128xf32>
    %177 = vector.shape_cast %174 : vector<8x128xf32> to vector<1x8x128xf32>
    tpu.vector_store %arg20[%c0_98, %c0_99, %c0_100], %177 {strides = array<i32>} : memref<1x8x128xf32, #tpu.memory_space<vmem>>, vector<1x8x128xf32>,
    return
  }
  func.func @transform_0(%arg0: i32, %arg1: i32) -> (i32, i32, i32) {
    %c0_i32 = arith.constant 0 : i32
    %c0_i32_0 = arith.constant 0 : i32
    return %arg0, %arg1, %c0_i32 : i32, i32, i32
  }
  func.func @transform_1(%arg0: i32, %arg1: i32) -> (i32, i32, i32, i32) {
    %c0_i32 = arith.constant 0 : i32
    %c0_i32_0 = arith.constant 0 : i32
    %c0_i32_1 = arith.constant 0 : i32
    %c0_i32_2 = arith.constant 0 : i32
    return %arg0, %c0_i32, %c0_i32_0, %c0_i32_1 : i32, i32, i32, i32
  }
  func.func @transform_2(%arg0: i32, %arg1: i32) -> (i32, i32, i32, i32) {
    %c0_i32 = arith.constant 0 : i32
    %c0_i32_0 = arith.constant 0 : i32
    %c0_i32_1 = arith.constant 0 : i32
    %c0_i32_2 = arith.constant 0 : i32
    return %arg0, %c0_i32, %c0_i32_0, %c0_i32_1 : i32, i32, i32, i32
  }
  func.func @transform_3(%arg0: i32, %arg1: i32) -> (i32, i32, i32) {
    %c0_i32 = arith.constant 0 : i32
    %c0_i32_0 = arith.constant 0 : i32
    %c0_i32_1 = arith.constant 0 : i32
    return %arg0, %c0_i32, %c0_i32_0 : i32, i32, i32
  }
  func.func @transform_4(%arg0: i32, %arg1: i32) -> (i32, i32, i32) {
    %c0_i32 = arith.constant 0 : i32
    %c0_i32_0 = arith.constant 0 : i32
    %c0_i32_1 = arith.constant 0 : i32
    return %arg0, %c0_i32, %c0_i32_0 : i32, i32, i32
  }
  func.func @transform_5(%arg0: i32, %arg1: i32) -> (i32, i32) {
    %c0_i32 = arith.constant 0 : i32
    %c0_i32_0 = arith.constant 0 : i32
    %c0_i32_1 = arith.constant 0 : i32
    return %c0_i32, %c0_i32_0 : i32, i32
  }
  func.func @transform_6(%arg0: i32, %arg1: i32) -> (i32, i32) {
    %c0_i32 = arith.constant 0 : i32
    %c0_i32_0 = arith.constant 0 : i32
    %c0_i32_1 = arith.constant 0 : i32
    return %c0_i32, %c0_i32_0 : i32, i32
  }
  func.func @transform_7(%arg0: i32, %arg1: i32) -> (i32, i32) {
    %c0_i32 = arith.constant 0 : i32
    %c0_i32_0 = arith.constant 0 : i32
    %c0_i32_1 = arith.constant 0 : i32
    return %c0_i32, %c0_i32_0 : i32, i32
  }
  func.func @transform_8(%arg0: i32, %arg1: i32) -> (i32, i32) {
    %c0_i32 = arith.constant 0 : i32
    %c0_i32_0 = arith.constant 0 : i32
    %c0_i32_1 = arith.constant 0 : i32
    return %c0_i32, %c0_i32_0 : i32, i32
  }
  func.func @transform_9(%arg0: i32, %arg1: i32) -> (i32, i32) {
    %c0_i32 = arith.constant 0 : i32
    %c0_i32_0 = arith.constant 0 : i32
    %c0_i32_1 = arith.constant 0 : i32
    return %c0_i32, %c0_i32_0 : i32, i32
  }
  func.func @transform_10(%arg0: i32, %arg1: i32) -> (i32, i32) {
    %c0_i32 = arith.constant 0 : i32
    %c0_i32_0 = arith.constant 0 : i32
    %c0_i32_1 = arith.constant 0 : i32
    return %c0_i32, %c0_i32_0 : i32, i32
  }
  func.func @transform_11(%arg0: i32, %arg1: i32) -> (i32, i32) {
    %c0_i32 = arith.constant 0 : i32
    %c0_i32_0 = arith.constant 0 : i32
    %c0_i32_1 = arith.constant 0 : i32
    return %c0_i32, %c0_i32_0 : i32, i32
  }
  func.func @transform_12(%arg0: i32, %arg1: i32) -> (i32, i32) {
    %c0_i32 = arith.constant 0 : i32
    %c0_i32_0 = arith.constant 0 : i32
    %c0_i32_1 = arith.constant 0 : i32
    return %c0_i32, %c0_i32_0 : i32, i32
  }
  func.func @transform_13(%arg0: i32, %arg1: i32) -> (i32, i32) {
    %c0_i32 = arith.constant 0 : i32
    %c0_i32_0 = arith.constant 0 : i32
    %c0_i32_1 = arith.constant 0 : i32
    return %c0_i32, %c0_i32_0 : i32, i32
  }
  func.func @transform_14(%arg0: i32, %arg1: i32) -> (i32, i32) {
    %c0_i32 = arith.constant 0 : i32
    %c0_i32_0 = arith.constant 0 : i32
    %c0_i32_1 = arith.constant 0 : i32
    return %c0_i32, %c0_i32_0 : i32, i32
  }
  func.func @transform_15(%arg0: i32, %arg1: i32) -> (i32, i32) {
    %c0_i32 = arith.constant 0 : i32
    %c0_i32_0 = arith.constant 0 : i32
    %c0_i32_1 = arith.constant 0 : i32
    return %c0_i32, %c0_i32_0 : i32, i32
  }
  func.func @transform_16(%arg0: i32, %arg1: i32) -> (i32, i32) {
    %c0_i32 = arith.constant 0 : i32
    %c0_i32_0 = arith.constant 0 : i32
    %c0_i32_1 = arith.constant 0 : i32
    return %c0_i32, %c0_i32_0 : i32, i32
  }
  func.func @transform_17(%arg0: i32, %arg1: i32) -> (i32, i32, i32) {
    %c0_i32 = arith.constant 0 : i32
    %c0_i32_0 = arith.constant 0 : i32
    return %arg0, %arg1, %c0_i32 : i32, i32, i32
  }
  func.func @transform_18(%arg0: i32, %arg1: i32) -> (i32, i32, i32) {
    %c0_i32 = arith.constant 0 : i32
    %c0_i32_0 = arith.constant 0 : i32
    return %arg0, %arg1, %c0_i32 : i32, i32, i32
  }
}

module attributes {stable_mosaic.version = 11 : i64} {
  func.func @decoder_layer_kernel(%arg0: i32, %arg1: i32, %arg2: memref<1x8x32xf32, #tpu.memory_space<vmem>>, %arg3: memref<1x4x136x8xbf16, #tpu.memory_space<vmem>>, %arg4: memref<1x4x136x8xbf16, #tpu.memory_space<vmem>>, %arg5: memref<1x1x128xf32, #tpu.memory_space<vmem>>, %arg6: memref<1x1x8xf32, #tpu.memory_space<vmem>>, %arg7: memref<1x32xf32, #tpu.memory_space<vmem>>, %arg8: memref<1x32xf32, #tpu.memory_space<vmem>>, %arg9: memref<1x32xf32, #tpu.memory_space<vmem>>, %arg10: memref<1x32xf32, #tpu.memory_space<vmem>>, %arg11: memref<32x32xbf16, #tpu.memory_space<vmem>>, %arg12: memref<1x32xf32, #tpu.memory_space<vmem>>, %arg13: memref<32x32xbf16, #tpu.memory_space<vmem>>, %arg14: memref<1x32xf32, #tpu.memory_space<vmem>>, %arg15: memref<32x128xbf16, #tpu.memory_space<vmem>>, %arg16: memref<1x128xf32, #tpu.memory_space<vmem>>, %arg17: memref<128x32xbf16, #tpu.memory_space<vmem>>, %arg18: memref<1x32xf32, #tpu.memory_space<vmem>>, %arg19: memref<1x8x32xf32, #tpu.memory_space<vmem>>, %arg20: memref<1x8x128xf32, #tpu.memory_space<vmem>>, %arg21: memref<4x8x8xbf16, #tpu.memory_space<vmem>>, %arg22: memref<8x32xf32, #tpu.memory_space<vmem>>) attributes {dimension_semantics = [#tpu.dimension_semantics<parallel>, #tpu.dimension_semantics<parallel>], iteration_bounds = array<i64: 2, 1>, scalar_prefetch = 0 : i64, scratch_operands = 2 : i64, tpu.core_type = #tpu.core_type<tc>, window_params = [{transform_indices = @transform_0, window_bounds = array<i64: 1, 8, 32>}, {transform_indices = @transform_1, window_bounds = array<i64: 1, 4, 136, 8>}, {transform_indices = @transform_2, window_bounds = array<i64: 1, 4, 136, 8>}, {transform_indices = @transform_3, window_bounds = array<i64: 1, 1, 128>}, {transform_indices = @transform_4, window_bounds = array<i64: 1, 1, 8>}, {pipeline_mode = #tpu.pipeline_mode<synchronous>, transform_indices = @transform_5, window_bounds = array<i64: 1, 32>}, {pipeline_mode = #tpu.pipeline_mode<synchronous>, transform_indices = @transform_6, window_bounds = array<i64: 1, 32>}, {pipeline_mode = #tpu.pipeline_mode<synchronous>, transform_indices = @transform_7, window_bounds = array<i64: 1, 32>}, {pipeline_mode = #tpu.pipeline_mode<synchronous>, transform_indices = @transform_8, window_bounds = array<i64: 1, 32>}, {pipeline_mode = #tpu.pipeline_mode<synchronous>, transform_indices = @transform_9, window_bounds = array<i64: 32, 32>}, {pipeline_mode = #tpu.pipeline_mode<synchronous>, transform_indices = @transform_10, window_bounds = array<i64: 1, 32>}, {pipeline_mode = #tpu.pipeline_mode<synchronous>, transform_indices = @transform_11, window_bounds = array<i64: 32, 32>}, {pipeline_mode = #tpu.pipeline_mode<synchronous>, transform_indices = @transform_12, window_bounds = array<i64: 1, 32>}, {pipeline_mode = #tpu.pipeline_mode<synchronous>, transform_indices = @transform_13, window_bounds = array<i64: 32, 128>}, {pipeline_mode = #tpu.pipeline_mode<synchronous>, transform_indices = @transform_14, window_bounds = array<i64: 1, 128>}, {pipeline_mode = #tpu.pipeline_mode<synchronous>, transform_indices = @transform_15, window_bounds = array<i64: 128, 32>}, {pipeline_mode = #tpu.pipeline_mode<synchronous>, transform_indices = @transform_16, window_bounds = array<i64: 1, 32>}, {transform_indices = @transform_17, window_bounds = array<i64: 1, 8, 32>}, {transform_indices = @transform_18, window_bounds = array<i64: 1, 8, 128>}]} {
    %c0 = arith.constant 0 : index
    %c0_0 = arith.constant 0 : index
    %c0_1 = arith.constant 0 : index
    %0 = vector.load %arg2[%c0, %c0_0, %c0_1] : memref<1x8x32xf32, #tpu.memory_space<vmem>>, vector<1x8x32xf32>
    %1 = vector.shape_cast %0 : vector<1x8x32xf32> to vector<8x32xf32>
    %c0_2 = arith.constant 0 : index
    %c0_3 = arith.constant 0 : index
    %2 = vector.load %arg7[%c0_2, %c0_3] : memref<1x32xf32, #tpu.memory_space<vmem>>, vector<1x32xf32>
    %c0_4 = arith.constant 0 : index
    %c0_5 = arith.constant 0 : index
    %3 = vector.load %arg8[%c0_4, %c0_5] : memref<1x32xf32, #tpu.memory_space<vmem>>, vector<1x32xf32>
    %cst = arith.constant dense<0.000000e+00> : vector<8xf32>
    %4 = vector.multi_reduction <add>, %1, %cst [1] : vector<8x32xf32> to vector<8xf32>
    %5 = vector.shape_cast %4 : vector<8xf32> to vector<8x1xf32>
    %cst_6 = arith.constant 3.200000e+01 : f32
    %6 = vector.broadcast %cst_6 : f32 to vector<8x1xf32>
    %7 = arith.divf %5, %6 : vector<8x1xf32>
    %8 = vector.broadcast %7 : vector<8x1xf32> to vector<8x32xf32>
    %9 = arith.subf %1, %8 : vector<8x32xf32>
    %10 = arith.mulf %9, %9 : vector<8x32xf32>
    %cst_7 = arith.constant dense<0.000000e+00> : vector<8xf32>
    %11 = vector.multi_reduction <add>, %10, %cst_7 [1] : vector<8x32xf32> to vector<8xf32>
    %12 = vector.shape_cast %11 : vector<8xf32> to vector<8x1xf32>
    %cst_8 = arith.constant 3.200000e+01 : f32
    %13 = vector.broadcast %cst_8 : f32 to vector<8x1xf32>
    %14 = arith.divf %12, %13 : vector<8x1xf32>
    %15 = vector.broadcast %7 : vector<8x1xf32> to vector<8x32xf32>
    %16 = arith.subf %1, %15 : vector<8x32xf32>
    %cst_9 = arith.constant 9.99999974E-6 : f32
    %17 = vector.broadcast %cst_9 : f32 to vector<8x1xf32>
    %18 = arith.addf %14, %17 : vector<8x1xf32>
    %19 = math.rsqrt %18 : vector<8x1xf32>
    %20 = vector.broadcast %19 : vector<8x1xf32> to vector<8x32xf32>
    %21 = arith.mulf %16, %20 : vector<8x32xf32>
    %22 = vector.broadcast %2 : vector<1x32xf32> to vector<8x32xf32>
    %23 = arith.mulf %21, %22 : vector<8x32xf32>
    %24 = vector.broadcast %3 : vector<1x32xf32> to vector<8x32xf32>
    %25 = arith.addf %23, %24 : vector<8x32xf32>
    %26 = arith.truncf %25 : vector<8x32xf32> to vector<8x32xbf16>
    %c0_10 = arith.constant 0 : index
    %c0_11 = arith.constant 0 : index
    %27 = vector.load %arg11[%c0_10, %c0_11] : memref<32x32xbf16, #tpu.memory_space<vmem>>, vector<32x32xbf16>
    %cst_12 = arith.constant dense<0.000000e+00> : vector<8x32xf32>
    %28 = tpu.matmul %26, %27, %cst_12 {dimension_numbers = #tpu.dot_dimension_numbers<[1], [0], [0], [1], [0, 0, 1, 1], [], []>} : vector<8x32xbf16>, vector<32x32xbf16>, vector<8x32xf32> -> vector<8x32xf32>
    %c0_13 = arith.constant 0 : index
    %c0_14 = arith.constant 0 : index
    %29 = vector.load %arg12[%c0_13, %c0_14] : memref<1x32xf32, #tpu.memory_space<vmem>>, vector<1x32xf32>
    %30 = vector.broadcast %29 : vector<1x32xf32> to vector<8x32xf32>
    %31 = arith.addf %28, %30 : vector<8x32xf32>
    %32 = vector.shape_cast %31 : vector<8x32xf32> to vector<8x4x8xf32>
    %33 = tpu.transpose %32, [1, 0, 2] : vector<8x4x8xf32> -> vector<4x8x8xf32>
    %34 = arith.truncf %33 : vector<4x8x8xf32> to vector<4x8x8xbf16>
    %c0_15 = arith.constant 0 : index
    %c0_16 = arith.constant 0 : index
    %c0_17 = arith.constant 0 : index
    %35 = vector.load %arg21[%c0_15, %c0_16, %c0_17] : memref<4x8x8xbf16, #tpu.memory_space<vmem>>, vector<4x8x8xbf16>
    tpu.vector_store %arg21[%c0_15, %c0_16, %c0_17], %34 {strides = array<i32>} : memref<4x8x8xbf16, #tpu.memory_space<vmem>>, vector<4x8x8xbf16>,
    %c0_18 = arith.constant 0 : index
    %c0_19 = arith.constant 0 : index
    %c0_20 = arith.constant 0 : index
    %36 = vector.load %arg5[%c0_18, %c0_19, %c0_20] : memref<1x1x128xf32, #tpu.memory_space<vmem>>, vector<1x1x128xf32>
    %37 = vector.shape_cast %36 : vector<1x1x128xf32> to vector<1x128xf32>
    %cst_21 = arith.constant 5.000000e-01 : f32
    %38 = vector.broadcast %cst_21 : f32 to vector<1x128xf32>
    %39 = arith.cmpf ogt, %37, %38 : vector<1x128xf32>
    %cst_22 = arith.constant -1.000000e+09 : f32
    %cst_23 = arith.constant 0.000000e+00 : f32
    %40 = vector.broadcast %cst_22 : f32 to vector<1x128xf32>
    %41 = vector.broadcast %cst_23 : f32 to vector<1x128xf32>
    %42 = arith.select %39, %40, %41 : vector<1x128xi1>, vector<1x128xf32>
    %43 = vector.shape_cast %42 : vector<1x128xf32> to vector<1x128xf32>
    %44 = vector.broadcast %43 : vector<1x128xf32> to vector<8x128xf32>
    %45 = tpu.iota {dimensions = array<i32: 0>} : vector<8x8xi32>
    %c8_i32 = arith.constant 8 : i32
    %46 = arith.muli %arg1, %c8_i32 : i32
    %47 = vector.broadcast %46 : i32 to vector<8x8xi32>
    %48 = arith.addi %45, %47 : vector<8x8xi32>
    %49 = tpu.iota {dimensions = array<i32: 1>} : vector<8x8xi32>
    %50 = arith.cmpi sgt, %49, %48 : vector<8x8xi32>
    %c0_24 = arith.constant 0 : index
    %c0_25 = arith.constant 0 : index
    %c0_26 = arith.constant 0 : index
    %51 = vector.load %arg6[%c0_24, %c0_25, %c0_26] : memref<1x1x8xf32, #tpu.memory_space<vmem>>, vector<1x1x8xf32>
    %52 = vector.shape_cast %51 : vector<1x1x8xf32> to vector<1x8xf32>
    %cst_27 = arith.constant 5.000000e-01 : f32
    %53 = vector.broadcast %cst_27 : f32 to vector<1x8xf32>
    %54 = arith.cmpf ogt, %52, %53 : vector<1x8xf32>
    %55 = vector.shape_cast %54 : vector<1x8xi1> to vector<1x8xi1>
    %56 = vector.broadcast %55 : vector<1x8xi1> to vector<8x8xi1>
    %57 = arith.ori %50, %56 : vector<8x8xi1>
    %cst_28 = arith.constant -1.000000e+09 : f32
    %cst_29 = arith.constant 0.000000e+00 : f32
    %58 = vector.broadcast %cst_28 : f32 to vector<8x8xf32>
    %59 = vector.broadcast %cst_29 : f32 to vector<8x8xf32>
    %60 = arith.select %57, %58, %59 : vector<8x8xi1>, vector<8x8xf32>
    %61 = tpu.concatenate %44, %60 in 1 : vector<8x128xf32>, vector<8x8xf32> -> vector<8x136xf32>
    %cst_30 = arith.constant 0.000000e+00 : f32
    %62 = vector.broadcast %cst_30 : f32 to vector<8x32xf32>
    %c0_31 = arith.constant 0 : index
    %c0_32 = arith.constant 0 : index
    %63 = vector.load %arg22[%c0_31, %c0_32] : memref<8x32xf32, #tpu.memory_space<vmem>>, vector<8x32xf32>
    tpu.vector_store %arg22[%c0_31, %c0_32], %62 {strides = array<i32>} : memref<8x32xf32, #tpu.memory_space<vmem>>, vector<8x32xf32>,
    %cst_33 = arith.constant 0.000000e+00 : f32
    %64 = vector.broadcast %cst_33 : f32 to vector<1x8x128xf32>
    %c0_34 = arith.constant 0 : index
    %c0_35 = arith.constant 0 : index
    %c0_36 = arith.constant 0 : index
    %65 = vector.load %arg20[%c0_34, %c0_35, %c0_36] : memref<1x8x128xf32, #tpu.memory_space<vmem>>, vector<1x8x128xf32>
    tpu.vector_store %arg20[%c0_34, %c0_35, %c0_36], %64 {strides = array<i32>} : memref<1x8x128xf32, #tpu.memory_space<vmem>>, vector<1x8x128xf32>,
    %c0_i32 = arith.constant 0 : i32
    %c1_i32 = arith.constant 1 : i32
    %66 = arith.muli %c0_i32, %c1_i32 : i32
    %c0_i32_37 = arith.constant 0 : i32
    %67 = arith.addi %c0_i32_37, %66 : i32
    %c4_i32 = arith.constant 4 : i32
    %68 = arith.muli %67, %c4_i32 : i32
    %69 = tpu.assume_multiple %68, 4 : i32
    %70 = arith.index_cast %69 : i32 to index
    %c0_38 = arith.constant 0 : index
    %c0_39 = arith.constant 0 : index
    %71 = vector.load %arg21[%70, %c0_38, %c0_39] : memref<4x8x8xbf16, #tpu.memory_space<vmem>>, vector<4x8x8xbf16>
    %c0_40 = arith.constant 0 : index
    %72 = arith.index_cast %69 : i32 to index
    %c0_41 = arith.constant 0 : index
    %c0_42 = arith.constant 0 : index
    %73 = vector.load %arg3[%c0_40, %72, %c0_41, %c0_42] : memref<1x4x136x8xbf16, #tpu.memory_space<vmem>>, vector<1x4x136x8xbf16>
    %74 = vector.shape_cast %73 : vector<1x4x136x8xbf16> to vector<4x136x8xbf16>
    %c0_43 = arith.constant 0 : index
    %75 = arith.index_cast %69 : i32 to index
    %c0_44 = arith.constant 0 : index
    %c0_45 = arith.constant 0 : index
    %76 = vector.load %arg4[%c0_43, %75, %c0_44, %c0_45] : memref<1x4x136x8xbf16, #tpu.memory_space<vmem>>, vector<1x4x136x8xbf16>
    %77 = vector.shape_cast %76 : vector<1x4x136x8xbf16> to vector<4x136x8xbf16>
    "tpu.trace_start"() <{level = 10 : i32, message = "htd,hld->htl"}> : () -> ()
    %cst_46 = arith.constant dense<0.000000e+00> : vector<4x8x136xf32>
    %78 = tpu.matmul %71, %74, %cst_46 {dimension_numbers = #tpu.dot_dimension_numbers<[2], [2], [1], [1], [0, 0, 0, 1, 1, 1], [0], [0]>} : vector<4x8x8xbf16>, vector<4x136x8xbf16>, vector<4x8x136xf32> -> vector<4x8x136xf32>
    "tpu.trace_stop"() : () -> ()
    %79 = vector.shape_cast %61 : vector<8x136xf32> to vector<1x8x136xf32>
    %80 = vector.broadcast %79 : vector<1x8x136xf32> to vector<4x8x136xf32>
    %81 = arith.addf %78, %80 : vector<4x8x136xf32>
    %cst_47 = arith.constant dense<0xFF800000> : vector<4x8xf32>
    %82 = vector.multi_reduction <maximumf>, %81, %cst_47 [2] : vector<4x8x136xf32> to vector<4x8xf32>
    %83 = vector.shape_cast %82 : vector<4x8xf32> to vector<4x8x1xf32>
    %84 = vector.broadcast %83 : vector<4x8x1xf32> to vector<4x8x136xf32>
    %85 = arith.subf %81, %84 : vector<4x8x136xf32>
    %86 = math.exp %85 : vector<4x8x136xf32>
    %cst_48 = arith.constant dense<0.000000e+00> : vector<4x8xf32>
    %87 = vector.multi_reduction <add>, %86, %cst_48 [2] : vector<4x8x136xf32> to vector<4x8xf32>
    %88 = vector.shape_cast %87 : vector<4x8xf32> to vector<4x8x1xf32>
    %89 = tpu.reciprocal %88 {approx = true} : vector<4x8x1xf32> -> vector<4x8x1xf32>
    %90 = vector.broadcast %89 : vector<4x8x1xf32> to vector<4x8x136xf32>
    %91 = arith.mulf %86, %90 : vector<4x8x136xf32>
    %92 = arith.truncf %91 : vector<4x8x136xf32> to vector<4x8x136xbf16>
    "tpu.trace_start"() <{level = 10 : i32, message = "htl,hld->htd"}> : () -> ()
    %cst_49 = arith.constant dense<0.000000e+00> : vector<4x8x8xf32>
    %93 = tpu.matmul %92, %77, %cst_49 {dimension_numbers = #tpu.dot_dimension_numbers<[2], [1], [1], [2], [0, 0, 0, 1, 1, 2], [0], [0]>} : vector<4x8x136xbf16>, vector<4x136x8xbf16>, vector<4x8x8xf32> -> vector<4x8x8xf32>
    "tpu.trace_stop"() : () -> ()
    %94 = tpu.transpose %93, [1, 0, 2] : vector<4x8x8xf32> -> vector<8x4x8xf32>
    %95 = vector.shape_cast %94 : vector<8x4x8xf32> to vector<8x32xf32>
    %96 = arith.truncf %95 : vector<8x32xf32> to vector<8x32xbf16>
    %c32_i32 = arith.constant 32 : i32
    %97 = arith.muli %67, %c32_i32 : i32
    %98 = tpu.assume_multiple %97, 32 : i32
    %99 = arith.index_cast %98 : i32 to index
    %c0_50 = arith.constant 0 : index
    %100 = vector.load %arg13[%99, %c0_50] : memref<32x32xbf16, #tpu.memory_space<vmem>>, vector<32x32xbf16>
    %c0_51 = arith.constant 0 : index
    %c0_52 = arith.constant 0 : index
    %101 = vector.load %arg22[%c0_51, %c0_52] : memref<8x32xf32, #tpu.memory_space<vmem>>, vector<8x32xf32>
    %cst_53 = arith.constant dense<0.000000e+00> : vector<8x32xf32>
    %102 = tpu.matmul %96, %100, %cst_53 {dimension_numbers = #tpu.dot_dimension_numbers<[1], [0], [0], [1], [0, 0, 1, 1], [], []>} : vector<8x32xbf16>, vector<32x32xbf16>, vector<8x32xf32> -> vector<8x32xf32>
    %103 = arith.addf %101, %102 : vector<8x32xf32>
    %c0_54 = arith.constant 0 : index
    %c0_55 = arith.constant 0 : index
    %104 = vector.load %arg22[%c0_54, %c0_55] : memref<8x32xf32, #tpu.memory_space<vmem>>, vector<8x32xf32>
    tpu.vector_store %arg22[%c0_54, %c0_55], %103 {strides = array<i32>} : memref<8x32xf32, #tpu.memory_space<vmem>>, vector<8x32xf32>,
    %c0_56 = arith.constant 0 : index
    %c0_57 = arith.constant 0 : index
    %c0_58 = arith.constant 0 : index
    %105 = vector.load %arg20[%c0_56, %c0_57, %c0_58] : memref<1x8x128xf32, #tpu.memory_space<vmem>>, vector<1x8x128xf32>
    %106 = vector.shape_cast %105 : vector<1x8x128xf32> to vector<8x128xf32>
    %107 = vector.extract_strided_slice %91 {offsets = [0, 0, 0], sizes = [4, 8, 128], strides = [1, 1, 1]} : vector<4x8x136xf32> to vector<4x8x128xf32>
    %cst_59 = arith.constant dense<0.000000e+00> : vector<8x128xf32>
    %108 = vector.multi_reduction <add>, %107, %cst_59 [0] : vector<4x8x128xf32> to vector<8x128xf32>
    %109 = arith.addf %106, %108 : vector<8x128xf32>
    %c0_60 = arith.constant 0 : index
    %c0_61 = arith.constant 0 : index
    %c0_62 = arith.constant 0 : index
    %110 = vector.load %arg20[%c0_60, %c0_61, %c0_62] : memref<1x8x128xf32, #tpu.memory_space<vmem>>, vector<1x8x128xf32>
    %111 = vector.shape_cast %110 : vector<1x8x128xf32> to vector<8x128xf32>
    %112 = vector.shape_cast %109 : vector<8x128xf32> to vector<1x8x128xf32>
    tpu.vector_store %arg20[%c0_60, %c0_61, %c0_62], %112 {strides = array<i32>} : memref<1x8x128xf32, #tpu.memory_space<vmem>>, vector<1x8x128xf32>,
    %c1_i32_63 = arith.constant 1 : i32
    %c0_64 = arith.constant 0 : index
    %c0_65 = arith.constant 0 : index
    %113 = vector.load %arg22[%c0_64, %c0_65] : memref<8x32xf32, #tpu.memory_space<vmem>>, vector<8x32xf32>
    %c0_66 = arith.constant 0 : index
    %c0_67 = arith.constant 0 : index
    %114 = vector.load %arg14[%c0_66, %c0_67] : memref<1x32xf32, #tpu.memory_space<vmem>>, vector<1x32xf32>
    %115 = vector.broadcast %114 : vector<1x32xf32> to vector<8x32xf32>
    %116 = arith.addf %113, %115 : vector<8x32xf32>
    %117 = arith.addf %116, %1 : vector<8x32xf32>
    %c0_68 = arith.constant 0 : index
    %c0_69 = arith.constant 0 : index
    %118 = vector.load %arg9[%c0_68, %c0_69] : memref<1x32xf32, #tpu.memory_space<vmem>>, vector<1x32xf32>
    %c0_70 = arith.constant 0 : index
    %c0_71 = arith.constant 0 : index
    %119 = vector.load %arg10[%c0_70, %c0_71] : memref<1x32xf32, #tpu.memory_space<vmem>>, vector<1x32xf32>
    %cst_72 = arith.constant dense<0.000000e+00> : vector<8xf32>
    %120 = vector.multi_reduction <add>, %117, %cst_72 [1] : vector<8x32xf32> to vector<8xf32>
    %121 = vector.shape_cast %120 : vector<8xf32> to vector<8x1xf32>
    %cst_73 = arith.constant 3.200000e+01 : f32
    %122 = vector.broadcast %cst_73 : f32 to vector<8x1xf32>
    %123 = arith.divf %121, %122 : vector<8x1xf32>
    %124 = vector.broadcast %123 : vector<8x1xf32> to vector<8x32xf32>
    %125 = arith.subf %117, %124 : vector<8x32xf32>
    %126 = arith.mulf %125, %125 : vector<8x32xf32>
    %cst_74 = arith.constant dense<0.000000e+00> : vector<8xf32>
    %127 = vector.multi_reduction <add>, %126, %cst_74 [1] : vector<8x32xf32> to vector<8xf32>
    %128 = vector.shape_cast %127 : vector<8xf32> to vector<8x1xf32>
    %cst_75 = arith.constant 3.200000e+01 : f32
    %129 = vector.broadcast %cst_75 : f32 to vector<8x1xf32>
    %130 = arith.divf %128, %129 : vector<8x1xf32>
    %131 = vector.broadcast %123 : vector<8x1xf32> to vector<8x32xf32>
    %132 = arith.subf %117, %131 : vector<8x32xf32>
    %cst_76 = arith.constant 9.99999974E-6 : f32
    %133 = vector.broadcast %cst_76 : f32 to vector<8x1xf32>
    %134 = arith.addf %130, %133 : vector<8x1xf32>
    %135 = math.rsqrt %134 : vector<8x1xf32>
    %136 = vector.broadcast %135 : vector<8x1xf32> to vector<8x32xf32>
    %137 = arith.mulf %132, %136 : vector<8x32xf32>
    %138 = vector.broadcast %118 : vector<1x32xf32> to vector<8x32xf32>
    %139 = arith.mulf %137, %138 : vector<8x32xf32>
    %140 = vector.broadcast %119 : vector<1x32xf32> to vector<8x32xf32>
    %141 = arith.addf %139, %140 : vector<8x32xf32>
    %142 = arith.truncf %141 : vector<8x32xf32> to vector<8x32xbf16>
    %c0_77 = arith.constant 0 : index
    %c0_78 = arith.constant 0 : index
    %143 = vector.load %arg15[%c0_77, %c0_78] : memref<32x128xbf16, #tpu.memory_space<vmem>>, vector<32x128xbf16>
    %cst_79 = arith.constant dense<0.000000e+00> : vector<8x128xf32>
    %144 = tpu.matmul %142, %143, %cst_79 {dimension_numbers = #tpu.dot_dimension_numbers<[1], [0], [0], [1], [0, 0, 1, 1], [], []>} : vector<8x32xbf16>, vector<32x128xbf16>, vector<8x128xf32> -> vector<8x128xf32>
    %c0_80 = arith.constant 0 : index
    %c0_81 = arith.constant 0 : index
    %145 = vector.load %arg16[%c0_80, %c0_81] : memref<1x128xf32, #tpu.memory_space<vmem>>, vector<1x128xf32>
    %146 = vector.broadcast %145 : vector<1x128xf32> to vector<8x128xf32>
    %147 = arith.addf %144, %146 : vector<8x128xf32>
    %148 = arith.mulf %147, %147 : vector<8x128xf32>
    %149 = arith.mulf %147, %148 : vector<8x128xf32>
    %cst_82 = arith.constant 4.471500e-02 : f32
    %150 = vector.broadcast %cst_82 : f32 to vector<8x128xf32>
    %151 = arith.mulf %150, %149 : vector<8x128xf32>
    %152 = arith.addf %147, %151 : vector<8x128xf32>
    %cst_83 = arith.constant 0.797884583 : f32
    %153 = vector.broadcast %cst_83 : f32 to vector<8x128xf32>
    %154 = arith.mulf %153, %152 : vector<8x128xf32>
    %155 = math.tanh %154 : vector<8x128xf32>
    %cst_84 = arith.constant 1.000000e+00 : f32
    %156 = vector.broadcast %cst_84 : f32 to vector<8x128xf32>
    %157 = arith.addf %156, %155 : vector<8x128xf32>
    %cst_85 = arith.constant 5.000000e-01 : f32
    %158 = vector.broadcast %cst_85 : f32 to vector<8x128xf32>
    %159 = arith.mulf %158, %157 : vector<8x128xf32>
    %160 = arith.mulf %147, %159 : vector<8x128xf32>
    %161 = arith.truncf %160 : vector<8x128xf32> to vector<8x128xbf16>
    %c0_86 = arith.constant 0 : index
    %c0_87 = arith.constant 0 : index
    %162 = vector.load %arg17[%c0_86, %c0_87] : memref<128x32xbf16, #tpu.memory_space<vmem>>, vector<128x32xbf16>
    %cst_88 = arith.constant dense<0.000000e+00> : vector<8x32xf32>
    %163 = tpu.matmul %161, %162, %cst_88 {dimension_numbers = #tpu.dot_dimension_numbers<[1], [0], [0], [1], [0, 0, 1, 1], [], []>} : vector<8x128xbf16>, vector<128x32xbf16>, vector<8x32xf32> -> vector<8x32xf32>
    %c0_89 = arith.constant 0 : index
    %c0_90 = arith.constant 0 : index
    %164 = vector.load %arg18[%c0_89, %c0_90] : memref<1x32xf32, #tpu.memory_space<vmem>>, vector<1x32xf32>
    %165 = vector.broadcast %164 : vector<1x32xf32> to vector<8x32xf32>
    %166 = arith.addf %163, %165 : vector<8x32xf32>
    %167 = arith.addf %166, %117 : vector<8x32xf32>
    %c0_91 = arith.constant 0 : index
    %c0_92 = arith.constant 0 : index
    %c0_93 = arith.constant 0 : index
    %168 = vector.load %arg19[%c0_91, %c0_92, %c0_93] : memref<1x8x32xf32, #tpu.memory_space<vmem>>, vector<1x8x32xf32>
    %169 = vector.shape_cast %168 : vector<1x8x32xf32> to vector<8x32xf32>
    %170 = vector.shape_cast %167 : vector<8x32xf32> to vector<1x8x32xf32>
    tpu.vector_store %arg19[%c0_91, %c0_92, %c0_93], %170 {strides = array<i32>} : memref<1x8x32xf32, #tpu.memory_space<vmem>>, vector<1x8x32xf32>,
    %c0_94 = arith.constant 0 : index
    %c0_95 = arith.constant 0 : index
    %c0_96 = arith.constant 0 : index
    %171 = vector.load %arg20[%c0_94, %c0_95, %c0_96] : memref<1x8x128xf32, #tpu.memory_space<vmem>>, vector<1x8x128xf32>
    %172 = vector.shape_cast %171 : vector<1x8x128xf32> to vector<8x128xf32>
    %cst_97 = arith.constant 2.500000e-01 : f32
    %173 = vector.broadcast %cst_97 : f32 to vector<8x128xf32>
    %174 = arith.mulf %172, %173 : vector<8x128xf32>
    %c0_98 = arith.constant 0 : index
    %c0_99 = arith.constant 0 : index
    %c0_100 = arith.constant 0 : index
    %175 = vector.load %arg20[%c0_98, %c0_99, %c0_100] : memref<1x8x128xf32, #tpu.memory_space<vmem>>, vector<1x8x128xf32>
    %176 = vector.shape_cast %175 : vector<1x8x128xf32> to vector<8x128xf32>
    %177 = vector.shape_cast %174 : vector<8x128xf32> to vector<1x8x128xf32>
    tpu.vector_store %arg20[%c0_98, %c0_99, %c0_100], %177 {strides = array<i32>} : memref<1x8x128xf32, #tpu.memory_space<vmem>>, vector<1x8x128xf32>,
    return
  }
  func.func @transform_0(%arg0: i32, %arg1: i32) -> (i32, i32, i32) {
    %c0_i32 = arith.constant 0 : i32
    %c0_i32_0 = arith.constant 0 : i32
    return %arg0, %arg1, %c0_i32 : i32, i32, i32
  }
  func.func @transform_1(%arg0: i32, %arg1: i32) -> (i32, i32, i32, i32) {
    %c0_i32 = arith.constant 0 : i32
    %c0_i32_0 = arith.constant 0 : i32
    %c0_i32_1 = arith.constant 0 : i32
    %c0_i32_2 = arith.constant 0 : i32
    return %arg0, %c0_i32, %c0_i32_0, %c0_i32_1 : i32, i32, i32, i32
  }
  func.func @transform_2(%arg0: i32, %arg1: i32) -> (i32, i32, i32, i32) {
    %c0_i32 = arith.constant 0 : i32
    %c0_i32_0 = arith.constant 0 : i32
    %c0_i32_1 = arith.constant 0 : i32
    %c0_i32_2 = arith.constant 0 : i32
    return %arg0, %c0_i32, %c0_i32_0, %c0_i32_1 : i32, i32, i32, i32
  }
  func.func @transform_3(%arg0: i32, %arg1: i32) -> (i32, i32, i32) {
    %c0_i32 = arith.constant 0 : i32
    %c0_i32_0 = arith.constant 0 : i32
    %c0_i32_1 = arith.constant 0 : i32
    return %arg0, %c0_i32, %c0_i32_0 : i32, i32, i32
  }
  func.func @transform_4(%arg0: i32, %arg1: i32) -> (i32, i32, i32) {
    %c0_i32 = arith.constant 0 : i32
    %c0_i32_0 = arith.constant 0 : i32
    %c0_i32_1 = arith.constant 0 : i32
    return %arg0, %c0_i32, %c0_i32_0 : i32, i32, i32
  }
  func.func @transform_5(%arg0: i32, %arg1: i32) -> (i32, i32) {
    %c0_i32 = arith.constant 0 : i32
    %c0_i32_0 = arith.constant 0 : i32
    %c0_i32_1 = arith.constant 0 : i32
    return %c0_i32, %c0_i32_0 : i32, i32
  }
  func.func @transform_6(%arg0: i32, %arg1: i32) -> (i32, i32) {
    %c0_i32 = arith.constant 0 : i32
    %c0_i32_0 = arith.constant 0 : i32
    %c0_i32_1 = arith.constant 0 : i32
    return %c0_i32, %c0_i32_0 : i32, i32
  }
  func.func @transform_7(%arg0: i32, %arg1: i32) -> (i32, i32) {
    %c0_i32 = arith.constant 0 : i32
    %c0_i32_0 = arith.constant 0 : i32
    %c0_i32_1 = arith.constant 0 : i32
    return %c0_i32, %c0_i32_0 : i32, i32
  }
  func.func @transform_8(%arg0: i32, %arg1: i32) -> (i32, i32) {
    %c0_i32 = arith.constant 0 : i32
    %c0_i32_0 = arith.constant 0 : i32
    %c0_i32_1 = arith.constant 0 : i32
    return %c0_i32, %c0_i32_0 : i32, i32
  }
  func.func @transform_9(%arg0: i32, %arg1: i32) -> (i32, i32) {
    %c0_i32 = arith.constant 0 : i32
    %c0_i32_0 = arith.constant 0 : i32
    %c0_i32_1 = arith.constant 0 : i32
    return %c0_i32, %c0_i32_0 : i32, i32
  }
  func.func @transform_10(%arg0: i32, %arg1: i32) -> (i32, i32) {
    %c0_i32 = arith.constant 0 : i32
    %c0_i32_0 = arith.constant 0 : i32
    %c0_i32_1 = arith.constant 0 : i32
    return %c0_i32, %c0_i32_0 : i32, i32
  }
  func.func @transform_11(%arg0: i32, %arg1: i32) -> (i32, i32) {
    %c0_i32 = arith.constant 0 : i32
    %c0_i32_0 = arith.constant 0 : i32
    %c0_i32_1 = arith.constant 0 : i32
    return %c0_i32, %c0_i32_0 : i32, i32
  }
  func.func @transform_12(%arg0: i32, %arg1: i32) -> (i32, i32) {
    %c0_i32 = arith.constant 0 : i32
    %c0_i32_0 = arith.constant 0 : i32
    %c0_i32_1 = arith.constant 0 : i32
    return %c0_i32, %c0_i32_0 : i32, i32
  }
  func.func @transform_13(%arg0: i32, %arg1: i32) -> (i32, i32) {
    %c0_i32 = arith.constant 0 : i32
    %c0_i32_0 = arith.constant 0 : i32
    %c0_i32_1 = arith.constant 0 : i32
    return %c0_i32, %c0_i32_0 : i32, i32
  }
  func.func @transform_14(%arg0: i32, %arg1: i32) -> (i32, i32) {
    %c0_i32 = arith.constant 0 : i32
    %c0_i32_0 = arith.constant 0 : i32
    %c0_i32_1 = arith.constant 0 : i32
    return %c0_i32, %c0_i32_0 : i32, i32
  }
  func.func @transform_15(%arg0: i32, %arg1: i32) -> (i32, i32) {
    %c0_i32 = arith.constant 0 : i32
    %c0_i32_0 = arith.constant 0 : i32
    %c0_i32_1 = arith.constant 0 : i32
    return %c0_i32, %c0_i32_0 : i32, i32
  }
  func.func @transform_16(%arg0: i32, %arg1: i32) -> (i32, i32) {
    %c0_i32 = arith.constant 0 : i32
    %c0_i32_0 = arith.constant 0 : i32
    %c0_i32_1 = arith.constant 0 : i32
    return %c0_i32, %c0_i32_0 : i32, i32
  }
  func.func @transform_17(%arg0: i32, %arg1: i32) -> (i32, i32, i32) {
    %c0_i32 = arith.constant 0 : i32
    %c0_i32_0 = arith.constant 0 : i32
    return %arg0, %arg1, %c0_i32 : i32, i32, i32
  }
  func.func @transform_18(%arg0: i32, %arg1: i32) -> (i32, i32, i32) {
    %c0_i32 = arith.constant 0 : i32
    %c0_i32_0 = arith.constant 0 : i32
    return %arg0, %arg1, %c0_i32 : i32, i32, i32
  }
}

</mosaic_0001>

<bundles_post_ra>
// kernel: tpu_custom_call.1
= control target key start
LH: loop header
LB: loop body
LE: loop exit
PB: predicated region body
PF: predicated region fallthrough
CT: control target
= control target key end

     0   :  { %s5426_s0 = inlined_call_operand.hbm [shape: f32[2,8,32], index: 0, kind: input, shape index: {}]   ;;  %s5427_s1 = inlined_call_operand.hbm [shape: bf16[2,4,136,8], index: 1, kind: input, shape index: {}]   ;;  %s5428_s2 = inlined_call_operand.hbm [shape: bf16[2,4,136,8], index: 2, kind: input, shape index: {}]   ;;  %s5429_s3 = inlined_call_operand.hbm [shape: f32[2,1,128], index: 3, kind: input, shape index: {}]   ;;  %s5430_s4 = inlined_call_operand.hbm [shape: f32[2,1,8], index: 4, kind: input, shape index: {}]   ;;  %s5431_s5 = inlined_call_operand.hbm [shape: f32[1,32], index: 5, kind: input, shape index: {}]   ;;  %s5432_s6 = inlined_call_operand.hbm [shape: f32[1,32], index: 6, kind: input, shape index: {}]   ;;  %s5433_s7 = inlined_call_operand.hbm [shape: f32[1,32], index: 7, kind: input, shape index: {}]   ;;  %s5434_s8 = inlined_call_operand.hbm [shape: f32[1,32], index: 8, kind: input, shape index: {}]   ;;  %s5435_s9 = inlined_call_operand.hbm [shape: bf16[32,32], index: 9, kind: input, shape index: {}]   ;;  %s5436_s10 = inlined_call_operand.hbm [shape: f32[1,32], index: 10, kind: input, shape index: {}]   ;;  %s5437_s11 = inlined_call_operand.hbm [shape: bf16[32,32], index: 11, kind: input, shape index: {}]   ;;  %s5438_s12 = inlined_call_operand.hbm [shape: f32[1,32], index: 12, kind: input, shape index: {}]   ;;  %s5439_s13 = inlined_call_operand.hbm [shape: bf16[32,128], index: 13, kind: input, shape index: {}]   ;;  %s5440_s14 = inlined_call_operand.hbm [shape: f32[1,128], index: 14, kind: input, shape index: {}]   ;;  %s5441_s15 = inlined_call_operand.hbm [shape: bf16[128,32], index: 15, kind: input, shape index: {}]   ;;  %s5442_s16 = inlined_call_operand.hbm [shape: f32[1,32], index: 16, kind: input, shape index: {}]   ;;  %s5443_s17 = inlined_call_operand.hbm [shape: f32[2,8,32], index: 17, kind: output, shape index: {0}]   ;;  %s5444_s18 = inlined_call_operand.hbm [shape: f32[2,8,128], index: 18, kind: output, shape index: {1}]  }
   0x1   :  { %5483 = sst [smem:[#allocation52_spill]] %s5426_s0 }
   0x2   :  { %5484 = sst [smem:[#allocation53_spill]] %s5427_s1 }
   0x3   :  { %5485 = sst [smem:[#allocation54_spill]] %s5428_s2 }
   0x4   :  { %5486 = sst [smem:[#allocation55_spill]] %s5429_s3 }
   0x5   :  { %5487 = sst [smem:[#allocation56_spill]] %s5431_s5 }
   0x6   :  { %5488 = sst [smem:[#allocation57_spill]] %s5432_s6 }
   0x7   :  { %5489 = sst [smem:[#allocation58_spill]] %s5433_s7 }
   0x8   :  { %5490 = sst [smem:[#allocation59_spill]] %s5434_s8 }
   0x9   :  { %5491 = sst [smem:[#allocation60_spill]] %s5435_s9 }
   0xa   :  { %5492 = sst [smem:[#allocation61_spill]] %s5436_s10 }
   0xb   :  { %5493 = sst [smem:[#allocation62_spill]] %s5437_s11 }
   0xc   :  { %5494 = sst [smem:[#allocation63_spill]] %s5438_s12 }
   0xd   :  { %5495 = sst [smem:[#allocation64_spill]] %s5439_s13 }
   0xe   :  { %5496 = sst [smem:[#allocation65_spill]] %s5440_s14 }
   0xf   :  { %5497 = sst [smem:[#allocation66_spill]] %s5441_s15 }
  0x10   :  { %5498 = sst [smem:[#allocation67_spill]] %s5442_s16 }
  0x11   :  { %5499 = sst [smem:[#allocation68_spill]] %s5443_s17 }
  0x12   :  { %5500 = sst [smem:[#allocation69_spill]] %s5444_s18 }
  0x13   :  { %24 = vsyncpa [#allocation5], 0 }
  0x14   :  { %26 = vsyncpa [#allocation5 + $0x1], 0 }
  0x15   :  { %27 = vsyncpa [#allocation8], 0 }
  0x16   :  { %29 = vsyncpa [#allocation8 + $0x1], 0 }
  0x17   :  { %30 = vsyncpa [#allocation11], 0 }
  0x18   :  { %32 = vsyncpa [#allocation11 + $0x1], 0 }
  0x19   :  { %33 = vsyncpa [#allocation14], 0 }
  0x1a   :  { %34 = vsyncpa [#allocation17], 0 }
  0x1b   :  { %35 = vsyncpa [#allocation20], 0 }
  0x1c   :  { %36 = vsyncpa [#allocation23], 0 }
  0x1d   :  { %37 = vsyncpa [#allocation26], 0 }
  0x1e   :  { %38 = vsyncpa [#allocation29], 0 }
  0x1f   :  { %39 = vsyncpa [#allocation6], 0 }
  0x20   :  { %41 = vsyncpa [#allocation6 + $0x1], 0 }
  0x21   :  { %42 = vsyncpa [#allocation33], 0 }
  0x22   :  { %44 = vsyncpa [#allocation33 + $0x1], 0  ;;  %s4386_s27 = smov 0   ;;  %s4388_s28 = smov 0  }
  0x23   :  { %s4390_s29 = smov 0   ;;  %s4392_s30 = smov 0  }
  0x24   :  { %s4394_s0 = smov 0   ;;  %s4396_s19 = smov 0  }
  0x25 LB: > { %5501 = sst [smem:[#allocation45_spill]] %s4237_s27  ;;  %s4417_s1 = sadd.s32 4294967295, %s4257_s19   ;;  %s4257_s19 = sphi %s4396_s19, %s50_s19   ;;  %s4253_s0 = sphi %s4394_s0, %s5577_s0   ;;  %s4249_s30 = sphi %s4392_s30, %s5576_s30   ;;  %s4245_s29 = sphi %s4390_s29, %s5572_s29   ;;  %s4241_s28 = sphi %s4388_s28, %s5575_s28   ;;  %s4237_s27 = sphi %s4386_s27, %s5574_s27  }
  0x26   : > { %5502 = sst [smem:[#allocation46_spill]] %s4245_s29  ;;  %p3069_p0 = scmp.ge.s32.totalorder %s4257_s19, 1 }
  0x27   : > { %5503 = sst [smem:[#allocation47_spill]] %s4249_s30  ;;  %p5453_p1 = scmp.eq.s32.totalorder %s4417_s1, 0 }
  0x28   : > { %p507_p2 = scmp.lt.s32.totalorder %s4257_s19, 3  ;;  %s4259_s21 = smov [#allocation13]  }
  0x29   : > { %s520_s22 = sshll.u32 %s4259_s21, 4  ;;  %s4260_s2 = smov [#allocation16]   ;;  %s521_s22 = int_to_ptr.vmem [resolvable:$true] %s520_s22 }
  0x2a   : > { %p4422_p3 = pnand %p3069_p0, %p507_p2  ;;  %s542_s23 = sshll.u32 %s4260_s2, 4  ;;  %s4435_s23 = int_to_ptr.vmem [resolvable:$true] %s542_s23 }
  0x2b   : > { %s4261_s25 = smov [#allocation19]   ;;  %s5507_s5 = sld [smem:[#allocation56_spill]] }
  0x2c   : > { %s5504_s20 = scalar_select %p4422_p3, 1, 0 }
  0x2d   : > { %p3349_p5 = pneg %p4422_p3  ;;  %s563_s26 = sshll.u32 %s4261_s25, 4  ;;  %s4437_s26 = int_to_ptr.vmem [resolvable:$true] %s563_s26 }
  0x2e   : > { %5505 = sst [smem:[#allocation48_spill]] %s5504_s20 }
  0x2f   : > { %p4431_p6 = pnand %p3349_p5, %p5453_p1 }
  0x31   : > { %s5506_s24 = scalar_select %p4431_p6, 1, 0 }
  0x32   : > { %s3625_s18 = scalar_lea.hbm %s5507_s5, 16  ;;  %p4447_p8 = pneg %p4431_p6 }
  0x33   : > { %p3626_p7 = scmp.ne.s32.totalorder %s5507_s5, %s3625_s18  ;;  %p3632_p11 = scmp.lt.u32.totalorder %s3625_s18, %s5507_s5 }
  0x34   : > { %s5508_s2 = scalar_select %p4447_p8, 1, 0 }
  0x35   : > { %p3628_p9 = pnand %p4447_p8, %p3626_p7 }
  0x37   : > { %p3629_p10 = pneg %p3628_p9 }
  0x39   : > { %p3634_p12 = pnand %p3632_p11, %p3629_p10 }
  0x3b   : > { %3637 = shalt.err (!%p3634_p12)
}
  0x3c   : > { %s3638_s17 = scalar_lea.vmem %s521_s22, 16  ;;  %s3645_s30 = scalar_lea.vmem %s521_s22, 32 }
  0x3d   : > { %p3639_p13 = scmp.ne.s32.totalorder %s521_s22, %s3638_s17  ;;  %p3646_p5 = scmp.lt.s32.totalorder %s521_s22, %s521_s22 }
  0x3e   : > { %p3647_p4 = scmp.lt.s32.totalorder %s3645_s30, %s3638_s17 }
  0x3f   : > { %p3641_p0 = pnand %p3639_p13, %p4447_p8 }
  0x40   : > { %p3648_p1 = por %p3647_p4, %p3646_p5 }
  0x41   : > { %p3642_p2 = pneg %p3641_p0 }
  0x43   : > { %p3649_p3 = pnand %p3648_p1, %p3642_p2 }
  0x45   : > { %3652 = shalt.err (!%p3649_p3)
}
  0x46   : > { %3352 = dma.hbm_to_vmem [thread:$0]  (!%p4431_p6), %s5507_s5, 16, %s521_s22, [#allocation14]  }
  0x47   : > { %s5509_s7 = sld [smem:[#allocation58_spill]] }
  0x4d   : > { %s3653_s25 = scalar_lea.hbm %s5509_s7, 16 }
  0x4e   : > { %p3654_p7 = scmp.ne.s32.totalorder %s5509_s7, %s3653_s25  ;;  %p3660_p1 = scmp.lt.u32.totalorder %s3653_s25, %s5509_s7 }
  0x50   : > { %p3656_p9 = pnand %p3654_p7, %p4447_p8 }
  0x52   : > { %p3657_p4 = pneg %p3656_p9 }
  0x54   : > { %p3662_p3 = pnand %p3660_p1, %p3657_p4 }
  0x56   : > { %3665 = shalt.err (!%p3662_p3)
}
  0x57   : > { %s3666_s22 = scalar_lea.vmem %s4435_s23, 16  ;;  %s3673_s12 = scalar_lea.vmem %s4435_s23, 32 }
  0x58   : > { %p3667_p10 = scmp.ne.s32.totalorder %s4435_s23, %s3666_s22  ;;  %p3674_p13 = scmp.lt.s32.totalorder %s4435_s23, %s4435_s23 }
  0x59   : > { %p3675_p0 = scmp.lt.s32.totalorder %s3673_s12, %s3666_s22 }
  0x5a   : > { %p3669_p11 = pnand %p3667_p10, %p4447_p8 }
  0x5b   : > { %p3676_p2 = por %p3675_p0, %p3674_p13 }
  0x5c   : > { %p3670_p12 = pneg %p3669_p11 }
  0x5e   : > { %p3677_p5 = pnand %p3676_p2, %p3670_p12 }
  0x60   : > { %3680 = shalt.err (!%p3677_p5)
}
  0x61   : > { %3358 = dma.hbm_to_vmem [thread:$0]  (!%p4431_p6), %s5509_s7, 16, %s4435_s23, [#allocation17]  }
  0x62   : > { %s5510_s9 = sld [smem:[#allocation60_spill]] }
  0x68   : > { %s3681_s18 = scalar_lea.hbm %s5510_s9, 256 }
  0x69   : > { %p3682_p7 = scmp.ne.s32.totalorder %s5510_s9, %s3681_s18  ;;  %p3688_p1 = scmp.lt.u32.totalorder %s3681_s18, %s5510_s9 }
  0x6b   : > { %p3684_p9 = pnand %p3682_p7, %p4447_p8 }
  0x6d   : > { %p3685_p4 = pneg %p3684_p9 }
  0x6f   : > { %p3690_p3 = pnand %p3688_p1, %p3685_p4 }
  0x71   : > { %3693 = shalt.err (!%p3690_p3)
}
  0x72   : > { %s3694_s23 = scalar_lea.vmem %s4437_s26, 256  ;;  %p3702_p13 = scmp.lt.s32.totalorder %s4437_s26, %s4437_s26 }
  0x73   : > { %p3695_p10 = scmp.ne.s32.totalorder %s4437_s26, %s3694_s23  ;;  %p3703_p0 = scmp.lt.s32.totalorder %s3694_s23, %s3694_s23 }
  0x75   : > { %p3697_p11 = pnand %p3695_p10, %p4447_p8  ;;  %p3704_p2 = por %p3703_p0, %p3702_p13 }
  0x77   : > { %p3698_p12 = pneg %p3697_p11 }
  0x79   : > { %p3705_p5 = pnand %p3704_p2, %p3698_p12 }
  0x7b   : > { %3708 = shalt.err (!%p3705_p5)
}
  0x7c   : > { %s5459_s12 = smov 64   ;;  %s5461_s14 = smov 4  }
  0x7d   : > { %3364 = dma.hbm_to_vmem [thread:$0]  (!%p4431_p6), %s5510_s9, 256, %s4437_s26, [#allocation20], %s5459_s12, %s5459_s12, %s5461_s14  }
  0x7e   : > { %s4264_s16 = smov [#allocation22]   ;;  %s4265_s25 = smov [#allocation25]  }
  0x7f   : > { %s587_s18 = sshll.u32 %s4264_s16, 4  ;;  %s611_s17 = sshll.u32 %s4265_s25, 4  ;;  %s588_s18 = int_to_ptr.vmem [resolvable:$true] %s587_s18  ;;  %s612_s17 = int_to_ptr.vmem [resolvable:$true] %s611_s17 }
  0x80   : > { %s5511_s11 = sld [smem:[#allocation62_spill]] }
  0x86   : > { %s3709_s23 = scalar_lea.hbm %s5511_s11, 256 }
  0x87   : > { %p3710_p7 = scmp.ne.s32.totalorder %s5511_s11, %s3709_s23  ;;  %p3716_p1 = scmp.lt.u32.totalorder %s3709_s23, %s5511_s11 }
  0x89   : > { %p3712_p9 = pnand %p3710_p7, %p4447_p8 }
  0x8b   : > { %p3713_p4 = pneg %p3712_p9 }
  0x8d   : > { %p3718_p3 = pnand %p3716_p1, %p3713_p4 }
  0x8f   : > { %3721 = shalt.err (!%p3718_p3)
}
  0x90   : > { %s3722_s26 = scalar_lea.vmem %s588_s18, 256  ;;  %p3730_p13 = scmp.lt.s32.totalorder %s588_s18, %s588_s18 }
  0x91   : > { %p3723_p10 = scmp.ne.s32.totalorder %s588_s18, %s3722_s26  ;;  %p3731_p0 = scmp.lt.s32.totalorder %s3722_s26, %s3722_s26 }
  0x93   : > { %p3725_p11 = pnand %p3723_p10, %p4447_p8  ;;  %p3732_p2 = por %p3731_p0, %p3730_p13 }
  0x95   : > { %p3726_p12 = pneg %p3725_p11 }
  0x97   : > { %p3733_p5 = pnand %p3732_p2, %p3726_p12 }
  0x99   : > { %3736 = shalt.err (!%p3733_p5)
}
  0x9a   : > { %3370 = dma.hbm_to_vmem [thread:$0]  (!%p4431_p6), %s5511_s11, 256, %s588_s18, [#allocation23], %s5459_s12, %s5459_s12, %s5461_s14  }
  0x9b   : > { %s5512_s13 = sld [smem:[#allocation64_spill]] }
  0xa1   : > { %s3737_s20 = scalar_lea.hbm %s5512_s13, 256 }
  0xa2   : > { %p3738_p7 = scmp.ne.s32.totalorder %s5512_s13, %s3737_s20  ;;  %p3744_p1 = scmp.lt.u32.totalorder %s3737_s20, %s5512_s13 }
  0xa4   : > { %p3740_p9 = pnand %p3738_p7, %p4447_p8 }
  0xa6   : > { %p3741_p4 = pneg %p3740_p9 }
  0xa8   : > { %p3746_p3 = pnand %p3744_p1, %p3741_p4 }
  0xaa   : > { %3749 = shalt.err (!%p3746_p3)
}
  0xab   : > { %s3750_s22 = scalar_lea.vmem %s612_s17, 256  ;;  %p3758_p13 = scmp.lt.s32.totalorder %s612_s17, %s612_s17 }
  0xac   : > { %p3751_p10 = scmp.ne.s32.totalorder %s612_s17, %s3750_s22  ;;  %p3759_p0 = scmp.lt.s32.totalorder %s3750_s22, %s3750_s22 }
  0xae   : > { %p3753_p11 = pnand %p3751_p10, %p4447_p8  ;;  %p3760_p2 = por %p3759_p0, %p3758_p13 }
  0xb0   : > { %p3754_p12 = pneg %p3753_p11 }
  0xb2   : > { %p3761_p5 = pnand %p3760_p2, %p3754_p12 }
  0xb4   : > { %3764 = shalt.err (!%p3761_p5)
}
  0xb5   : > { %3376 = dma.hbm_to_vmem [thread:$0]  (!%p4431_p6), %s5512_s13, 256, %s612_s17, [#allocation26], %s5459_s12, %s5459_s12, %s5461_s14  }
  0xb6   : > { %s4266_s26 = smov [#allocation28]   ;;  %s5513_s15 = sld [smem:[#allocation66_spill]] }
  0xb7   : > { %s635_s5 = sshll.u32 %s4266_s26, 4  ;;  %s636_s5 = int_to_ptr.vmem [resolvable:$true] %s635_s5 }
  0xbc   : > { %s3765_s10 = scalar_lea.hbm %s5513_s15, 1024 }
  0xbd   : > { %p3766_p7 = scmp.ne.s32.totalorder %s5513_s15, %s3765_s10  ;;  %p3772_p1 = scmp.lt.u32.totalorder %s3765_s10, %s5513_s15 }
  0xbf   : > { %p3768_p9 = pnand %p3766_p7, %p4447_p8 }
  0xc1   : > { %p3769_p4 = pneg %p3768_p9 }
  0xc3   : > { %p3774_p3 = pnand %p3772_p1, %p3769_p4 }
  0xc5   : > { %3777 = shalt.err (!%p3774_p3)
}
  0xc6   : > { %s3778_s17 = scalar_lea.vmem %s636_s5, 1024  ;;  %p3786_p13 = scmp.lt.s32.totalorder %s636_s5, %s636_s5 }
  0xc7   : > { %p3779_p10 = scmp.ne.s32.totalorder %s636_s5, %s3778_s17  ;;  %p3787_p0 = scmp.lt.s32.totalorder %s3778_s17, %s3778_s17 }
  0xc9   : > { %p3781_p11 = pnand %p3779_p10, %p4447_p8  ;;  %p3788_p2 = por %p3787_p0, %p3786_p13 }
  0xcb   : > { %p3782_p12 = pneg %p3781_p11 }
  0xcd   : > { %p3789_p5 = pnand %p3788_p2, %p3782_p12 }
  0xcf   : > { %3792 = shalt.err (!%p3789_p5)
}
  0xd0   : > { %3382 = dma.hbm_to_vmem [thread:$0]  (!%p4431_p6), %s5513_s15, 1024, %s636_s5, [#allocation29], %s5459_s12, %s5459_s12, %s5461_s14  }
  0xd1   : > { %s3068_s18 = sadd.s32 4294967294, %s4257_s19   ;;  %s62_s23 = sadd.s32 1, %s4253_s0 }
  0xd2   : > { %p64_p7 = scmp.ge.s32.totalorder %s62_s23, 2  ;;  %s71_s26 = sadd.s32 1, %s4245_s29 }
  0xd3   : > { %p78_p9 = scmp.ne.s32.totalorder %s4245_s29, %s4241_s28  ;;  %p79_p4 = scmp.eq.s32.totalorder %s4257_s19, 0 }
  0xd4   : > { %s5579_s23 = smov (%p64_p7, %s62_s23), 0  ;;  %p84_p3 = scmp.ne.s32.totalorder %s4241_s28, %s4237_s27 }
  0xd5   : > { %5514 = sst [smem:[#allocation49_spill]] %s5579_s23  ;;  %p4584_p1 = por %p79_p4, %p78_p9 }
  0xd6   : > { %s66_s5 = ssub.s32 %s4253_s0, %s5579_s23  ;;  %p466_p10 = scmp.eq.s32.totalorder %s4417_s1, 1 }
  0xd7   : > { %p69_p11 = scmp.eq.s32.totalorder %s66_s5, 0  ;;  %p5516_p12 = scmp.eq.s32.totalorder %s4417_s1, 0 }
  0xd8   : > { %p4599_p0 = por %p466_p10, %p78_p9  ;;  %p472_p2 = scmp.eq.s32.totalorder %s3068_s18, 1 }
  0xd9   : > { %p4595_p13 = por %p5516_p12, %p84_p3  ;;  %p3421_p7 = scmp.lt.s32.totalorder %s4257_s19, 2 }
  0xda   : > { %s5518_s10 = scalar_select %p4599_p0, 1, 0 }
  0xdb   : > { %s5517_s8 = scalar_select %p4595_p13, 1, 0 }
  0xdc   : > { %s4604_s20 = scalar_select %p69_p11, %s4245_s29, %s71_s26  }
  0xdd   : > { %p4606_p5 = por %p472_p2, %p84_p3  ;;  %s4612_s16 = sand.u32 1, %s4245_s29  }
  0xde   : > { %5519 = sst [smem:[#allocation50_spill]] %s4604_s20  ;;  %p4617_p4 = pnand %p3421_p7, %p4584_p1 }
  0xdf   : > { %s5520_s21 = scalar_select %p4606_p5, 1, 0 }
  0xe0   : > { %s5522_s17 = scalar_select %p4617_p4, 1, 0 }
  0xe1   : > { %5521 = sst [smem:[#allocation51_spill]] %s5520_s21  ;;  %s5463_s30 = smul.u32 272, %s4612_s16 }
  0xe2   : > { %s5464_s22 = smul.u32 4352, %s4253_s0  ;;  %s5523_s5 = sld [smem:[#allocation53_spill]] }
  0xe3   : > { %s683_s14 = scalar_lea.vmem [#allocation7], %s5463_s30  ;;  %s5524_s9 = sand.u32 1, %s4257_s19  }
  0xe4   : > { %s690_s7 = sshll.u32 %s683_s14, 4  ;;  %s4637_s11 = scalar_lea.sflag [#allocation8], %s5524_s9  ;;  %s4632_s7 = int_to_ptr.vmem [resolvable:$true] %s690_s7 }
  0xe5   : > { %p4643_p1 = pneg %p4617_p4 }
  0xe7   : > { %s5525_s18 = scalar_select %p4643_p1, 1, 0 }
  0xe8   : > { %s4628_s12 = scalar_lea.hbm %s5523_s5, %s5464_s22  ;;  %s3798_s14 = scalar_lea.hbm %s5523_s5, 8704 }
  0xe9   : > { %s3793_s13 = scalar_lea.hbm %s4628_s12, 4352  ;;  %p3799_p11 = scmp.lt.u32.totalorder %s4628_s12, %s5523_s5 }
  0xea   : > { %p3794_p9 = scmp.ne.s32.totalorder %s4628_s12, %s3793_s13  ;;  %p3800_p12 = scmp.lt.u32.totalorder %s3798_s14, %s3793_s13 }
  0xeb   : > { %p3802_p7 = scmp.lt.u32.totalorder %s3793_s13, %s4628_s12 }
  0xec   : > { %p3796_p3 = pnand %p4643_p1, %p3794_p9  ;;  %p3801_p2 = por %p3800_p12, %p3799_p11 }
  0xee   : > { %p3797_p10 = pneg %p3796_p3  ;;  %p3803_p5 = por %p3802_p7, %p3801_p2 }
  0xf0   : > { %p3804_p0 = pnand %p3803_p5, %p3797_p10 }
  0xf2   : > { %3807 = shalt.err (!%p3804_p0)
}
  0xf3   : > { %s3808_s9 = scalar_lea.vmem %s4632_s7, 4352  ;;  %s4267_s30 = smov [#allocation7]  }
  0xf4   : > { %p3809_p9 = scmp.ne.s32.totalorder %s4632_s7, %s3808_s9  ;;  %s3813_s26 = sshll.u32 %s4267_s30, 4  ;;  %s3814_s26 = int_to_ptr.vmem [resolvable:$false] %s3813_s26 }
  0xf5   : > { %s3815_s25 = scalar_lea.vmem %s3814_s26, 8704  ;;  %p3816_p6 = scmp.lt.s32.totalorder %s4632_s7, %s3814_s26 }
  0xf6   : > { %p3811_p3 = pnand %p3809_p9, %p4643_p1  ;;  %p3817_p8 = scmp.lt.s32.totalorder %s3815_s25, %s3808_s9 }
  0xf8   : > { %p3812_p13 = pneg %p3811_p3  ;;  %p3818_p11 = por %p3817_p8, %p3816_p6 }
  0xfa   : > { %p3819_p12 = pnand %p3818_p11, %p3812_p13 }
  0xfc   : > { %3822 = shalt.err (!%p3819_p12)
}
  0xfd   : > { %s5526_s13 = smov 4   ;;  %s5527_s22 = smov 64  }
  0xfe   : > { %3392 = dma.hbm_to_vmem [thread:$0]  (!%p4617_p4), %s4628_s12, 4352, %s4632_s7, %s4637_s11, %s5527_s22, %s5527_s22, %s5526_s13  }
  0xff   : > { %s5528_s14 = sshll.u32 %s4253_s0, 4  ;;  %s5529_s3 = sld [smem:[#allocation55_spill]] }
 0x100   : > { %s724_s25 = scalar_lea.vmem [#allocation10], %s4612_s16  ;;  %s5530_s15 = smov %s5528_s14 }
 0x101   : > { %s731_s5 = sshll.u32 %s724_s25, 4  ;;  %s4685_s29 = scalar_lea.hbm %s5430_s4, %s5530_s15  ;;  %s4678_s5 = int_to_ptr.vmem [resolvable:$true] %s731_s5 }
 0x102   : > { %s5531_s12 = sand.u32 1, %s4257_s19  }
 0x103   : > { %s4689_s7 = scalar_lea.sflag [#allocation11], %s5531_s12 }
 0x105   : > { %s4675_s26 = scalar_lea.hbm %s5529_s3, %s5528_s14  ;;  %s3828_s25 = scalar_lea.hbm %s5529_s3, 32 }
 0x106   : > { %s3823_s30 = scalar_lea.hbm %s4675_s26, 16  ;;  %p3829_p0 = scmp.lt.u32.totalorder %s4675_s26, %s5529_s3 }
 0x107   : > { %p3824_p6 = scmp.ne.s32.totalorder %s4675_s26, %s3823_s30  ;;  %p3830_p5 = scmp.lt.u32.totalorder %s3828_s25, %s3823_s30 }
 0x108   : > { %p3832_p2 = scmp.lt.u32.totalorder %s3823_s30, %s4675_s26 }
 0x109   : > { %p3826_p8 = pnand %p3824_p6, %p4643_p1  ;;  %p3831_p10 = por %p3830_p5, %p3829_p0 }
 0x10b   : > { %p3827_p13 = pneg %p3826_p8  ;;  %p3833_p7 = por %p3832_p2, %p3831_p10 }
 0x10d   : > { %p3834_p9 = pnand %p3833_p7, %p3827_p13 }
 0x10f   : > { %3837 = shalt.err (!%p3834_p9)
}
 0x110   : > { %s3838_s15 = scalar_lea.vmem %s4678_s5, 16  ;;  %s4268_s23 = smov [#allocation10]  }
 0x111   : > { %p3839_p3 = scmp.ne.s32.totalorder %s4678_s5, %s3838_s15  ;;  %s3843_s20 = sshll.u32 %s4268_s23, 4  ;;  %s3844_s20 = int_to_ptr.vmem [resolvable:$false] %s3843_s20 }
 0x112   : > { %s3845_s27 = scalar_lea.vmem %s3844_s20, 32  ;;  %p3846_p6 = scmp.lt.s32.totalorder %s4678_s5, %s3844_s20 }
 0x113   : > { %p3841_p11 = pnand %p3839_p3, %p4643_p1  ;;  %p3847_p8 = scmp.lt.s32.totalorder %s3845_s27, %s3838_s15 }
 0x115   : > { %p3842_p12 = pneg %p3841_p11  ;;  %p3848_p0 = por %p3847_p8, %p3846_p6 }
 0x117   : > { %p3849_p5 = pnand %p3848_p0, %p3842_p12 }
 0x119   : > { %3852 = shalt.err (!%p3849_p5)
}
 0x11a   : > { %3398 = dma.hbm_to_vmem [thread:$0]  (!%p4617_p4), %s4675_s26, 16, %s4678_s5, %s4689_s7  }
 0x11b   : > { %s4269_s21 = smov [#allocation15]   ;;  %s4270_s30 = smov [#allocation18]  }
 0x11c   : > { %s531_s12 = sshll.u32 %s4269_s21, 4  ;;  %s553_s14 = sshll.u32 %s4270_s30, 4  ;;  %s532_s12 = int_to_ptr.vmem [resolvable:$true] %s531_s12  ;;  %s4713_s14 = int_to_ptr.vmem [resolvable:$true] %s553_s14 }
 0x11d   : > { %s5532_s6 = sld [smem:[#allocation57_spill]]  ;;  %p5533_p10 = scmp.ne.s32.totalorder %s5508_s2, 0 }
 0x123   : > { %s3853_s15 = scalar_lea.hbm %s5532_s6, 16 }
 0x124   : > { %p3854_p13 = scmp.ne.s32.totalorder %s5532_s6, %s3853_s15  ;;  %p3860_p9 = scmp.lt.u32.totalorder %s3853_s15, %s5532_s6 }
 0x126   : > { %p3856_p2 = pnand %p3854_p13, %p5533_p10 }
 0x128   : > { %p3857_p7 = pneg %p3856_p2 }
 0x12a   : > { %p3862_p3 = pnand %p3860_p9, %p3857_p7 }
 0x12c   : > { %3865 = shalt.err (!%p3862_p3)
}
 0x12d   : > { %s3866_s26 = scalar_lea.vmem %s532_s12, 16  ;;  %s3873_s21 = scalar_lea.vmem %s532_s12, 32 }
 0x12e   : > { %p3867_p11 = scmp.ne.s32.totalorder %s532_s12, %s3866_s26  ;;  %p3874_p8 = scmp.lt.s32.totalorder %s532_s12, %s532_s12 }
 0x12f   : > { %p3875_p0 = scmp.lt.s32.totalorder %s3873_s21, %s3866_s26 }
 0x130   : > { %p3869_p12 = pnand %p3867_p11, %p5533_p10 }
 0x131   : > { %p3876_p5 = por %p3875_p0, %p3874_p8 }
 0x132   : > { %p3870_p6 = pneg %p3869_p12 }
 0x134   : > { %p3877_p4 = pnand %p3876_p5, %p3870_p6 }
 0x136   : > { %3880 = shalt.err (!%p3877_p4)
}
 0x137   : > { %p5534_p13 = scmp.ne.s32.totalorder %s5506_s24, 0  ;;  %s5535_s23 = sld [smem:[#allocation59_spill]] }
 0x139   : > { %3355 = dma.hbm_to_vmem [thread:$0]  (!%p5534_p13), %s5532_s6, 16, %s532_s12, [#allocation14]  }
 0x13d   : > { %s3881_s20 = scalar_lea.hbm %s5535_s23, 16 }
 0x13e   : > { %p3882_p2 = scmp.ne.s32.totalorder %s5535_s23, %s3881_s20  ;;  %p3888_p4 = scmp.lt.u32.totalorder %s3881_s20, %s5535_s23 }
 0x140   : > { %p3884_p7 = pnand %p3882_p2, %p5533_p10 }
 0x142   : > { %p3885_p9 = pneg %p3884_p7 }
 0x144   : > { %p3890_p3 = pnand %p3888_p4, %p3885_p9 }
 0x146   : > { %3893 = shalt.err (!%p3890_p3)
}
 0x147   : > { %s3894_s12 = scalar_lea.vmem %s4713_s14, 16  ;;  %s3901_s30 = scalar_lea.vmem %s4713_s14, 32 }
 0x148   : > { %p3895_p11 = scmp.ne.s32.totalorder %s4713_s14, %s3894_s12  ;;  %p3902_p8 = scmp.lt.s32.totalorder %s4713_s14, %s4713_s14 }
 0x149   : > { %p3903_p0 = scmp.lt.s32.totalorder %s3901_s30, %s3894_s12 }
 0x14a   : > { %p3897_p12 = pnand %p3895_p11, %p5533_p10 }
 0x14b   : > { %p3904_p5 = por %p3903_p0, %p3902_p8 }
 0x14c   : > { %p3898_p6 = pneg %p3897_p12 }
 0x14e   : > { %p3905_p2 = pnand %p3904_p5, %p3898_p6 }
 0x150   : > { %3908 = shalt.err (!%p3905_p2)
}
 0x151   : > { %3361 = dma.hbm_to_vmem [thread:$0]  (!%p5534_p13), %s5535_s23, 16, %s4713_s14, [#allocation17]  }
 0x152   : > { %s4271_s15 = smov [#allocation21]   ;;  %s4272_s27 = smov [#allocation24]  }
 0x153   : > { %s577_s20 = sshll.u32 %s4271_s15, 4  ;;  %s601_s5 = sshll.u32 %s4272_s27, 4  ;;  %s578_s20 = int_to_ptr.vmem [resolvable:$true] %s577_s20  ;;  %s4757_s5 = int_to_ptr.vmem [resolvable:$true] %s601_s5 }
 0x154   : > { %s5536_s12 = sld [smem:[#allocation61_spill]] }
 0x15a   : > { %s3909_s30 = scalar_lea.hbm %s5536_s12, 16 }
 0x15b   : > { %p3910_p7 = scmp.ne.s32.totalorder %s5536_s12, %s3909_s30  ;;  %p3916_p3 = scmp.lt.u32.totalorder %s3909_s30, %s5536_s12 }
 0x15d   : > { %p3912_p9 = pnand %p3910_p7, %p5533_p10 }
 0x15f   : > { %p3913_p4 = pneg %p3912_p9 }
 0x161   : > { %p3918_p11 = pnand %p3916_p3, %p3913_p4 }
 0x163   : > { %3921 = shalt.err (!%p3918_p11)
}
 0x164   : > { %s3922_s25 = scalar_lea.vmem %s578_s20, 16  ;;  %s3929_s15 = scalar_lea.vmem %s578_s20, 32 }
 0x165   : > { %p3923_p12 = scmp.ne.s32.totalorder %s578_s20, %s3922_s25  ;;  %p3930_p0 = scmp.lt.s32.totalorder %s578_s20, %s578_s20 }
 0x166   : > { %p3931_p5 = scmp.lt.s32.totalorder %s3929_s15, %s3922_s25 }
 0x167   : > { %p3925_p6 = pnand %p3923_p12, %p5533_p10 }
 0x168   : > { %p3932_p2 = por %p3931_p5, %p3930_p0 }
 0x169   : > { %p3926_p8 = pneg %p3925_p6 }
 0x16b   : > { %p3933_p1 = pnand %p3932_p2, %p3926_p8 }
 0x16d   : > { %3936 = shalt.err (!%p3933_p1)
}
 0x16e   : > { %3367 = dma.hbm_to_vmem [thread:$0]  (!%p5534_p13), %s5536_s12, 16, %s578_s20, [#allocation20]  }
 0x16f   : > { %s5537_s21 = sld [smem:[#allocation63_spill]] }
 0x175   : > { %s3937_s30 = scalar_lea.hbm %s5537_s21, 16 }
 0x176   : > { %p3938_p7 = scmp.ne.s32.totalorder %s5537_s21, %s3937_s30  ;;  %p3944_p1 = scmp.lt.u32.totalorder %s3937_s30, %s5537_s21 }
 0x178   : > { %p3940_p9 = pnand %p3938_p7, %p5533_p10 }
 0x17a   : > { %p3941_p4 = pneg %p3940_p9 }
 0x17c   : > { %p3946_p3 = pnand %p3944_p1, %p3941_p4 }
 0x17e   : > { %3949 = shalt.err (!%p3946_p3)
}
 0x17f   : > { %s3950_s20 = scalar_lea.vmem %s4757_s5, 16  ;;  %s3957_s3 = scalar_lea.vmem %s4757_s5, 32 }
 0x180   : > { %p3951_p11 = scmp.ne.s32.totalorder %s4757_s5, %s3950_s20  ;;  %p3958_p8 = scmp.lt.s32.totalorder %s4757_s5, %s4757_s5 }
 0x181   : > { %p3959_p0 = scmp.lt.s32.totalorder %s3957_s3, %s3950_s20 }
 0x182   : > { %p3953_p12 = pnand %p3951_p11, %p5533_p10 }
 0x183   : > { %p3960_p5 = por %p3959_p0, %p3958_p8 }
 0x184   : > { %p3954_p6 = pneg %p3953_p12 }
 0x186   : > { %p3961_p2 = pnand %p3960_p5, %p3954_p6 }
 0x188   : > { %3964 = shalt.err (!%p3961_p2)
}
 0x189   : > { %3373 = dma.hbm_to_vmem [thread:$0]  (!%p5534_p13), %s5537_s21, 16, %s4757_s5, [#allocation23]  }
 0x18a   : > { %s4273_s26 = smov [#allocation27]   ;;  %s4274_s9 = smov [#allocation30]  }
 0x18b   : > { %s625_s30 = sshll.u32 %s4273_s26, 4  ;;  %s649_s14 = sshll.u32 %s4274_s9, 4  ;;  %s626_s30 = int_to_ptr.vmem [resolvable:$true] %s625_s30  ;;  %s4801_s14 = int_to_ptr.vmem [resolvable:$true] %s649_s14 }
 0x18c   : > { %s5538_s20 = sld [smem:[#allocation65_spill]] }
 0x192   : > { %s3965_s3 = scalar_lea.hbm %s5538_s20, 16 }
 0x193   : > { %p3966_p7 = scmp.ne.s32.totalorder %s5538_s20, %s3965_s3  ;;  %p3972_p1 = scmp.lt.u32.totalorder %s3965_s3, %s5538_s20 }
 0x195   : > { %p3968_p9 = pnand %p3966_p7, %p5533_p10 }
 0x197   : > { %p3969_p4 = pneg %p3968_p9 }
 0x199   : > { %p3974_p3 = pnand %p3972_p1, %p3969_p4 }
 0x19b   : > { %3977 = shalt.err (!%p3974_p3)
}
 0x19c   : > { %s3978_s27 = scalar_lea.vmem %s626_s30, 16  ;;  %s3985_s26 = scalar_lea.vmem %s626_s30, 32 }
 0x19d   : > { %p3979_p11 = scmp.ne.s32.totalorder %s626_s30, %s3978_s27  ;;  %p3986_p8 = scmp.lt.s32.totalorder %s626_s30, %s626_s30 }
 0x19e   : > { %p3987_p0 = scmp.lt.s32.totalorder %s3985_s26, %s3978_s27 }
 0x19f   : > { %p3981_p12 = pnand %p3979_p11, %p5533_p10 }
 0x1a0   : > { %p3988_p5 = por %p3987_p0, %p3986_p8 }
 0x1a1   : > { %p3982_p6 = pneg %p3981_p12 }
 0x1a3   : > { %p3989_p2 = pnand %p3988_p5, %p3982_p6 }
 0x1a5   : > { %3992 = shalt.err (!%p3989_p2)
}
 0x1a6   : > { %3379 = dma.hbm_to_vmem [thread:$0]  (!%p5534_p13), %s5538_s20, 16, %s626_s30, [#allocation26]  }
 0x1a7   : > { %s5539_s15 = sld [smem:[#allocation67_spill]] }
 0x1ad   : > { %s3993_s3 = scalar_lea.hbm %s5539_s15, 16 }
 0x1ae   : > { %p3994_p7 = scmp.ne.s32.totalorder %s5539_s15, %s3993_s3  ;;  %p4000_p1 = scmp.lt.u32.totalorder %s3993_s3, %s5539_s15 }
 0x1b0   : > { %p3996_p9 = pnand %p3994_p7, %p5533_p10 }
 0x1b2   : > { %p3997_p4 = pneg %p3996_p9 }
 0x1b4   : > { %p4002_p3 = pnand %p4000_p1, %p3997_p4 }
 0x1b6   : > { %4005 = shalt.err (!%p4002_p3)
}
 0x1b7   : > { %s4006_s30 = scalar_lea.vmem %s4801_s14, 16  ;;  %s4013_s23 = scalar_lea.vmem %s4801_s14, 32 }
 0x1b8   : > { %p4007_p11 = scmp.ne.s32.totalorder %s4801_s14, %s4006_s30  ;;  %p4014_p8 = scmp.lt.s32.totalorder %s4801_s14, %s4801_s14 }
 0x1b9   : > { %p4015_p0 = scmp.lt.s32.totalorder %s4013_s23, %s4006_s30 }
 0x1ba   : > { %p4009_p12 = pnand %p4007_p11, %p5533_p10 }
 0x1bb   : > { %p4016_p5 = por %p4015_p0, %p4014_p8 }
 0x1bc   : > { %p4010_p6 = pneg %p4009_p12 }
 0x1be   : > { %p4017_p2 = pnand %p4016_p5, %p4010_p6 }
 0x1c0   : > { %4020 = shalt.err (!%p4017_p2)
}
 0x1c1   : > { %3385 = dma.hbm_to_vmem [thread:$0]  (!%p5534_p13), %s5539_s15, 16, %s4801_s14, [#allocation29]  }
 0x1c2   : > { %s3083_s2 = sshll.u32 %s4612_s16, 3  ;;  %s3084_s25 = sshll.u32 %s4253_s0, 7 }
 0x1c3   : > { %s5540_s5 = sld [smem:[#allocation52_spill]]  ;;  %s664_s24 = scalar_lea.vmem [#allocation4], %s3083_s2 }
 0x1c4   : > { %s672_s26 = sshll.u32 %s664_s24, 4  ;;  %s661_s30 = scalar_lea.sflag [#allocation5], %s4612_s16  ;;  %s673_s26 = int_to_ptr.vmem [resolvable:$true] %s672_s26 }
 0x1c5   : > { %p5541_p7 = scmp.ne.s32.totalorder %s5525_s18, 0 }
 0x1c9   : > { %s4850_s27 = scalar_lea.hbm %s5540_s5, %s3084_s25  ;;  %s4026_s9 = scalar_lea.hbm %s5540_s5, 256 }
 0x1ca   : > { %s4021_s23 = scalar_lea.hbm %s4850_s27, 128  ;;  %p4027_p4 = scmp.lt.u32.totalorder %s4850_s27, %s5540_s5 }
 0x1cb   : > { %p4022_p10 = scmp.ne.s32.totalorder %s4850_s27, %s4021_s23  ;;  %p4028_p1 = scmp.lt.u32.totalorder %s4026_s9, %s4021_s23 }
 0x1cc   : > { %p4030_p11 = scmp.lt.u32.totalorder %s4021_s23, %s4850_s27 }
 0x1cd   : > { %p4024_p9 = pnand %p4022_p10, %p5541_p7  ;;  %p4029_p3 = por %p4028_p1, %p4027_p4 }
 0x1cf   : > { %p4025_p13 = pneg %p4024_p9  ;;  %p4031_p12 = por %p4030_p11, %p4029_p3 }
 0x1d1   : > { %p4032_p6 = pnand %p4031_p12, %p4025_p13 }
 0x1d3   : > { %4035 = shalt.err (!%p4032_p6)
}
 0x1d4   : > { %s4036_s2 = scalar_lea.vmem %s673_s26, 128  ;;  %s4275_s6 = smov [#allocation4]  }
 0x1d5   : > { %p4037_p8 = scmp.ne.s32.totalorder %s673_s26, %s4036_s2  ;;  %s4041_s24 = sshll.u32 %s4275_s6, 4  ;;  %s4042_s24 = int_to_ptr.vmem [resolvable:$false] %s4041_s24 }
 0x1d6   : > { %s4043_s14 = scalar_lea.vmem %s4042_s24, 256  ;;  %p4044_p2 = scmp.lt.s32.totalorder %s673_s26, %s4042_s24 }
 0x1d7   : > { %p4039_p0 = pnand %p4037_p8, %p5541_p7  ;;  %p4045_p10 = scmp.lt.s32.totalorder %s4043_s14, %s4036_s2 }
 0x1d9   : > { %p4040_p5 = pneg %p4039_p0  ;;  %p4046_p9 = por %p4045_p10, %p4044_p2 }
 0x1db   : > { %p4047_p1 = pnand %p4046_p9, %p4040_p5 }
 0x1dd   : > { %4050 = shalt.err (!%p4047_p1)
}
 0x1de   : > { %p5542_p4 = scmp.ne.s32.totalorder %s5522_s17, 0  ;;  %s5543_s23 = smul.u32 4352, %s4253_s0 }
 0x1df   : > { %s5544_s3 = sld [smem:[#allocation54_spill]]  ;;  %s5545_s6 = smul.u32 272, %s4612_s16 }
 0x1e0   : > { %3389 = dma.hbm_to_vmem [thread:$0]  (!%p5542_p4), %s4850_s27, 128, %s673_s26, %s661_s30  }
 0x1e1   : > { %s704_s2 = scalar_lea.vmem [#allocation9], %s5545_s6 }
 0x1e2   : > { %s711_s24 = sshll.u32 %s704_s2, 4  ;;  %s4879_s24 = int_to_ptr.vmem [resolvable:$true] %s711_s24 }
 0x1e5   : > { %s4875_s25 = scalar_lea.hbm %s5544_s3, %s5543_s23  ;;  %s4056_s30 = scalar_lea.hbm %s5544_s3, 8704 }
 0x1e6   : > { %s4051_s14 = scalar_lea.hbm %s4875_s25, 4352  ;;  %p4057_p12 = scmp.lt.u32.totalorder %s4875_s25, %s5544_s3 }
 0x1e7   : > { %p4052_p13 = scmp.ne.s32.totalorder %s4875_s25, %s4051_s14  ;;  %p4058_p6 = scmp.lt.u32.totalorder %s4056_s30, %s4051_s14 }
 0x1e8   : > { %p4060_p0 = scmp.lt.u32.totalorder %s4051_s14, %s4875_s25 }
 0x1e9   : > { %p4054_p3 = pnand %p4052_p13, %p5541_p7  ;;  %p4059_p8 = por %p4058_p6, %p4057_p12 }
 0x1eb   : > { %p4055_p11 = pneg %p4054_p3  ;;  %p4061_p5 = por %p4060_p0, %p4059_p8 }
 0x1ed   : > { %p4062_p2 = pnand %p4061_p5, %p4055_p11 }
 0x1ef   : > { %4065 = shalt.err (!%p4062_p2)
}
 0x1f0   : > { %s4066_s9 = scalar_lea.vmem %s4879_s24, 4352  ;;  %s4276_s6 = smov [#allocation9]  }
 0x1f1   : > { %p4067_p10 = scmp.ne.s32.totalorder %s4879_s24, %s4066_s9  ;;  %s4071_s2 = sshll.u32 %s4276_s6, 4  ;;  %s4072_s2 = int_to_ptr.vmem [resolvable:$false] %s4071_s2 }
 0x1f2   : > { %s4073_s27 = scalar_lea.vmem %s4072_s2, 8704  ;;  %p4074_p13 = scmp.lt.s32.totalorder %s4879_s24, %s4072_s2 }
 0x1f3   : > { %p4069_p9 = pnand %p4067_p10, %p5541_p7  ;;  %p4075_p3 = scmp.lt.s32.totalorder %s4073_s27, %s4066_s9 }
 0x1f5   : > { %p4070_p1 = pneg %p4069_p9  ;;  %p4076_p12 = por %p4075_p3, %p4074_p13 }
 0x1f7   : > { %p4077_p6 = pnand %p4076_p12, %p4070_p1 }
 0x1f9   : > { %4080 = shalt.err (!%p4077_p6)
}
 0x1fa   : > { %3395 = dma.hbm_to_vmem [thread:$0]  (!%p5542_p4), %s4875_s25, 4352, %s4879_s24, %s4637_s11, %s5527_s22, %s5527_s22, %s5526_s13  }
 0x1fb   : > { %s741_s14 = scalar_lea.vmem [#allocation12], %s4612_s16  ;;  %s4081_s30 = scalar_lea.hbm %s4685_s29, 16 }
 0x1fc   : > { %s748_s26 = sshll.u32 %s741_s14, 4  ;;  %p4082_p11 = scmp.ne.s32.totalorder %s4685_s29, %s4081_s30  ;;  %s749_s26 = int_to_ptr.vmem [resolvable:$true] %s748_s26 }
 0x1fd   : > { %s4086_s9 = scalar_lea.hbm %s5430_s4, 32  ;;  %p4087_p5 = scmp.lt.u32.totalorder %s4685_s29, %s5430_s4 }
 0x1fe   : > { %p4084_p8 = pnand %p4082_p11, %p5541_p7  ;;  %p4088_p2 = scmp.lt.u32.totalorder %s4086_s9, %s4081_s30 }
 0x1ff   : > { %p4090_p9 = scmp.lt.u32.totalorder %s4081_s30, %s4685_s29 }
 0x200   : > { %p4085_p0 = pneg %p4084_p8  ;;  %p4089_p10 = por %p4088_p2, %p4087_p5 }
 0x202   : > { %p4091_p1 = por %p4090_p9, %p4089_p10 }
 0x204   : > { %p4092_p13 = pnand %p4091_p1, %p4085_p0 }
 0x206   : > { %4095 = shalt.err (!%p4092_p13)
}
 0x207   : > { %s4096_s11 = scalar_lea.vmem %s749_s26, 16  ;;  %s4277_s16 = smov [#allocation12]  }
 0x208   : > { %p4097_p3 = scmp.ne.s32.totalorder %s749_s26, %s4096_s11  ;;  %s4101_s13 = sshll.u32 %s4277_s16, 4  ;;  %s4102_s13 = int_to_ptr.vmem [resolvable:$false] %s4101_s13 }
 0x209   : > { %s4103_s22 = scalar_lea.vmem %s4102_s13, 32  ;;  %p4104_p11 = scmp.lt.s32.totalorder %s749_s26, %s4102_s13 }
 0x20a   : > { %p4099_p12 = pnand %p4097_p3, %p5541_p7  ;;  %p4105_p8 = scmp.lt.s32.totalorder %s4103_s22, %s4096_s11 }
 0x20c   : > { %p4100_p6 = pneg %p4099_p12  ;;  %p4106_p4 = por %p4105_p8, %p4104_p11 }
 0x20e   : > { %p4107_p2 = pnand %p4106_p4, %p4100_p6 }
 0x210   : > { %4110 = shalt.err (!%p4107_p2)
}
 0x211   : > { %p5546_p5 = scmp.ne.s32.totalorder %s5522_s17, 0  ;;  %s5547_s25 = sld [smem:[#allocation48_spill]] }
 0x213   : > { %3401 = dma.hbm_to_vmem [thread:$0]  (!%p5546_p5), %s4685_s29, 16, %s749_s26, %s4689_s7  }
 0x217   : > { %p5548_p0 = scmp.ne.s32.totalorder %s5547_s25, 0 }
 0x218   : > { %s4928_s18 = sand.u32 (!%p5548_p0), 1, %s4241_s28   ;;  %p5549_p7 = scmp.ne.s32.totalorder (!%p5548_p0), %s5517_s8, 0 }
 0x219   : > { %757 = sbr.rel (%p5548_p0) target bundleno = 3227 (0xc9b), region = 88  ;;  %s4931_s24 = sshll.u32 (!%p5548_p0), %s4928_s18, 3 }
 0x21a   : > { %s760_s27 = scalar_lea.sflag (!%p5548_p0), [#allocation5], %s4928_s18  ;;  %s763_s14 = scalar_lea.vmem (!%p5548_p0), [#allocation4], %s4931_s24 }
 0x220   : > { %4192 = dma.done.wait (%p5549_p7), %s760_s27, 128  }
 0x221   : > { %4194 = vsyncadd (%p5549_p7), %s760_s27, 4294967168  ;;  %s768_s29 = sand.u32 1, %s4417_s1   ;;  %s3286_s17 = smul.u32 272, %s4928_s18 }
 0x222   : > { %s769_s7 = scalar_lea.sflag [#allocation8], %s768_s29 }
 0x223   : > { %s4941_s26 = scalar_lea.vmem [#allocation7], %s3286_s17 }
 0x224   : > { %4196 = dma.done.wait (%p5549_p7), %s769_s7, 8704  }
 0x225   : > { %4198 = vsyncadd (%p5549_p7), %s769_s7, 4294958592  ;;  %s4947_s30 = scalar_lea.vmem [#allocation9], %s3286_s17  ;;  %s787_s23 = scalar_lea.sflag [#allocation11], %s768_s29 }
 0x226   : > { %s789_s12 = scalar_lea.vmem [#allocation10], %s4928_s18 }
 0x227   : > { %4200 = dma.done.wait (%p5549_p7), %s787_s23, 32  }
 0x228   : > { %4202 = vsyncadd (%p5549_p7), %s787_s23, 4294967264  ;;  %s797_s9 = scalar_lea.vmem [#allocation12], %s4928_s18  ;;  %p5550_p4 = scmp.eq.s32.totalorder %s4417_s1, 0 }
 0x22a   : > { %4204 = dma.done.wait (%p5550_p4), [#allocation14], 32   ;;  %p5551_p10 = pmov %p5550_p4 }
 0x22b   : > { %p5552_p9 = pmov %p5550_p4 }
 0x22c   : > { %4206 = vsyncadd (%p5551_p10), [#allocation14], 4294967264 }
 0x22d   : > { %4208 = dma.done.wait (%p5552_p9), [#allocation17], 32   ;;  %p5553_p1 = pmov %p5550_p4 }
 0x22f   : > { %4210 = vsyncadd (%p5553_p1), [#allocation17], 4294967264  ;;  %p5554_p13 = pmov %p5553_p1 }
 0x230   : > { %p5555_p3 = pmov %p5553_p1 }
 0x231   : > { %4212 = dma.done.wait (%p5554_p13), [#allocation20], 272  }
 0x232   : > { %4214 = vsyncadd (%p5555_p3), [#allocation20], 4294967024  ;;  %p5556_p12 = pmov %p5553_p1 }
 0x233   : > { %p5557_p6 = pmov %p5553_p1 }
 0x234   : > { %4216 = dma.done.wait (%p5556_p12), [#allocation23], 272  }
 0x235   : > { %4218 = vsyncadd (%p5557_p6), [#allocation23], 4294967024  ;;  %p5558_p11 = pmov %p5553_p1 }
 0x236   : > { %p5559_p8 = pmov %p5553_p1 }
 0x237   : > { %4220 = dma.done.wait (%p5558_p11), [#allocation26], 272  }
 0x238   : > { %4222 = vsyncadd (%p5559_p8), [#allocation26], 4294967024  ;;  %p5560_p2 = pmov %p5553_p1 }
 0x239   : > { %p5561_p5 = pmov %p5553_p1 }
 0x23a   : > { %4224 = dma.done.wait (%p5560_p2), [#allocation29], 1040  }
 0x23b   : > { %4226 = vsyncadd (%p5561_p5), [#allocation29], 4294966256  ;;  %vm925_vm0 = vcmask 261120   ;;  %v922_v0 = vld [vmem:[%s763_s14] sm:$0xff]  ;;  %v4278_v8 = vmov 0.0   ;;  %vm4279_vm1 = vmmov 0  }
 0x23c   : > { %v926_v1 = vsel %vm925_vm0, %v922_v0, 0.0  ;;  %v3508_v7 = vld [vmem:[#allocation19] sm:$0xff]   ;;  %3238 = vmatprep.subr.bf16.mxu0 %v4278_v8  ;;  %1203 = vst.msk [vmem:[#allocation3] sm:$0xff] %vm925_vm0, %v4278_v8  ;;  %3242 = vmatprep.mubr.msk.bf16.mxu0 %vm4279_vm1, %v4278_v8  ;;  %v3509_v9 = vld [vmem:[#allocation19 + $0x8] sm:$0xff]   ;;  %v3105_v14 = vld [vmem:[#allocation13] ss:$0 sm:$0xff] }
 0x23d   : > { %927 = vadd.xlane.f32.xlu0 %v926_v1  ;;  %3239 = vmatpush3.bf16.msra.mxu0 %v3508_v7  ;;  %v3106_v16 = vld [vmem:[#allocation15] ss:$0 sm:$0xff]  ;;  %vm1393_vm2 = vcmask 64512   ;;  %v4280_v22 = vmov 0   ;;  %v3512_v25 = vld [vmem:[%s4941_s26 + $0x8] sm:$0xff]   ;;  %v3516_v33 = vld [vmem:[%s4941_s26 + $0x18] sm:$0xff]   ;;  %v1036_v1 = vlaneseq }
 0x23e   : > { %3240 = vmatprep.subr.bf16.mxu0 %v4278_v8  ;;  %v3510_v20 = vld [vmem:[%s4941_s26] sm:$0xff]   ;;  %1424 = vmatprep.subr.bf16.mxu1 %v4280_v22  ;;  %v3513_v26 = vld [vmem:[%s4941_s26 + $0x4c] sm:$0xff]   ;;  %v1401_v27 = vsel %vm1393_vm2, %v3512_v25, 0  ;;  %v3515_v30 = vld [vmem:[%s4941_s26 + $0x54] sm:$0xff]   ;;  %v1407_v35 = vsel %vm1393_vm2, %v3516_v33, 0  ;;  %s4281_s1 = smov 104  }
 0x23f   : > { %v3511_v21 = vld [vmem:[%s4941_s26 + $0x44] sm:$0xff]   ;;  %v1398_v23 = vsel %vm1393_vm2, %v3510_v20, 0  ;;  %1456 = vmatprep.mubr.bf16.mxu1 %v4280_v22  ;;  %v1515_v28 = vsel %vm1393_vm2, %v3513_v26, 0  ;;  %v3514_v29 = vld [vmem:[%s4941_s26 + $0x10] sm:$0xff]   ;;  %v1518_v32 = vsel %vm1393_vm2, %v3515_v30, 0  ;;  %v3517_v34 = vld [vmem:[%s4941_s26 + $0x5c] sm:$0xff]  }
 0x240   : > { %v1512_v24 = vsel %vm1393_vm2, %v3511_v21, 0  ;;  %1425 = vmatpush1.bf16.xpose.msra.mxu1 %v1398_v23  ;;  %v1404_v31 = vsel %vm1393_vm2, %v3514_v29, 0  ;;  %v1521_v36 = vsel %vm1393_vm2, %v3517_v34, 0  ;;  %v3518_v37 = vld [vmem:[%s4941_s26 + $0x20] sm:$0xff]   ;;  %v3520_v41 = vld [vmem:[%s4941_s26 + $0x28] sm:$0xff]   ;;  %v3522_v45 = vld [vmem:[%s4941_s26 + $0x30] sm:$0xff]  }
 0x241   : > { %3241 = vmatpush3.bf16.msra.mxu0 %v3509_v9  ;;  %1426 = vmatprep.subr.bf16.mxu1 %v4280_v22  ;;  %v3519_v38 = vld [vmem:[%s4941_s26 + $0x64] sm:$0xff]   ;;  %v1410_v39 = vsel %vm1393_vm2, %v3518_v37, 0  ;;  %v3521_v42 = vld [vmem:[%s4941_s26 + $0x6c] sm:$0xff]   ;;  %v1413_v43 = vsel %vm1393_vm2, %v3520_v41, 0  ;;  %v3523_v46 = vld [vmem:[%s4941_s26 + $0x74] sm:$0xff]   ;;  %v1416_v47 = vsel %vm1393_vm2, %v3522_v45, 0 }
 0x242   : > { %1538 = vmatprep.subr.bf16.mxu0 %v4280_v22  ;;  %v1524_v40 = vsel %vm1393_vm2, %v3519_v38, 0  ;;  %v1527_v44 = vsel %vm1393_vm2, %v3521_v42, 0  ;;  %v1530_v48 = vsel %vm1393_vm2, %v3523_v46, 0  ;;  %v3107_v49 = vld [vmem:[#allocation21] ss:$0 sm:$0xff]  ;;  %s4282_s8 = smov 120  }
 0x243   : > { %v3524_v55 = vld [vmem:[%s4941_s26 + $0x38] sm:$0xff]   ;;  %s4283_s6 = smov 112   ;;  %v3526_v59 = vld [vmem:[%s4941_s26 + $0x40] ss:$0 sps:$4 sm:$0xff]   ;;  %v3527_v60 = vld [vmem:[%s4941_s26 + $0x84] ss:$0 sps:$4 sm:$0xff]  }
 0x244   : > { %v3525_v56 = vld [vmem:[%s4941_s26 + $0x7c] sm:$0xff]   ;;  %v1419_v57 = vsel %vm1393_vm2, %v3524_v55, 0  ;;  %v1422_v61 = vsel %vm1393_vm2, %v3526_v59, 0  ;;  %v1536_v62 = vsel %vm1393_vm2, %v3527_v60, 0  ;;  %v4284_v63 = vmov 1983009808  }
 0x245   : > { %v1533_v58 = vsel %vm1393_vm2, %v3525_v56, 0  ;;  %vm1171_vm3 = vcmask 60416   ;;  %v3529_v55 = vld [vmem:[%s4941_s26 + $0xcc] sm:$0xff]   ;;  %vm1937_vm9 = vcmask 1043456   ;;  %s920_s2 = scalar_lea.vmem [#allocation32], %s4931_s24  ;;  %s4286_s11 = smov 16  }
 0x246   : > { %v3530_v60 = vld [vmem:[%s4941_s26 + $0x90] sm:$0xff]   ;;  %s4287_s16 = smov 8   ;;  %s4288_s13 = smov 24   ;;  %vm2421_vm10 = vcmask 130048   ;;  %vm2423_vm11 = vcmask 195584  }
 0x247   : > { %s5562_s22 = sld [smem:[#allocation47_spill]]  ;;  %s5563_s29 = sld [smem:[#allocation69_spill]] }
 0x248   : > { %1427 = vmatpush1.bf16.xpose.msra.mxu1 %v1401_v27  ;;  %p5565_p7 = scmp.ne.s32.totalorder %s5518_s10, 0 }
 0x249   : > { %1428 = vmatprep.subr.bf16.mxu1 %v4280_v22 }
 0x24d   : > { %s3216_s25 = sshll.u32 %s5562_s22, 7  ;;  %s5564_s17 = smov %s5563_s29 }
 0x24e   : > { %s5347_s7 = scalar_lea.hbm %s5563_s29, %s3216_s25 }
 0x250   : > { %1429 = vmatpush1.bf16.xpose.msra.mxu1 %v1404_v31 }
 0x251   : > { %1430 = vmatprep.subr.bf16.mxu1 %v4280_v22 }
 0x258   : > { %1431 = vmatpush1.bf16.xpose.msra.mxu1 %v1407_v35 }
 0x259   : > { %1432 = vmatprep.subr.bf16.mxu1 %v4280_v22 }
 0x260   : > { %1433 = vmatpush1.bf16.xpose.msra.mxu1 %v1410_v39 }
 0x261   : > { %1434 = vmatprep.subr.bf16.mxu1 %v4280_v22 }
 0x268   : > { %1435 = vmatpush1.bf16.xpose.msra.mxu1 %v1413_v43 }
 0x269   : > { %1436 = vmatprep.subr.bf16.mxu1 %v4280_v22 }
 0x270   : > { %1437 = vmatpush1.bf16.xpose.msra.mxu1 %v1416_v47 }
 0x271   : > { %1438 = vmatprep.subr.bf16.mxu1 %v4280_v22 }
 0x278   : > { %1439 = vmatpush1.bf16.xpose.msra.mxu1 %v1419_v57  ;;  %v1740_v57 = vsel %vm1393_vm2, %v3529_v55, 0 }
 0x279   : > { %1440 = vmatprep.subr.bf16.mxu1 %v4280_v22 }
 0x280   : > { %1441 = vmatpush1.bf16.xpose.msra.mxu1 %v1422_v61  ;;  %v3531_v61 = vld [vmem:[%s4941_s26 + $0xd4] sm:$0xff]  }
 0x281   : > { %1652 = vmatprep.subr.bf16.mxu1 %v4280_v22 }
 0x2ca   : > { %v928_v2 = vpop.xlane.xlu0 %927 }
 0x2cb   : > { %v930_v3 = vmul.f32 0.03125, %v928_v2  ;;  %v4285_v2 = vmov 1934713408  }
 0x2cd   : > { %v931_v4 = vsub.f32 %v922_v0, %v930_v3  ;;  %v1034_v0 = vunpack.c.l.s4 %v4284_v63  ;;  %v1066_v3 = vunpack.c.l.s4 %v4285_v2  ;;  %v1743_v63 = vsel %vm1393_vm2, %v3531_v61, 0  ;;  %v3533_v2 = vld [vmem:[%s4941_s26 + $0xdc] sm:$0xff]  }
 0x2cf   : > { %v932_v5 = vmul.f32 %v931_v4, %v931_v4  ;;  %v1067_v9 = vunpack.c.0.s8 %v1066_v3 }
 0x2d1   : > { %v933_v6 = vsel %vm925_vm0, %v932_v5, 0.0  ;;  %v5049_v5 = vshrl.u32 %v1036_v1, 7 }
 0x2d2   : > { %934 = vadd.xlane.f32.xlu0 %v933_v6 }
 0x35f   : > { %v935_v10 = vpop.xlane.xlu0 %934 }
 0x360   : > { %v936_v11 = vmul.f32 0.03125, %v935_v10 }
 0x362   : > { %v937_v12 = vadd.f32 1e-05, %v936_v11 }
 0x364   : > { %3594 = vrsqrt.f32 %v937_v12 }
 0x36e   : > { %v3595_v13 = vpop.eup %3594 }
 0x36f   : > { %v939_v15 = vmul.f32 %v3595_v13, %v931_v4  ;;  %v1035_v4 = vunpack.c.0.s8 %v1034_v0  ;;  %v3532_v0 = vld [vmem:[%s4941_s26 + $0x98] sm:$0xff]  }
 0x370   : > { %v1632_v3 = vsel %vm1393_vm2, %v3532_v0, 0 }
 0x371   : > { %v946_v17 = vmul.f32 %v3105_v14, %v939_v15  ;;  %v5052_v10 = vsub.s32 %v1035_v4, %v5049_v5  ;;  %v1746_v4 = vsel %vm1393_vm2, %v3533_v2, 0 }
 0x373   : > { %v953_v18 = vadd.f32 %v3106_v16, %v946_v17  ;;  %v5055_v16 = vsub.s32 %v1067_v9, %v5049_v5 }
 0x375   : > { %v954_v19 = vpack.c.bf16 %v953_v18, %v953_v18 }
 0x377   : > { %3243 = vmatmul.mubr.msk.bf16.vlgmr.msra.gmra.mrb[0].mxu0 %vm925_vm0, %v954_v19 }
 0x378   : > { %1570 = vmatprep.mubr.bf16.mxu0 %v4280_v22  ;;  %1539 = vmatpush1.bf16.xpose.msra.mxu0 %v1512_v24 }
 0x379   : > { %1540 = vmatprep.subr.bf16.mxu0 %v4280_v22 }
 0x380   : > { %1541 = vmatpush1.bf16.xpose.msra.mxu0 %v1515_v28 }
 0x381   : > { %1542 = vmatprep.subr.bf16.mxu0 %v4280_v22 }
 0x388   : > { %1543 = vmatpush1.bf16.xpose.msra.mxu0 %v1518_v32 }
 0x389   : > { %1544 = vmatprep.subr.bf16.mxu0 %v4280_v22 }
 0x390   : > { %1545 = vmatpush1.bf16.xpose.msra.mxu0 %v1521_v36 }
 0x391   : > { %1546 = vmatprep.subr.bf16.mxu0 %v4280_v22 }
 0x398   : > { %1547 = vmatpush1.bf16.xpose.msra.mxu0 %v1524_v40 }
 0x399   : > { %1548 = vmatprep.subr.bf16.mxu0 %v4280_v22 }
 0x3a0   : > { %1549 = vmatpush1.bf16.xpose.msra.mxu0 %v1527_v44 }
 0x3a1   : > { %1550 = vmatprep.subr.bf16.mxu0 %v4280_v22 }
 0x3a8   : > { %1551 = vmatpush1.bf16.xpose.msra.mxu0 %v1530_v48 }
 0x3a9   : > { %1552 = vmatprep.subr.bf16.mxu0 %v4280_v22 }
 0x3b0   : > { %1553 = vmatpush1.bf16.xpose.msra.mxu0 %v1533_v58 }
 0x3b1   : > { %1554 = vmatprep.subr.bf16.mxu0 %v4280_v22 }
 0x3b8   : > { %1555 = vmatpush1.bf16.xpose.msra.mxu0 %v1536_v62  ;;  %v1629_v62 = vsel %vm1393_vm2, %v3530_v60, 0 }
 0x3b9   : > { %1766 = vmatprep.subr.bf16.mxu0 %v4280_v22 }
 0x44a   : > { %v1015_v50 = vpop.f32.mrb[0].mxu0 }
 0x44b   : > { %v1016_v51 = vadd.f32 %v3107_v49, %v1015_v50  ;;  %v3244_v52 = vpop.f32.mrb[1].mxu0 }
 0x44c   : > { %v1018_v53 = vpop.f32.mrb[2].mxu0 }
 0x44d   : > { %1028 = vrot.lane.b32.xlu0 %v1016_v51, %s4281_s1  ;;  %1022 = vrot.lane.b32.xlu1 %v1016_v51, %s4282_s8  ;;  %v3245_v54 = vpop.f32.mrb[3].mxu0 }
 0x44e   : > { %v3528_v54 = vld [vmem:[%s4941_s26 + $0x88] sm:$0xff]  }
 0x44f   : > { %v1626_v56 = vsel %vm1393_vm2, %v3528_v54, 0 }
 0x451   : > { %1025 = vrot.lane.b32.xlu1 %v1016_v51, %s4283_s6 }
 0x4bf   : > { %v1029_v6 = vpop.permute.xlu0 %1028  ;;  %v1023_v7 = vpop.permute.xlu1 %1022 }
 0x4c0   : > { %v1047_v11 = vcombine.low %v1023_v7, %v1029_v6  ;;  %v1048_v12 = vcombine.high %v1023_v7, %v1029_v6  ;;  %v3534_v6 = vld [vmem:[%s4941_s26 + $0xa0] sm:$0xff]  }
 0x4c1   : > { %v3535_v7 = vld [vmem:[%s4941_s26 + $0xe4] sm:$0xff]   ;;  %v1635_v9 = vsel %vm1393_vm2, %v3534_v6, 0 }
 0x4c2   : > { %v1055_v17 = vrot.slane %v1047_v11, %v5052_v10  ;;  %v1062_v18 = vrot.slane %v1048_v12, %v5052_v10  ;;  %v1749_v11 = vsel %vm1393_vm2, %v3535_v7, 0  ;;  %v3536_v12 = vld [vmem:[%s4941_s26 + $0xa8] sm:$0xff]  }
 0x4c3   : > { %v1026_v13 = vpop.permute.xlu1 %1025 }
 0x4c4   : > { %v1031_v14 = vcombine.low %v1016_v51, %v1026_v13  ;;  %v1032_v15 = vcombine.high %v1016_v51, %v1026_v13  ;;  %v3537_v13 = vld [vmem:[%s4941_s26 + $0xec] sm:$0xff]  }
 0x4c6   : > { %v1039_v19 = vrot.slane %v1031_v14, %v5052_v10  ;;  %v1046_v20 = vrot.slane %v1032_v15, %v5052_v10  ;;  %v1638_v14 = vsel %vm1393_vm2, %v3536_v12, 0  ;;  %v1752_v15 = vsel %vm1393_vm2, %v3537_v13, 0 }
 0x4c8   : > { %v1063_v21 = vcombine.low %v1039_v19, %v1055_v17  ;;  %v1064_v23 = vcombine.high %v1039_v19, %v1055_v17  ;;  %v1079_v24 = vcombine.low %v1046_v20, %v1062_v18  ;;  %v1080_v25 = vcombine.high %v1046_v20, %v1062_v18  ;;  %v3538_v17 = vld [vmem:[%s4941_s26 + $0xb0] sm:$0xff]  }
 0x4c9   : > { %v3539_v18 = vld [vmem:[%s4941_s26 + $0xf4] sm:$0xff]   ;;  %v1641_v19 = vsel %vm1393_vm2, %v3538_v17, 0  ;;  %v3548_v17 = vld [vmem:[%s4947_s30 + $0x44] sm:$0xff]  }
 0x4ca   : > { %v1071_v26 = vrot.slane %v1063_v21, %v5055_v16  ;;  %v1078_v27 = vrot.slane %v1064_v23, %v5055_v16  ;;  %v1087_v28 = vrot.slane %v1079_v24, %v5055_v16  ;;  %v1094_v29 = vrot.slane %v1080_v25, %v5055_v16  ;;  %v3540_v21 = vld [vmem:[%s4941_s26 + $0xb8] sm:$0xff]  }
 0x4cb   : > { %v1755_v20 = vsel %vm1393_vm2, %v3539_v18, 0  ;;  %v3541_v23 = vld [vmem:[%s4941_s26 + $0xfc] sm:$0xff]   ;;  %v1644_v24 = vsel %vm1393_vm2, %v3540_v21, 0  ;;  %v3547_v18 = vld [vmem:[%s4947_s30 + $0x8] sm:$0xff]   ;;  %v3552_v21 = vld [vmem:[%s4947_s30 + $0x54] sm:$0xff]  }
 0x4cc   : > { %v1099_v30 = vcombine.low %v1071_v26, %v1078_v27  ;;  %v3111_v31 = vcombine.high %v1071_v26, %v1078_v27  ;;  %v1115_v32 = vcombine.low %v1087_v28, %v1094_v29  ;;  %v3112_v33 = vcombine.high %v1087_v28, %v1094_v29  ;;  %v3542_v26 = vld [vmem:[%s4941_s26 + $0xc0] sm:$0xff]  }
 0x4cd   : > { %v1758_v25 = vsel %vm1393_vm2, %v3541_v23, 0  ;;  %v3543_v27 = vld [vmem:[%s4941_s26 + $0x104] sm:$0xff]   ;;  %v1647_v28 = vsel %vm1393_vm2, %v3542_v26, 0  ;;  %v3551_v23 = vld [vmem:[%s4947_s30 + $0x18] sm:$0xff]  }
 0x4ce   : > { %v1106_v34 = vrot.slane %v1099_v30, %v5052_v10  ;;  %v1114_v35 = vrot.slane %v3111_v31, %v5052_v10  ;;  %v1122_v36 = vrot.slane %v1115_v32, %v5052_v10  ;;  %v1130_v37 = vrot.slane %v3112_v33, %v5052_v10  ;;  %v3544_v30 = vld [vmem:[%s4941_s26 + $0xc8] ss:$0 sps:$4 sm:$0xff]   ;;  %v3545_v31 = vld [vmem:[%s4941_s26 + $0x10c] ss:$0 sps:$4 sm:$0xff]   ;;  %s2760_s26 = sshll.u32 %s920_s2, 4  ;;  %s2761_s26 = int_to_ptr.vmem [resolvable:$true] %s2760_s26 }
 0x4cf   : > { %v1761_v29 = vsel %vm1393_vm2, %v3543_v27, 0  ;;  %v1650_v32 = vsel %vm1393_vm2, %v3544_v30, 0  ;;  %v1764_v33 = vsel %vm1393_vm2, %v3545_v31, 0  ;;  %s4111_s23 = scalar_lea.vmem %s2761_s26, 128 }
 0x4d0   : > { %v1131_v38 = vcombine.low %v1106_v34, %v1114_v35  ;;  %v1132_v39 = vcombine.high %v1106_v34, %v1114_v35  ;;  %v1147_v40 = vcombine.low %v1122_v36, %v1130_v37  ;;  %v1148_v41 = vcombine.high %v1122_v36, %v1130_v37  ;;  %v1193_v36 = vld [vmem:[%s797_s9] sm:$0x1]  ;;  %p4112_p0 = scmp.ne.s32.totalorder %s2761_s26, %s4111_s23 }
 0x4d1   : > { %vm1194_vm4 = vcmp.gt.f32.partialorder %v1193_v36, 0.5  ;;  %v1182_v37 = vsub.s32 0, %v5049_v5 }
 0x4d2   : > { %v1139_v42 = vrot.slane %v1131_v38, %v5055_v16  ;;  %v1146_v43 = vrot.slane %v1132_v39, %v5055_v16  ;;  %v1155_v44 = vrot.slane %v1147_v40, %v5055_v16  ;;  %v1162_v45 = vrot.slane %v1148_v41, %v5055_v16  ;;  %v1176_v41 = vld [vmem:[%s789_s12] sm:$0x1]  ;;  %p4113_p4 = pnand %p4112_p0, %p5565_p7  ;;  %s4289_s12 = smov [#allocation32]  }
 0x4d3   : > { %v1195_v38 = vsel %vm1194_vm4, 1, %v4280_v22  ;;  %v1191_v39 = vand.u32 127, %v1036_v1  ;;  %vm1177_vm5 = vcmp.gt.f32.partialorder %v1176_v41, 0.5  ;;  %s4115_s9 = sshll.u32 %s4289_s12, 4  ;;  %s4116_s9 = int_to_ptr.vmem [resolvable:$false] %s4115_s9 }
 0x4d4   : > { %v1163_v46 = vcombine.low %v1139_v42, %v1155_v44  ;;  %v1164_v47 = vcombine.high %v1139_v42, %v1155_v44  ;;  %v1165_v48 = vcombine.low %v1146_v43, %v1162_v45  ;;  %v1166_v49 = vcombine.high %v1146_v43, %v1162_v45  ;;  %p4114_p10 = pneg %p4113_p4  ;;  %s4117_s1 = scalar_lea.vmem %s4116_s9, 256 }
 0x4d5   : > { %v1199_v40 = vrot.slane %v1195_v38, %v1182_v37  ;;  %vm1192_vm6 = vcmp.gt.s32.totalorder %v1191_v39, %v5049_v5  ;;  %v1178_v42 = vsel %vm1177_vm5, -1e+09, %v4278_v8  ;;  %p4118_p9 = scmp.lt.s32.totalorder %s2761_s26, %s4116_s9  ;;  %p4119_p1 = scmp.lt.s32.totalorder %s4117_s1, %s4111_s23 }
 0x4d6   : > { %v1167_v50 = vpack.c.bf16 %v1163_v46, %v1163_v46  ;;  %v1168_v51 = vpack.c.bf16 %v1164_v47, %v1164_v47  ;;  %v1169_v52 = vpack.c.bf16 %v1165_v48, %v1165_v48  ;;  %v1170_v53 = vpack.c.bf16 %v1166_v49, %v1166_v49 }
 0x4d7   : > { %vm1200_vm7 = vcmp.eq.s32.totalorder %v1199_v40, 1  ;;  %v1183_v43 = vrot.slane %v1178_v42, %v1182_v37  ;;  %p4120_p13 = por %p4119_p1, %p4118_p9 }
 0x4d8   : > { %1172 = vst.msk [vmem:[#allocation2] sm:$0xf] %vm1171_vm3, %v1167_v50  ;;  %1173 = vst.msk [vmem:[#allocation2 + $0x4] sm:$0xf] %vm1171_vm3, %v1168_v51 }
 0x4d9   : > { %1174 = vst.msk [vmem:[#allocation2 + $0x8] sm:$0xf] %vm1171_vm3, %v1169_v52  ;;  %1175 = vst.msk [vmem:[#allocation2 + $0xc] sm:$0xf] %vm1171_vm3, %v1170_v53  ;;  %p4121_p3 = pnand %p4120_p13, %p4114_p10 }
 0x4da   : > { %vm1201_vm8 = vmor %vm1192_vm6, %vm1200_vm7 }
 0x4db   : > { %v1202_v44 = vsel %vm1201_vm8, -1e+09, %v4278_v8 }
 0x4df   : > { %v1205_v58 = vld [vmem:[#allocation2] sm:$0xf]  ;;  %v1206_v59 = vld [vmem:[#allocation2 + $0x4] sm:$0xf] }
 0x4e0   : > { %3122 = vmatmul.mubr.msk.bf16.vlgmr.msra.gmra.mrb[0].mxu1 %vm1393_vm2, %v1205_v58  ;;  %3132 = vmatmul.mubr.msk.bf16.vlgmr.msra.gmra.mrb[4].mxu0 %vm1393_vm2, %v1206_v59  ;;  %v1207_v34 = vld [vmem:[#allocation2 + $0x8] sm:$0xf]  ;;  %v1208_v35 = vld [vmem:[#allocation2 + $0xc] sm:$0xf] }
 0x4e1   : > { %1653 = vmatpush1.bf16.xpose.msra.mxu1 %v1626_v56  ;;  %1767 = vmatpush1.bf16.xpose.msra.mxu0 %v1740_v57 }
 0x4e2   : > { %1654 = vmatprep.subr.bf16.mxu1 %v4280_v22  ;;  %1768 = vmatprep.subr.bf16.mxu0 %v4280_v22 }
 0x4e3   : > { %1684 = vmatprep.mubr.bf16.mxu1 %v4280_v22  ;;  %1798 = vmatprep.mubr.bf16.mxu0 %v4280_v22 }
 0x4e9   : > { %1655 = vmatpush1.bf16.xpose.msra.mxu1 %v1629_v62  ;;  %1769 = vmatpush1.bf16.xpose.msra.mxu0 %v1743_v63 }
 0x4ea   : > { %1656 = vmatprep.subr.bf16.mxu1 %v4280_v22  ;;  %1770 = vmatprep.subr.bf16.mxu0 %v4280_v22 }
 0x4f1   : > { %1657 = vmatpush1.bf16.xpose.msra.mxu1 %v1632_v3  ;;  %1771 = vmatpush1.bf16.xpose.msra.mxu0 %v1746_v4 }
 0x4f2   : > { %1658 = vmatprep.subr.bf16.mxu1 %v4280_v22  ;;  %1772 = vmatprep.subr.bf16.mxu0 %v4280_v22 }
 0x4f9   : > { %1659 = vmatpush1.bf16.xpose.msra.mxu1 %v1635_v9  ;;  %1773 = vmatpush1.bf16.xpose.msra.mxu0 %v1749_v11 }
 0x4fa   : > { %1660 = vmatprep.subr.bf16.mxu1 %v4280_v22  ;;  %1774 = vmatprep.subr.bf16.mxu0 %v4280_v22 }
 0x501   : > { %1661 = vmatpush1.bf16.xpose.msra.mxu1 %v1638_v14  ;;  %1775 = vmatpush1.bf16.xpose.msra.mxu0 %v1752_v15  ;;  %v3546_v15 = vld [vmem:[%s4947_s30] sm:$0xff]  }
 0x502   : > { %1662 = vmatprep.subr.bf16.mxu1 %v4280_v22  ;;  %1776 = vmatprep.subr.bf16.mxu0 %v4280_v22 }
 0x509   : > { %1663 = vmatpush1.bf16.xpose.msra.mxu1 %v1641_v19  ;;  %1777 = vmatpush1.bf16.xpose.msra.mxu0 %v1755_v20  ;;  %v3550_v19 = vld [vmem:[%s4947_s30 + $0x4c] sm:$0xff]  }
 0x50a   : > { %1664 = vmatprep.subr.bf16.mxu1 %v4280_v22  ;;  %1778 = vmatprep.subr.bf16.mxu0 %v4280_v22  ;;  %v3549_v20 = vld [vmem:[%s4947_s30 + $0x10] sm:$0xff]  }
 0x511   : > { %1665 = vmatpush1.bf16.xpose.msra.mxu1 %v1644_v24  ;;  %1779 = vmatpush1.bf16.xpose.msra.mxu0 %v1758_v25  ;;  %v3554_v24 = vld [vmem:[%s4947_s30 + $0x5c] sm:$0xff]  }
 0x512   : > { %1666 = vmatprep.subr.bf16.mxu1 %v4280_v22  ;;  %1780 = vmatprep.subr.bf16.mxu0 %v4280_v22  ;;  %v3553_v25 = vld [vmem:[%s4947_s30 + $0x20] sm:$0xff]  }
 0x519   : > { %1667 = vmatpush1.bf16.xpose.msra.mxu1 %v1647_v28  ;;  %1781 = vmatpush1.bf16.xpose.msra.mxu0 %v1761_v29 }
 0x51a   : > { %1668 = vmatprep.subr.bf16.mxu1 %v4280_v22  ;;  %1782 = vmatprep.subr.bf16.mxu0 %v4280_v22 }
 0x521   : > { %1669 = vmatpush1.bf16.xpose.msra.mxu1 %v1650_v32  ;;  %1783 = vmatpush1.bf16.xpose.msra.mxu0 %v1764_v33 }
 0x522   : > { %1941 = vmatprep.subr.bf16.mxu1 %v4280_v22  ;;  %2038 = vmatprep.subr.bf16.mxu0 %v4280_v22 }
 0x528   : > { %3142 = vmatmul.mubr.msk.bf16.vlgmr.msra.gmra.mrb[4].mxu1 %vm1393_vm2, %v1207_v34  ;;  %3152 = vmatmul.mubr.msk.bf16.vlgmr.msra.gmra.mrb[8].mxu0 %vm1393_vm2, %v1208_v35 }
 0x529   : > { %1942 = vmatpush1.bf16.msra.mxu1 %v3546_v15  ;;  %2039 = vmatpush1.bf16.msra.mxu0 %v3548_v17 }
 0x52a   : > { %1943 = vmatprep.subr.bf16.mxu1 %v4280_v22  ;;  %2040 = vmatprep.subr.bf16.mxu0 %v4280_v22 }
 0x52d   : > { %1944 = vmatpush1.bf16.msra.mxu1 %v3547_v18  ;;  %2041 = vmatpush1.bf16.msra.mxu0 %v3550_v19  ;;  %v3564_v19 = vld [vmem:[%s4947_s30 + $0x88] sm:$0xff]  }
 0x52e   : > { %1945 = vmatprep.subr.bf16.mxu1 %v4280_v22  ;;  %2042 = vmatprep.subr.bf16.mxu0 %v4280_v22 }
 0x531   : > { %1946 = vmatpush1.bf16.msra.mxu1 %v3549_v20  ;;  %2043 = vmatpush1.bf16.msra.mxu0 %v3552_v21 }
 0x532   : > { %1947 = vmatprep.subr.bf16.mxu1 %v4280_v22  ;;  %2044 = vmatprep.subr.bf16.mxu0 %v4280_v22 }
 0x535   : > { %1948 = vmatpush1.bf16.msra.mxu1 %v3551_v23  ;;  %2045 = vmatpush1.bf16.msra.mxu0 %v3554_v24 }
 0x536   : > { %1949 = vmatprep.subr.bf16.mxu1 %v4280_v22  ;;  %2046 = vmatprep.subr.bf16.mxu0 %v4280_v22 }
 0x539   : > { %1950 = vmatpush1.bf16.msra.mxu1 %v3553_v25 }
 0x53a   : > { %1951 = vmatprep.subr.bf16.mxu1 %v4280_v22 }
 0x5b3   : > { %v1458_v45 = vpop.f32.mrb[0].mxu1  ;;  %v1572_v46 = vpop.f32.mrb[4].mxu0 }
 0x5b4   : > { %v1460_v47 = vpop.f32.mrb[1].mxu1  ;;  %v1574_v48 = vpop.f32.mrb[5].mxu0  ;;  %v1459_v52 = vadd.f32 %v1458_v45, %v1183_v43  ;;  %v5147_v53 = vadd.f32 %v1572_v46, %v1183_v43  ;;  %v3556_v45 = vld [vmem:[%s4947_s30 + $0x64] sm:$0xff]   ;;  %v3557_v46 = vld [vmem:[%s4947_s30 + $0x30] sm:$0xff]  }
 0x5b5   : > { %v5143_v49 = vadd.f32 %v1460_v47, %v1202_v44  ;;  %v5145_v1 = vadd.f32 %v1574_v48, %v1202_v44  ;;  %v1462_v50 = vpop.f32.mrb[2].mxu1  ;;  %v1576_v51 = vpop.f32.mrb[6].mxu0  ;;  %2047 = vmatpush1.bf16.msra.mxu0 %v3556_v45  ;;  %v3558_v47 = vld [vmem:[%s4947_s30 + $0x6c] sm:$0xff]   ;;  %v3559_v48 = vld [vmem:[%s4947_s30 + $0x38] sm:$0xff]  }
 0x5b6   : > { %v1463_v5 = vpop.f32.mrb[3].mxu1  ;;  %v1577_v54 = vpop.f32.mrb[7].mxu0  ;;  %2048 = vmatprep.subr.bf16.mxu0 %v4280_v22  ;;  %v3562_v50 = vld [vmem:[%s4947_s30 + $0x7c] sm:$0xff]  }
 0x5b7   : > { %v1807_v55 = vsel %vm1393_vm2, %v5143_v49, -inf  ;;  %v1811_v56 = vsel %vm1393_vm2, %v5145_v1, -inf }
 0x5b8   : > { %v1808_v57 = vmax.f32 %v1459_v52, %v1807_v55  ;;  %v1812_v58 = vmax.f32 %v5147_v53, %v1811_v56 }
 0x5b9   : > { %2049 = vmatpush1.bf16.msra.mxu0 %v3558_v47 }
 0x5ba   : > { %1809 = vmax.xlane.f32.xlu1 %v1808_v57  ;;  %1813 = vmax.xlane.f32.xlu0 %v1812_v58 }
 0x5bb   : > { %2050 = vmatprep.subr.bf16.mxu0 %v4280_v22 }
 0x5fb   : > { %v1686_v59 = vpop.f32.mrb[4].mxu1  ;;  %v1800_v60 = vpop.f32.mrb[8].mxu0 }
 0x5fc   : > { %v1688_v61 = vpop.f32.mrb[5].mxu1  ;;  %v1802_v62 = vpop.f32.mrb[9].mxu0  ;;  %v5158_v4 = vadd.f32 %v1686_v59, %v1183_v43  ;;  %v5165_v13 = vadd.f32 %v1800_v60, %v1183_v43 }
 0x5fd   : > { %v5154_v63 = vadd.f32 %v1688_v61, %v1202_v44  ;;  %v5156_v0 = vadd.f32 %v1802_v62, %v1202_v44  ;;  %v1690_v2 = vpop.f32.mrb[6].mxu1  ;;  %v1804_v3 = vpop.f32.mrb[10].mxu0  ;;  %v3555_v44 = vld [vmem:[%s4947_s30 + $0x28] sm:$0xff]  }
 0x5fe   : > { %v1691_v6 = vpop.f32.mrb[7].mxu1  ;;  %v1805_v7 = vpop.f32.mrb[11].mxu0  ;;  %1952 = vmatpush1.bf16.msra.mxu1 %v3555_v44  ;;  %v3581_v44 = vld [vmem:[%s4947_s30 + $0x10c] ss:$0 sps:$4 sm:$0xff]  }
 0x5ff   : > { %v1815_v9 = vsel %vm1393_vm2, %v5154_v63, -inf  ;;  %v1819_v12 = vsel %vm1393_vm2, %v5156_v0, -inf  ;;  %1953 = vmatprep.subr.bf16.mxu1 %v4280_v22  ;;  %v2230_v45 = vsel %vm1937_vm9, %v3581_v44, 0 }
 0x600   : > { %v1816_v11 = vmax.f32 %v5158_v4, %v1815_v9  ;;  %v1820_v14 = vmax.f32 %v5165_v13, %v1819_v12 }
 0x602   : > { %1817 = vmax.xlane.f32.xlu1 %v1816_v11  ;;  %1954 = vmatpush1.bf16.msra.mxu1 %v3557_v46 }
 0x603   : > { %1955 = vmatprep.subr.bf16.mxu1 %v4280_v22 }
 0x606   : > { %1821 = vmax.xlane.f32.xlu1 %v1820_v14  ;;  %1956 = vmatpush1.bf16.msra.mxu1 %v3559_v48 }
 0x607   : > { %1957 = vmatprep.subr.bf16.mxu1 %v4280_v22 }
 0x647   : > { %v1810_v26 = vpop.xlane.xlu1 %1809  ;;  %v1814_v27 = vpop.xlane.xlu0 %1813 }
 0x648   : > { %v1823_v28 = vsub.f32 %v1459_v52, %v1810_v26  ;;  %v1824_v29 = vsub.f32 %v5143_v49, %v1810_v26  ;;  %v1825_v30 = vsub.f32 %v5147_v53, %v1814_v27  ;;  %v1826_v31 = vsub.f32 %v5145_v1, %v1814_v27  ;;  %v3560_v49 = vld [vmem:[%s4947_s30 + $0x74] sm:$0xff]   ;;  %v3561_v1 = vld [vmem:[%s4947_s30 + $0x40] ss:$0 sps:$4 sm:$0xff]   ;;  %v3563_v52 = vld [vmem:[%s4947_s30 + $0x84] ss:$0 sps:$4 sm:$0xff]  }
 0x649   : > { %2051 = vmatpush1.bf16.msra.mxu0 %v3560_v49  ;;  %v1939_v51 = vsel %vm1937_vm9, %v3561_v1, 0  ;;  %v2036_v53 = vsel %vm1937_vm9, %v3563_v52, 0  ;;  %v3565_v27 = vld [vmem:[%s4947_s30 + $0x90] sm:$0xff]  }
 0x64a   : > { %v1831_v32 = vmul.f32 1.442695, %v1823_v28  ;;  %v1833_v33 = vmul.f32 1.442695, %v1824_v29  ;;  %v1837_v34 = vmul.f32 1.442695, %v1826_v31  ;;  %2052 = vmatprep.subr.bf16.mxu0 %v4280_v22  ;;  %1958 = vmatpush1.bf16.msra.mxu1 %v1939_v51 }
 0x64b   : > { %v1835_v35 = vmul.f32 1.442695, %v1825_v30  ;;  %2135 = vmatprep.subr.bf16.mxu1 %v4280_v22  ;;  %v3566_v28 = vld [vmem:[%s4947_s30 + $0xcc] sm:$0xff]   ;;  %v3567_v29 = vld [vmem:[%s4947_s30 + $0x98] sm:$0xff]   ;;  %v3569_v31 = vld [vmem:[%s4947_s30 + $0xa0] sm:$0xff]  }
 0x64c   : > { %3596 = vpow2.f32 %v1831_v32  ;;  %v3568_v30 = vld [vmem:[%s4947_s30 + $0xd4] sm:$0xff]   ;;  %v3570_v32 = vld [vmem:[%s4947_s30 + $0xdc] sm:$0xff]  }
 0x64d   : > { %3598 = vpow2.f32 %v1833_v33  ;;  %2053 = vmatpush1.bf16.msra.mxu0 %v3562_v50  ;;  %v3571_v33 = vld [vmem:[%s4947_s30 + $0xa8] sm:$0xff]  }
 0x64e   : > { %3600 = vpow2.f32 %v1837_v34  ;;  %2054 = vmatprep.subr.bf16.mxu0 %v4280_v22  ;;  %v3572_v34 = vld [vmem:[%s4947_s30 + $0xe4] sm:$0xff]  }
 0x64f   : > { %3602 = vpow2.f32 %v1835_v35  ;;  %v3573_v35 = vld [vmem:[%s4947_s30 + $0xb0] sm:$0xff]  }
 0x651   : > { %2055 = vmatpush1.bf16.msra.mxu0 %v2036_v53 }
 0x652   : > { %2232 = vmatprep.subr.bf16.mxu0 %v4280_v22 }
 0x656   : > { %v5189_v36 = vpop.eup %3596 }
 0x657   : > { %v5191_v37 = vpop.eup %3598 }
 0x658   : > { %v1847_v38 = vsel %vm1393_vm2, %v5191_v37, 0.0  ;;  %v5195_v39 = vpop.eup %3600 }
 0x659   : > { %v1848_v40 = vadd.f32 %v5189_v36, %v1847_v38  ;;  %v5198_v41 = vpop.eup %3602  ;;  %v1851_v42 = vsel %vm1393_vm2, %v5195_v39, 0.0  ;;  %v3576_v38 = vld [vmem:[%s4947_s30 + $0xf4] sm:$0xff]  }
 0x65a   : > { %v1852_v43 = vadd.f32 %v5198_v41, %v1851_v42  ;;  %v3580_v42 = vld [vmem:[%s4947_s30 + $0x104] sm:$0xff]  }
 0x65b   : > { %1849 = vadd.xlane.f32.xlu1 %v1848_v40  ;;  %v3578_v40 = vld [vmem:[%s4947_s30 + $0xfc] sm:$0xff]  }
 0x65f   : > { %1853 = vadd.xlane.f32.xlu1 %v1852_v43 }
 0x68f   : > { %v1818_v5 = vpop.xlane.xlu1 %1817 }
 0x690   : > { %v1827_v54 = vsub.f32 %v5158_v4, %v1818_v5  ;;  %v1828_v55 = vsub.f32 %v5154_v63, %v1818_v5 }
 0x692   : > { %v1839_v56 = vmul.f32 1.442695, %v1827_v54  ;;  %v1841_v57 = vmul.f32 1.442695, %v1828_v55 }
 0x693   : > { %v1822_v58 = vpop.xlane.xlu1 %1821 }
 0x694   : > { %3604 = vpow2.f32 %v1839_v56  ;;  %v1829_v59 = vsub.f32 %v5165_v13, %v1822_v58  ;;  %v1830_v60 = vsub.f32 %v5156_v0, %v1822_v58  ;;  %v3582_v58 = vld [vmem:[#allocation22] sm:$0xff]  }
 0x695   : > { %3606 = vpow2.f32 %v1841_v57 }
 0x696   : > { %v1843_v61 = vmul.f32 1.442695, %v1829_v59  ;;  %v1845_v62 = vmul.f32 1.442695, %v1830_v60 }
 0x698   : > { %3608 = vpow2.f32 %v1843_v61 }
 0x699   : > { %3610 = vpow2.f32 %v1845_v62 }
 0x69e   : > { %v5227_v2 = vpop.eup %3604 }
 0x69f   : > { %v5229_v3 = vpop.eup %3606 }
 0x6a0   : > { %v1855_v63 = vsel %vm1393_vm2, %v5229_v3, 0.0 }
 0x6a1   : > { %v1856_v4 = vadd.f32 %v5227_v2, %v1855_v63 }
 0x6a2   : > { %v5234_v6 = vpop.eup %3608 }
 0x6a3   : > { %v5236_v7 = vpop.eup %3610  ;;  %1857 = vadd.xlane.f32.xlu1 %v1856_v4 }
 0x6a4   : > { %v1859_v0 = vsel %vm1393_vm2, %v5236_v7, 0.0 }
 0x6a5   : > { %v1860_v9 = vadd.f32 %v5234_v6, %v1859_v0 }
 0x6a7   : > { %1861 = vadd.xlane.f32.xlu0 %v1860_v9 }
 0x6e8   : > { %v1850_v11 = vpop.xlane.xlu1 %1849 }
 0x6e9   : > { %3612 = vrcp.f32 %v1850_v11 }
 0x6ec   : > { %v1854_v12 = vpop.xlane.xlu1 %1853 }
 0x6ed   : > { %3614 = vrcp.f32 %v1854_v12 }
 0x6f3   : > { %v3613_v13 = vpop.eup %3612 }
 0x6f4   : > { %v1868_v14 = vmul.f32 %v3613_v13, %v5191_v37  ;;  %v1867_v15 = vmul.f32 %v3613_v13, %v5189_v36  ;;  %v3574_v36 = vld [vmem:[%s4947_s30 + $0xec] sm:$0xff]   ;;  %v3575_v37 = vld [vmem:[%s4947_s30 + $0xb8] sm:$0xff]  }
 0x6f6   : > { %v1876_v17 = vpack.c.bf16 %v1868_v14, %v1868_v14  ;;  %v1875_v18 = vpack.c.bf16 %v1867_v15, %v1867_v15 }
 0x6f7   : > { %v3615_v20 = vpop.eup %3614 }
 0x6f8   : > { %3162 = vmatprep.mubr.msk.bf16.mxu1 %vm1393_vm2, %v1876_v17  ;;  %v1870_v21 = vmul.f32 %v3615_v20, %v5195_v39  ;;  %v1869_v23 = vmul.f32 %v3615_v20, %v5198_v41  ;;  %v3577_v39 = vld [vmem:[%s4947_s30 + $0xc0] sm:$0xff]   ;;  %v3579_v41 = vld [vmem:[%s4947_s30 + $0xc8] ss:$0 sps:$4 sm:$0xff]   ;;  %s2732_s30 = scalar_lea.sflag [#allocation33], %s4928_s18 }
 0x6f9   : > { %1974 = vmatmul.mubr.bf16.vlgmr.msra.gmra.mrb[8].mxu1 %v1875_v18  ;;  %v2133_v43 = vsel %vm1937_vm9, %v3579_v41, 0 }
 0x6fa   : > { %v1878_v24 = vpack.c.bf16 %v1870_v21, %v1870_v21  ;;  %v1877_v25 = vpack.c.bf16 %v1869_v23, %v1869_v23  ;;  %v5247_v26 = vadd.f32 %v1869_v23, %v1867_v15  ;;  %2136 = vmatpush1.bf16.msra.mxu1 %v3564_v19 }
 0x6fb   : > { %2137 = vmatprep.subr.bf16.mxu1 %v4280_v22 }
 0x6fc   : > { %3172 = vmatprep.mubr.msk.bf16.mxu0 %vm1393_vm2, %v1878_v24 }
 0x6fd   : > { %2071 = vmatmul.mubr.bf16.vlgmr.msra.gmra.mrb[12].mxu0 %v1877_v25 }
 0x6fe   : > { %2138 = vmatpush1.bf16.msra.mxu1 %v3565_v27  ;;  %2233 = vmatpush1.bf16.msra.mxu0 %v3566_v28 }
 0x6ff   : > { %2139 = vmatprep.subr.bf16.mxu1 %v4280_v22  ;;  %2234 = vmatprep.subr.bf16.mxu0 %v4280_v22 }
 0x702   : > { %2140 = vmatpush1.bf16.msra.mxu1 %v3567_v29  ;;  %2235 = vmatpush1.bf16.msra.mxu0 %v3568_v30  ;;  %v3583_v29 = vld [vmem:[#allocation22 + $0x8] sm:$0xff]  }
 0x703   : > { %2141 = vmatprep.subr.bf16.mxu1 %v4280_v22  ;;  %2236 = vmatprep.subr.bf16.mxu0 %v4280_v22 }
 0x706   : > { %2142 = vmatpush1.bf16.msra.mxu1 %v3569_v31  ;;  %2237 = vmatpush1.bf16.msra.mxu0 %v3570_v32 }
 0x707   : > { %2143 = vmatprep.subr.bf16.mxu1 %v4280_v22  ;;  %2238 = vmatprep.subr.bf16.mxu0 %v4280_v22 }
 0x70a   : > { %2144 = vmatpush1.bf16.msra.mxu1 %v3571_v33  ;;  %2239 = vmatpush1.bf16.msra.mxu0 %v3572_v34 }
 0x70b   : > { %2145 = vmatprep.subr.bf16.mxu1 %v4280_v22  ;;  %2240 = vmatprep.subr.bf16.mxu0 %v4280_v22 }
 0x70e   : > { %2146 = vmatpush1.bf16.msra.mxu1 %v3573_v35  ;;  %2241 = vmatpush1.bf16.msra.mxu0 %v3574_v36 }
 0x70f   : > { %2147 = vmatprep.subr.bf16.mxu1 %v4280_v22  ;;  %2242 = vmatprep.subr.bf16.mxu0 %v4280_v22 }
 0x712   : > { %2148 = vmatpush1.bf16.msra.mxu1 %v3575_v37  ;;  %2243 = vmatpush1.bf16.msra.mxu0 %v3576_v38 }
 0x713   : > { %2149 = vmatprep.subr.bf16.mxu1 %v4280_v22  ;;  %2244 = vmatprep.subr.bf16.mxu0 %v4280_v22 }
 0x716   : > { %2150 = vmatpush1.bf16.msra.mxu1 %v3577_v39  ;;  %2245 = vmatpush1.bf16.msra.mxu0 %v3578_v40 }
 0x717   : > { %2151 = vmatprep.subr.bf16.mxu1 %v4280_v22  ;;  %2246 = vmatprep.subr.bf16.mxu0 %v4280_v22 }
 0x71a   : > { %2152 = vmatpush1.bf16.msra.mxu1 %v2133_v43  ;;  %2247 = vmatpush1.bf16.msra.mxu0 %v3580_v42 }
 0x71b   : > { %2248 = vmatprep.subr.bf16.mxu0 %v4280_v22  ;;  %3262 = vmatprep.subr.bf16.mxu1 %v4278_v8 }
 0x71e   : > { %2249 = vmatpush1.bf16.msra.mxu0 %v2230_v45 }
 0x71f   : > { %3246 = vmatprep.subr.bf16.mxu0 %v4278_v8 }
 0x730   : > { %v1858_v46 = vpop.xlane.xlu1 %1857 }
 0x731   : > { %3616 = vrcp.f32 %v1858_v46 }
 0x734   : > { %v1862_v47 = vpop.xlane.xlu0 %1861 }
 0x735   : > { %3618 = vrcp.f32 %v1862_v47 }
 0x73b   : > { %v3617_v48 = vpop.eup %3616 }
 0x73c   : > { %v1872_v49 = vmul.f32 %v3617_v48, %v5229_v3  ;;  %v1871_v1 = vmul.f32 %v3617_v48, %v5227_v2 }
 0x73e   : > { %v1880_v50 = vpack.c.bf16 %v1872_v49, %v1872_v49  ;;  %v1879_v51 = vpack.c.bf16 %v1871_v1, %v1871_v1  ;;  %v2490_v52 = vadd.f32 %v5247_v26, %v1871_v1 }
 0x73f   : > { %v3619_v22 = vpop.eup %3618 }
 0x740   : > { %3182 = vmatprep.mubr.msk.bf16.mxu1 %vm1393_vm2, %v1880_v50  ;;  %v1874_v53 = vmul.f32 %v3619_v22, %v5236_v7  ;;  %v1873_v5 = vmul.f32 %v3619_v22, %v5234_v6 }
 0x741   : > { %2168 = vmatmul.mubr.bf16.vlgmr.msra.gmra.mrb[12].mxu1 %v1879_v51 }
 0x742   : > { %v1882_v54 = vpack.c.bf16 %v1874_v53, %v1874_v53  ;;  %v1881_v55 = vpack.c.bf16 %v1873_v5, %v1873_v5  ;;  %v2491_v56 = vadd.f32 %v2490_v52, %v1873_v5  ;;  %3278 = vmatprep.mubr.msk.bf16.mxu1 %vm4279_vm1, %v4278_v8 }
 0x744   : > { %3192 = vmatprep.mubr.msk.bf16.mxu0 %vm1393_vm2, %v1882_v54  ;;  %v2724_v57 = vmul.f32 0.25, %v2491_v56  ;;  %v2430_v56 = vld [vmem:[#allocation3] sm:$0xff] }
 0x745   : > { %2265 = vmatmul.mubr.bf16.vlgmr.msra.gmra.mrb[16].mxu0 %v1881_v55 }
 0x746   : > { %3250 = vmatprep.mubr.msk.bf16.mxu0 %vm4279_vm1, %v4278_v8  ;;  %2725 = vst [vmem:[%s920_s2] sm:$0xff] %v2724_v57  ;;  %3247 = vmatpush3.bf16.msra.mxu0 %v3582_v58 }
 0x747   : > { %3248 = vmatprep.subr.bf16.mxu0 %v4278_v8 }
 0x74a   : > { %3249 = vmatpush3.bf16.msra.mxu0 %v3583_v29  ;;  %v3588_v29 = vld [vmem:[#allocation28 + $0x10] sm:$0xff]  }
 0x74b   : > { %3254 = vmatprep.subr.bf16.mxu0 %v4278_v8 }
 0x7cc   : > { %v1975_v59 = vpop.f32.mrb[8].mxu1 }
 0x7cd   : > { %v1977_v60 = vpop.f32.mrb[9].mxu1 }
 0x7ce   : > { %v1978_v61 = vpop.f32.mrb[10].mxu1 }
 0x7cf   : > { %v1979_v62 = vpop.f32.mrb[11].mxu1 }
 0x7d0   : > { %v2072_v2 = vpop.f32.mrb[12].mxu0  ;;  %v3198_v62 = vld [vmem:[#allocation24] ss:$0 sm:$0xff] }
 0x7d1   : > { %v2074_v3 = vpop.f32.mrb[13].mxu0 }
 0x7d2   : > { %v2075_v63 = vpop.f32.mrb[14].mxu0 }
 0x7d3   : > { %v2076_v4 = vpop.f32.mrb[15].mxu0  ;;  %v3624_v63 = vld [vmem:[%s763_s14] sm:$0xff] }
 0x814   : > { %v2169_v6 = vpop.f32.mrb[12].mxu1 }
 0x815   : > { %v2272_v7 = vcombine.low %v1975_v59, %v2169_v6  ;;  %v2273_v0 = vcombine.high %v1975_v59, %v2169_v6  ;;  %v2171_v9 = vpop.f32.mrb[13].mxu1 }
 0x816   : > { %v2172_v11 = vpop.f32.mrb[14].mxu1 }
 0x817   : > { %v2173_v12 = vpop.f32.mrb[15].mxu1  ;;  %v2280_v19 = vrot.slane %v2272_v7, %v5052_v10  ;;  %v2287_v20 = vrot.slane %v2273_v0, %v5052_v10 }
 0x818   : > { %v2266_v13 = vpop.f32.mrb[16].mxu0 }
 0x819   : > { %v2288_v14 = vcombine.low %v2072_v2, %v2266_v13  ;;  %v2289_v15 = vcombine.high %v2072_v2, %v2266_v13  ;;  %v2268_v17 = vpop.f32.mrb[17].mxu0  ;;  %v3584_v13 = vld [vmem:[#allocation25] sm:$0xff]  }
 0x81a   : > { %v2269_v18 = vpop.f32.mrb[18].mxu0 }
 0x81b   : > { %v2296_v21 = vrot.slane %v2288_v14, %v5052_v10  ;;  %v2303_v23 = vrot.slane %v2289_v15, %v5052_v10  ;;  %v2270_v24 = vpop.f32.mrb[19].mxu0  ;;  %v3585_v14 = vld [vmem:[#allocation25 + $0x8] sm:$0xff]  }
 0x81d   : > { %v2304_v25 = vcombine.low %v2280_v19, %v2296_v21  ;;  %v2305_v26 = vcombine.high %v2280_v19, %v2296_v21  ;;  %v2320_v27 = vcombine.low %v2287_v20, %v2303_v23  ;;  %v2321_v28 = vcombine.high %v2287_v20, %v2303_v23  ;;  %v3199_v20 = vld [vmem:[#allocation16] ss:$0 sm:$0xff]  ;;  %v3200_v23 = vld [vmem:[#allocation18] ss:$0 sm:$0xff] }
 0x81f   : > { %v2312_v30 = vrot.slane %v2304_v25, %v5055_v16  ;;  %v2319_v31 = vrot.slane %v2305_v26, %v5055_v16  ;;  %v2328_v32 = vrot.slane %v2320_v27, %v5055_v16  ;;  %v2335_v33 = vrot.slane %v2321_v28, %v5055_v16  ;;  %v3586_v27 = vld [vmem:[#allocation28] sm:$0xff]   ;;  %v3587_v28 = vld [vmem:[#allocation28 + $0x8] sm:$0xff]  }
 0x820   : > { %3263 = vmatpush3.bf16.msra.mxu1 %v3586_v27 }
 0x821   : > { %v2340_v34 = vcombine.low %v2312_v30, %v2319_v31  ;;  %v3193_v35 = vcombine.high %v2312_v30, %v2319_v31  ;;  %v2356_v36 = vcombine.low %v2328_v32, %v2335_v33  ;;  %v3194_v37 = vcombine.high %v2328_v32, %v2335_v33  ;;  %3264 = vmatprep.subr.bf16.mxu1 %v4278_v8  ;;  %v3589_v30 = vld [vmem:[#allocation28 + $0x18] sm:$0xff]   ;;  %v3590_v31 = vld [vmem:[#allocation28 + $0x20] sm:$0xff]   ;;  %v3591_v32 = vld [vmem:[#allocation28 + $0x28] sm:$0xff]  }
 0x822   : > { %v3592_v33 = vld [vmem:[#allocation28 + $0x30] sm:$0xff]  }
 0x823   : > { %v2347_v38 = vrot.slane %v2340_v34, %v5052_v10  ;;  %v2355_v39 = vrot.slane %v3193_v35, %v5052_v10  ;;  %v2363_v40 = vrot.slane %v2356_v36, %v5052_v10  ;;  %v2371_v41 = vrot.slane %v3194_v37, %v5052_v10  ;;  %v3593_v34 = vld [vmem:[#allocation28 + $0x38] sm:$0xff]  }
 0x824   : > { %3265 = vmatpush3.bf16.msra.mxu1 %v3587_v28  ;;  %v3201_v35 = vld [vmem:[#allocation27] ss:$0 sm:$0xff] }
 0x825   : > { %v2373_v42 = vcombine.high %v2347_v38, %v2355_v39  ;;  %v2389_v43 = vcombine.high %v2363_v40, %v2371_v41  ;;  %v2372_v44 = vcombine.low %v2347_v38, %v2355_v39  ;;  %v2388_v45 = vcombine.low %v2363_v40, %v2371_v41  ;;  %3266 = vmatprep.subr.bf16.mxu1 %v4278_v8 }
 0x827   : > { %v2387_v46 = vrot.slane %v2373_v42, %v5055_v16  ;;  %v2403_v47 = vrot.slane %v2389_v43, %v5055_v16  ;;  %v2380_v48 = vrot.slane %v2372_v44, %v5055_v16  ;;  %v2396_v49 = vrot.slane %v2388_v45, %v5055_v16 }
 0x828   : > { %3267 = vmatpush3.bf16.msra.mxu1 %v3588_v29 }
 0x829   : > { %v2406_v1 = vcombine.low %v2387_v46, %v2403_v47  ;;  %v2405_v50 = vcombine.high %v2380_v48, %v2396_v49  ;;  %v2407_v51 = vcombine.high %v2387_v46, %v2403_v47  ;;  %v2404_v22 = vcombine.low %v2380_v48, %v2396_v49  ;;  %3268 = vmatprep.subr.bf16.mxu1 %v4278_v8 }
 0x82b   : > { %2413 = vrot.lane.b32.xlu0 %v2406_v1, %s4286_s11  ;;  %2409 = vrot.lane.b32.xlu1 %v2405_v50, %s4287_s16 }
 0x82c   : > { %3269 = vmatpush3.bf16.msra.mxu1 %v3589_v30 }
 0x82d   : > { %3270 = vmatprep.subr.bf16.mxu1 %v4278_v8 }
 0x82f   : > { %2417 = vrot.lane.b32.xlu1 %v2407_v51, %s4288_s13 }
 0x830   : > { %3271 = vmatpush3.bf16.msra.mxu1 %v3590_v31 }
 0x831   : > { %3272 = vmatprep.subr.bf16.mxu1 %v4278_v8 }
 0x834   : > { %3273 = vmatpush3.bf16.msra.mxu1 %v3591_v32 }
 0x835   : > { %3274 = vmatprep.subr.bf16.mxu1 %v4278_v8 }
 0x838   : > { %3275 = vmatpush3.bf16.msra.mxu1 %v3592_v33 }
 0x839   : > { %3276 = vmatprep.subr.bf16.mxu1 %v4278_v8 }
 0x83c   : > { %3277 = vmatpush3.bf16.msra.mxu1 %v3593_v34 }
 0x89d   : > { %v2410_v10 = vpop.permute.xlu1 %2409  ;;  %v2414_v52 = vpop.permute.xlu0 %2413 }
 0x89e   : > { %v2420_v53 = vsel %vm1393_vm2, %v2404_v22, %v2410_v10 }
 0x89f   : > { %v2422_v54 = vsel %vm2421_vm10, %v2420_v53, %v2414_v52 }
 0x8a1   : > { %v2418_v5 = vpop.permute.xlu1 %2417 }
 0x8a2   : > { %v2424_v16 = vsel %vm2423_vm11, %v2422_v54, %v2418_v5 }
 0x8a3   : > { %v2425_v55 = vpack.c.bf16 %v2424_v16, %v2424_v16 }
 0x8a5   : > { %3251 = vmatmul.mubr.msk.bf16.vlgmr.msra.gmra.mrb[20].mxu0 %vm925_vm0, %v2425_v55 }
 0x8a6   : > { %3258 = vmatprep.mubr.msk.bf16.mxu0 %vm4279_vm1, %v4278_v8  ;;  %3255 = vmatpush3.bf16.msra.mxu0 %v3584_v13 }
 0x8a7   : > { %3256 = vmatprep.subr.bf16.mxu0 %v4278_v8 }
 0x8aa   : > { %3257 = vmatpush3.bf16.msra.mxu0 %v3585_v14 }
 0x978   : > { %v2480_v57 = vpop.f32.mrb[20].mxu0 }
 0x979   : > { %v2486_v58 = vadd.f32 %v2480_v57, %v2430_v56  ;;  %v3252_v59 = vpop.f32.mrb[21].mxu0 }
 0x97a   : > { %v2483_v60 = vpop.f32.mrb[22].mxu0 }
 0x97b   : > { %2487 = vst.msk [vmem:[#allocation3] sm:$0xff] %vm925_vm0, %v2486_v58  ;;  %v3253_v61 = vpop.f32.mrb[23].mxu0 }
 0x982   : > { %v2494_v2 = vld [vmem:[#allocation3] sm:$0xff] }
 0x983   : > { %v2502_v3 = vadd.f32 %v3198_v62, %v2494_v2 }
 0x985   : > { %v5326_v4 = vadd.f32 %v3624_v63, %v2502_v3 }
 0x987   : > { %v2506_v6 = vsel %vm925_vm0, %v5326_v4, 0.0 }
 0x988   : > { %2507 = vadd.xlane.f32.xlu1 %v2506_v6 }
 0xa15   : > { %v2508_v7 = vpop.xlane.xlu1 %2507 }
 0xa16   : > { %v2509_v0 = vmul.f32 0.03125, %v2508_v7 }
 0xa18   : > { %v2510_v9 = vsub.f32 %v5326_v4, %v2509_v0 }
 0xa1a   : > { %v2511_v11 = vmul.f32 %v2510_v9, %v2510_v9 }
 0xa1c   : > { %v2512_v12 = vsel %vm925_vm0, %v2511_v11, 0.0 }
 0xa1d   : > { %2513 = vadd.xlane.f32.xlu0 %v2512_v12 }
 0xaaa   : > { %v2514_v15 = vpop.xlane.xlu0 %2513 }
 0xaab   : > { %v2515_v17 = vmul.f32 0.03125, %v2514_v15 }
 0xaad   : > { %v2516_v18 = vadd.f32 1e-05, %v2515_v17 }
 0xaaf   : > { %3620 = vrsqrt.f32 %v2516_v18 }
 0xab9   : > { %v3621_v19 = vpop.eup %3620 }
 0xaba   : > { %v2518_v21 = vmul.f32 %v3621_v19, %v2510_v9 }
 0xabc   : > { %v2525_v24 = vmul.f32 %v3199_v20, %v2518_v21 }
 0xabe   : > { %v2532_v25 = vadd.f32 %v3200_v23, %v2525_v24 }
 0xac0   : > { %v2533_v26 = vpack.c.bf16 %v2532_v25, %v2532_v25 }
 0xac2   : > { %3259 = vmatmul.mubr.msk.bf16.vlgmr.msra.gmra.mrb[24].mxu0 %vm925_vm0, %v2533_v26 }
 0xb95   : > { %v2594_v36 = vpop.f32.mrb[24].mxu0 }
 0xb96   : > { %v2595_v37 = vadd.f32 %v3201_v35, %v2594_v36  ;;  %v3260_v38 = vpop.f32.mrb[25].mxu0 }
 0xb97   : > { %v2597_v39 = vpop.f32.mrb[26].mxu0 }
 0xb98   : > { %v2600_v40 = vmul.f32 %v2595_v37, %v2595_v37  ;;  %v3261_v41 = vpop.f32.mrb[27].mxu0 }
 0xb9a   : > { %v2601_v42 = vmul.f32 %v2600_v40, %v2595_v37 }
 0xb9c   : > { %v2602_v43 = vmul.f32 0.044715, %v2601_v42 }
 0xb9e   : > { %v2603_v44 = vadd.f32 %v2602_v43, %v2595_v37 }
 0xba0   : > { %v2604_v45 = vmul.f32 0.7978846, %v2603_v44 }
 0xba2   : > { %3622 = vtanh.f32 %v2604_v45 }
 0xbac   : > { %v3623_v46 = vpop.eup %3622 }
 0xbad   : > { %v2606_v8 = vadd.f32 1.0, %v3623_v46 }
 0xbaf   : > { %v2607_v47 = vmul.f32 0.5, %v2606_v8 }
 0xbb1   : > { %v2608_v48 = vmul.f32 %v2607_v47, %v2595_v37 }
 0xbb3   : > { %v2609_v49 = vpack.c.bf16 %v2608_v48, %v2608_v48 }
 0xbb5   : > { %3279 = vmatmul.mubr.bf16.vlgmr.msra.gmra.mrb[16].mxu1 %v2609_v49 }
 0xbb6   : > { %4124 = shalt.err (!%p4121_p3)
}
 0xbb7   : > { %s4125_s8 = scalar_lea.hbm %s5347_s7, 128  ;;  %s4129_s11 = scalar_lea.hbm %s5564_s17, 256 }
 0xbb8   : > { %p4126_p12 = scmp.ne.s32.totalorder %s5347_s7, %s4125_s8  ;;  %p4130_p8 = scmp.lt.u32.totalorder %s5347_s7, %s5564_s17 }
 0xbb9   : > { %p4131_p2 = scmp.lt.u32.totalorder %s4129_s11, %s4125_s8  ;;  %p4133_p0 = scmp.lt.u32.totalorder %s4125_s8, %s5347_s7 }
 0xbba   : > { %p4127_p6 = pnand %p4126_p12, %p5565_p7 }
 0xbbb   : > { %p4132_p5 = por %p4131_p2, %p4130_p8 }
 0xbbc   : > { %p4128_p11 = pneg %p4127_p6 }
 0xbbd   : > { %p4134_p4 = por %p4133_p0, %p4132_p5 }
 0xbbf   : > { %p4135_p10 = pnand %p4134_p4, %p4128_p11 }
 0xbc1   : > { %4138 = shalt.err (!%p4135_p10)
}
 0xbc2   : > { %3346 = dma.vmem_to_hbm [thread:$0]  (%p5565_p7), %s2761_s26, 128, %s5347_s7, %s2732_s30   ;;  %v3205_v1 = vld [vmem:[#allocation30] ss:$0 sm:$0xff] }
 0xbc3   : > { %s913_s27 = scalar_lea.vmem [#allocation31], %s4931_s24  ;;  %s5566_s12 = sld [smem:[#allocation68_spill]] }
 0xbc4   : > { %s2746_s14 = sshll.u32 %s913_s27, 4  ;;  %s2727_s24 = scalar_lea.sflag [#allocation6], %s4928_s18  ;;  %s5378_s14 = int_to_ptr.vmem [resolvable:$true] %s2746_s14 }
 0xbc5   : > { %s4139_s7 = scalar_lea.vmem %s5378_s14, 128  ;;  %s4290_s26 = smov [#allocation31]  }
 0xbc6   : > { %p4140_p9 = scmp.ne.s32.totalorder %s5378_s14, %s4139_s7  ;;  %s4143_s22 = sshll.u32 %s4290_s26, 4  ;;  %s4144_s22 = int_to_ptr.vmem [resolvable:$false] %s4143_s22 }
 0xbc7   : > { %s4145_s30 = scalar_lea.vmem %s4144_s22, 256  ;;  %p4146_p3 = scmp.lt.s32.totalorder %s5378_s14, %s4144_s22 }
 0xbc8   : > { %p4141_p1 = pnand %p4140_p9, %p5565_p7  ;;  %p4147_p12 = scmp.lt.s32.totalorder %s4145_s30, %s4139_s7 }
 0xbc9   : > { %s5376_s9 = scalar_lea.hbm %s5566_s12, %s3216_s25 }
 0xbca   : > { %p4142_p13 = pneg %p4141_p1  ;;  %p4148_p6 = por %p4147_p12, %p4146_p3 }
 0xbcc   : > { %p4149_p11 = pnand %p4148_p6, %p4142_p13 }
 0xc88   : > { %v2715_v50 = vpop.f32.mrb[16].mxu1 }
 0xc89   : > { %v2716_v51 = vadd.f32 %v3205_v1, %v2715_v50  ;;  %v3280_v22 = vpop.f32.mrb[17].mxu1 }
 0xc8a   : > { %v2718_v10 = vpop.f32.mrb[18].mxu1 }
 0xc8b   : > { %v2721_v52 = vadd.f32 %v2716_v51, %v5326_v4  ;;  %v3281_v53 = vpop.f32.mrb[19].mxu1 }
 0xc8d   : > { %2722 = vst.msk [vmem:[%s913_s27] sm:$0xff] %vm925_vm0, %v2721_v52 }
 0xc8e   : > { %4152 = shalt.err (!%p4149_p11)
}
 0xc8f   : > { %s4153_s18 = scalar_lea.hbm %s5376_s9, 128  ;;  %s4157_s8 = scalar_lea.hbm %s5566_s12, 256 }
 0xc90   : > { %p4154_p8 = scmp.ne.s32.totalorder %s5376_s9, %s4153_s18  ;;  %p4158_p0 = scmp.lt.u32.totalorder %s5376_s9, %s5566_s12 }
 0xc91   : > { %p4159_p4 = scmp.lt.u32.totalorder %s4157_s8, %s4153_s18  ;;  %p4161_p9 = scmp.lt.u32.totalorder %s4153_s18, %s5376_s9 }
 0xc92   : > { %p4155_p2 = pnand %p4154_p8, %p5565_p7 }
 0xc93   : > { %p4160_p10 = por %p4159_p4, %p4158_p0 }
 0xc94   : > { %p4156_p5 = pneg %p4155_p2 }
 0xc95   : > { %p4162_p1 = por %p4161_p9, %p4160_p10 }
 0xc97   : > { %p4163_p13 = pnand %p4162_p1, %p4156_p5 }
 0xc99   : > { %4166 = shalt.err (!%p4163_p13)
}
 0xc9a   : > { %3345 = dma.vmem_to_hbm [thread:$0]  (%p5565_p7), %s5378_s14, 128, %s5376_s9, %s2727_s24  }
 0xc9b PF: > { %s5567_s11 = sld [smem:[#allocation45_spill]]  ;;  %s5568_s16 = sld [smem:[#allocation51_spill]] }
 0xc9c   : > { %p5570_p12 = scmp.ge.s32.totalorder %s4257_s19, 2 }
 0xca1   : > { %s2772_s13 = sand.u32 1, %s5567_s11   ;;  %p5569_p3 = scmp.ne.s32.totalorder %s5568_s16, 0 }
 0xca2   : > { %s2773_s27 = scalar_lea.sflag [#allocation6], %s2772_s13 }
 0xca3   : > { %p3403_p6 = pnand %p5570_p12, %p5569_p3 }
 0xca5   : > { %4228 = dma.done.wait (!%p3403_p6), %s2773_s27, 128  }
 0xca6   : > { %4230 = vsyncadd (!%p3403_p6), %s2773_s27, 4294967168  ;;  %s2782_s29 = scalar_lea.sflag [#allocation33], %s2772_s13 }
 0xca7   : > { %4232 = dma.done.wait (!%p3403_p6), %s2782_s29, 128  }
 0xca8   : > { %4234 = vsyncadd (!%p3403_p6), %s2782_s29, 4294967168  ;;  %s50_s19 = sadd.s32 1, %s4257_s19   ;;  %s5571_s10 = sld [smem:[#allocation46_spill]] }
 0xca9   : > { %p47_p11 = scmp.ge.s32.totalorder %s50_s19, 4   ;;  %s5572_s29 = sld [smem:[#allocation50_spill]] }
 0xcaa   : > { %s5573_s14 = sld [smem:[#allocation49_spill]]  ;;  %s5574_s27 = smov %s4241_s28 }
 0xcab   : > { %s5576_s30 = smov %s4253_s0  ;;  %49 = sbr.rel (!%p47_p11) target bundleno = 37 (0x25), region = 248 }
 0xcae   : > { %s5575_s28 = smov %s5571_s10 }
 0xcb0   : > { %s5577_s0 = smov %s5573_s14 }
 0xcb2   :  { %2787 = vsyncpa [#allocation5], 1 }
 0xcb3   :  { %2789 = vsyncpa [#allocation5 + $0x1], 1 }
 0xcb4   :  { %2790 = vsyncpa [#allocation8], 1 }
 0xcb5   :  { %2792 = vsyncpa [#allocation8 + $0x1], 1 }
 0xcb6   :  { %2793 = vsyncpa [#allocation11], 1 }
 0xcb7   :  { %2795 = vsyncpa [#allocation11 + $0x1], 1 }
 0xcb8   :  { %2796 = vsyncpa [#allocation14], 1 }
 0xcb9   :  { %2797 = vsyncpa [#allocation17], 1 }
 0xcba   :  { %2798 = vsyncpa [#allocation20], 1 }
 0xcbb   :  { %2799 = vsyncpa [#allocation23], 1 }
 0xcbc   :  { %2800 = vsyncpa [#allocation26], 1 }
 0xcbd   :  { %2801 = vsyncpa [#allocation29], 1 }
 0xcbe   :  { %2802 = vsyncpa [#allocation6], 1 }
 0xcbf   :  { %2804 = vsyncpa [#allocation6 + $0x1], 1 }
 0xcc0   :  { %2805 = vsyncpa [#allocation33], 1 }
 0xcc1   :  { %2807 = vsyncpa [#allocation33 + $0x1], 1 }

// kernel: tpu_custom_call.1
= control target key start
LH: loop header
LB: loop body
LE: loop exit
PB: predicated region body
PF: predicated region fallthrough
CT: control target
= control target key end

     0   :  { %s5426_s0 = inlined_call_operand.hbm [shape: f32[2,8,32], index: 0, kind: input, shape index: {}]   ;;  %s5427_s1 = inlined_call_operand.hbm [shape: bf16[2,4,136,8], index: 1, kind: input, shape index: {}]   ;;  %s5428_s2 = inlined_call_operand.hbm [shape: bf16[2,4,136,8], index: 2, kind: input, shape index: {}]   ;;  %s5429_s3 = inlined_call_operand.hbm [shape: f32[2,1,128], index: 3, kind: input, shape index: {}]   ;;  %s5430_s4 = inlined_call_operand.hbm [shape: f32[2,1,8], index: 4, kind: input, shape index: {}]   ;;  %s5431_s5 = inlined_call_operand.hbm [shape: f32[1,32], index: 5, kind: input, shape index: {}]   ;;  %s5432_s6 = inlined_call_operand.hbm [shape: f32[1,32], index: 6, kind: input, shape index: {}]   ;;  %s5433_s7 = inlined_call_operand.hbm [shape: f32[1,32], index: 7, kind: input, shape index: {}]   ;;  %s5434_s8 = inlined_call_operand.hbm [shape: f32[1,32], index: 8, kind: input, shape index: {}]   ;;  %s5435_s9 = inlined_call_operand.hbm [shape: bf16[32,32], index: 9, kind: input, shape index: {}]   ;;  %s5436_s10 = inlined_call_operand.hbm [shape: f32[1,32], index: 10, kind: input, shape index: {}]   ;;  %s5437_s11 = inlined_call_operand.hbm [shape: bf16[32,32], index: 11, kind: input, shape index: {}]   ;;  %s5438_s12 = inlined_call_operand.hbm [shape: f32[1,32], index: 12, kind: input, shape index: {}]   ;;  %s5439_s13 = inlined_call_operand.hbm [shape: bf16[32,128], index: 13, kind: input, shape index: {}]   ;;  %s5440_s14 = inlined_call_operand.hbm [shape: f32[1,128], index: 14, kind: input, shape index: {}]   ;;  %s5441_s15 = inlined_call_operand.hbm [shape: bf16[128,32], index: 15, kind: input, shape index: {}]   ;;  %s5442_s16 = inlined_call_operand.hbm [shape: f32[1,32], index: 16, kind: input, shape index: {}]   ;;  %s5443_s17 = inlined_call_operand.hbm [shape: f32[2,8,32], index: 17, kind: output, shape index: {0}]   ;;  %s5444_s18 = inlined_call_operand.hbm [shape: f32[2,8,128], index: 18, kind: output, shape index: {1}]  }
   0x1   :  { %5483 = sst [smem:[#allocation52_spill]] %s5426_s0 }
   0x2   :  { %5484 = sst [smem:[#allocation53_spill]] %s5427_s1 }
   0x3   :  { %5485 = sst [smem:[#allocation54_spill]] %s5428_s2 }
   0x4   :  { %5486 = sst [smem:[#allocation55_spill]] %s5429_s3 }
   0x5   :  { %5487 = sst [smem:[#allocation56_spill]] %s5431_s5 }
   0x6   :  { %5488 = sst [smem:[#allocation57_spill]] %s5432_s6 }
   0x7   :  { %5489 = sst [smem:[#allocation58_spill]] %s5433_s7 }
   0x8   :  { %5490 = sst [smem:[#allocation59_spill]] %s5434_s8 }
   0x9   :  { %5491 = sst [smem:[#allocation60_spill]] %s5435_s9 }
   0xa   :  { %5492 = sst [smem:[#allocation61_spill]] %s5436_s10 }
   0xb   :  { %5493 = sst [smem:[#allocation62_spill]] %s5437_s11 }
   0xc   :  { %5494 = sst [smem:[#allocation63_spill]] %s5438_s12 }
   0xd   :  { %5495 = sst [smem:[#allocation64_spill]] %s5439_s13 }
   0xe   :  { %5496 = sst [smem:[#allocation65_spill]] %s5440_s14 }
   0xf   :  { %5497 = sst [smem:[#allocation66_spill]] %s5441_s15 }
  0x10   :  { %5498 = sst [smem:[#allocation67_spill]] %s5442_s16 }
  0x11   :  { %5499 = sst [smem:[#allocation68_spill]] %s5443_s17 }
  0x12   :  { %5500 = sst [smem:[#allocation69_spill]] %s5444_s18 }
  0x13   :  { %24 = vsyncpa [#allocation5], 0 }
  0x14   :  { %26 = vsyncpa [#allocation5 + $0x1], 0 }
  0x15   :  { %27 = vsyncpa [#allocation8], 0 }
  0x16   :  { %29 = vsyncpa [#allocation8 + $0x1], 0 }
  0x17   :  { %30 = vsyncpa [#allocation11], 0 }
  0x18   :  { %32 = vsyncpa [#allocation11 + $0x1], 0 }
  0x19   :  { %33 = vsyncpa [#allocation14], 0 }
  0x1a   :  { %34 = vsyncpa [#allocation17], 0 }
  0x1b   :  { %35 = vsyncpa [#allocation20], 0 }
  0x1c   :  { %36 = vsyncpa [#allocation23], 0 }
  0x1d   :  { %37 = vsyncpa [#allocation26], 0 }
  0x1e   :  { %38 = vsyncpa [#allocation29], 0 }
  0x1f   :  { %39 = vsyncpa [#allocation6], 0 }
  0x20   :  { %41 = vsyncpa [#allocation6 + $0x1], 0 }
  0x21   :  { %42 = vsyncpa [#allocation33], 0 }
  0x22   :  { %44 = vsyncpa [#allocation33 + $0x1], 0  ;;  %s4386_s27 = smov 0   ;;  %s4388_s28 = smov 0  }
  0x23   :  { %s4390_s29 = smov 0   ;;  %s4392_s30 = smov 0  }
  0x24   :  { %s4394_s0 = smov 0   ;;  %s4396_s19 = smov 0  }
  0x25 LB: > { %5501 = sst [smem:[#allocation45_spill]] %s4237_s27  ;;  %s4417_s1 = sadd.s32 4294967295, %s4257_s19   ;;  %s4257_s19 = sphi %s4396_s19, %s50_s19   ;;  %s4253_s0 = sphi %s4394_s0, %s5577_s0   ;;  %s4249_s30 = sphi %s4392_s30, %s5576_s30   ;;  %s4245_s29 = sphi %s4390_s29, %s5572_s29   ;;  %s4241_s28 = sphi %s4388_s28, %s5575_s28   ;;  %s4237_s27 = sphi %s4386_s27, %s5574_s27  }
  0x26   : > { %5502 = sst [smem:[#allocation46_spill]] %s4245_s29  ;;  %p3069_p0 = scmp.ge.s32.totalorder %s4257_s19, 1 }
  0x27   : > { %5503 = sst [smem:[#allocation47_spill]] %s4249_s30  ;;  %p5453_p1 = scmp.eq.s32.totalorder %s4417_s1, 0 }
  0x28   : > { %p507_p2 = scmp.lt.s32.totalorder %s4257_s19, 3  ;;  %s4259_s21 = smov [#allocation13]  }
  0x29   : > { %s520_s22 = sshll.u32 %s4259_s21, 4  ;;  %s4260_s2 = smov [#allocation16]   ;;  %s521_s22 = int_to_ptr.vmem [resolvable:$true] %s520_s22 }
  0x2a   : > { %p4422_p3 = pnand %p3069_p0, %p507_p2  ;;  %s542_s23 = sshll.u32 %s4260_s2, 4  ;;  %s4435_s23 = int_to_ptr.vmem [resolvable:$true] %s542_s23 }
  0x2b   : > { %s4261_s25 = smov [#allocation19]   ;;  %s5507_s5 = sld [smem:[#allocation56_spill]] }
  0x2c   : > { %s5504_s20 = scalar_select %p4422_p3, 1, 0 }
  0x2d   : > { %p3349_p5 = pneg %p4422_p3  ;;  %s563_s26 = sshll.u32 %s4261_s25, 4  ;;  %s4437_s26 = int_to_ptr.vmem [resolvable:$true] %s563_s26 }
  0x2e   : > { %5505 = sst [smem:[#allocation48_spill]] %s5504_s20 }
  0x2f   : > { %p4431_p6 = pnand %p3349_p5, %p5453_p1 }
  0x31   : > { %s5506_s24 = scalar_select %p4431_p6, 1, 0 }
  0x32   : > { %s3625_s18 = scalar_lea.hbm %s5507_s5, 16  ;;  %p4447_p8 = pneg %p4431_p6 }
  0x33   : > { %p3626_p7 = scmp.ne.s32.totalorder %s5507_s5, %s3625_s18  ;;  %p3632_p11 = scmp.lt.u32.totalorder %s3625_s18, %s5507_s5 }
  0x34   : > { %s5508_s2 = scalar_select %p4447_p8, 1, 0 }
  0x35   : > { %p3628_p9 = pnand %p4447_p8, %p3626_p7 }
  0x37   : > { %p3629_p10 = pneg %p3628_p9 }
  0x39   : > { %p3634_p12 = pnand %p3632_p11, %p3629_p10 }
  0x3b   : > { %3637 = shalt.err (!%p3634_p12)
}
  0x3c   : > { %s3638_s17 = scalar_lea.vmem %s521_s22, 16  ;;  %s3645_s30 = scalar_lea.vmem %s521_s22, 32 }
  0x3d   : > { %p3639_p13 = scmp.ne.s32.totalorder %s521_s22, %s3638_s17  ;;  %p3646_p5 = scmp.lt.s32.totalorder %s521_s22, %s521_s22 }
  0x3e   : > { %p3647_p4 = scmp.lt.s32.totalorder %s3645_s30, %s3638_s17 }
  0x3f   : > { %p3641_p0 = pnand %p3639_p13, %p4447_p8 }
  0x40   : > { %p3648_p1 = por %p3647_p4, %p3646_p5 }
  0x41   : > { %p3642_p2 = pneg %p3641_p0 }
  0x43   : > { %p3649_p3 = pnand %p3648_p1, %p3642_p2 }
  0x45   : > { %3652 = shalt.err (!%p3649_p3)
}
  0x46   : > { %3352 = dma.hbm_to_vmem [thread:$0]  (!%p4431_p6), %s5507_s5, 16, %s521_s22, [#allocation14]  }
  0x47   : > { %s5509_s7 = sld [smem:[#allocation58_spill]] }
  0x4d   : > { %s3653_s25 = scalar_lea.hbm %s5509_s7, 16 }
  0x4e   : > { %p3654_p7 = scmp.ne.s32.totalorder %s5509_s7, %s3653_s25  ;;  %p3660_p1 = scmp.lt.u32.totalorder %s3653_s25, %s5509_s7 }
  0x50   : > { %p3656_p9 = pnand %p3654_p7, %p4447_p8 }
  0x52   : > { %p3657_p4 = pneg %p3656_p9 }
  0x54   : > { %p3662_p3 = pnand %p3660_p1, %p3657_p4 }
  0x56   : > { %3665 = shalt.err (!%p3662_p3)
}
  0x57   : > { %s3666_s22 = scalar_lea.vmem %s4435_s23, 16  ;;  %s3673_s12 = scalar_lea.vmem %s4435_s23, 32 }
  0x58   : > { %p3667_p10 = scmp.ne.s32.totalorder %s4435_s23, %s3666_s22  ;;  %p3674_p13 = scmp.lt.s32.totalorder %s4435_s23, %s4435_s23 }
  0x59   : > { %p3675_p0 = scmp.lt.s32.totalorder %s3673_s12, %s3666_s22 }
  0x5a   : > { %p3669_p11 = pnand %p3667_p10, %p4447_p8 }
  0x5b   : > { %p3676_p2 = por %p3675_p0, %p3674_p13 }
  0x5c   : > { %p3670_p12 = pneg %p3669_p11 }
  0x5e   : > { %p3677_p5 = pnand %p3676_p2, %p3670_p12 }
  0x60   : > { %3680 = shalt.err (!%p3677_p5)
}
  0x61   : > { %3358 = dma.hbm_to_vmem [thread:$0]  (!%p4431_p6), %s5509_s7, 16, %s4435_s23, [#allocation17]  }
  0x62   : > { %s5510_s9 = sld [smem:[#allocation60_spill]] }
  0x68   : > { %s3681_s18 = scalar_lea.hbm %s5510_s9, 256 }
  0x69   : > { %p3682_p7 = scmp.ne.s32.totalorder %s5510_s9, %s3681_s18  ;;  %p3688_p1 = scmp.lt.u32.totalorder %s3681_s18, %s5510_s9 }
  0x6b   : > { %p3684_p9 = pnand %p3682_p7, %p4447_p8 }
  0x6d   : > { %p3685_p4 = pneg %p3684_p9 }
  0x6f   : > { %p3690_p3 = pnand %p3688_p1, %p3685_p4 }
  0x71   : > { %3693 = shalt.err (!%p3690_p3)
}
  0x72   : > { %s3694_s23 = scalar_lea.vmem %s4437_s26, 256  ;;  %p3702_p13 = scmp.lt.s32.totalorder %s4437_s26, %s4437_s26 }
  0x73   : > { %p3695_p10 = scmp.ne.s32.totalorder %s4437_s26, %s3694_s23  ;;  %p3703_p0 = scmp.lt.s32.totalorder %s3694_s23, %s3694_s23 }
  0x75   : > { %p3697_p11 = pnand %p3695_p10, %p4447_p8  ;;  %p3704_p2 = por %p3703_p0, %p3702_p13 }
  0x77   : > { %p3698_p12 = pneg %p3697_p11 }
  0x79   : > { %p3705_p5 = pnand %p3704_p2, %p3698_p12 }
  0x7b   : > { %3708 = shalt.err (!%p3705_p5)
}
  0x7c   : > { %s5459_s12 = smov 64   ;;  %s5461_s14 = smov 4  }
  0x7d   : > { %3364 = dma.hbm_to_vmem [thread:$0]  (!%p4431_p6), %s5510_s9, 256, %s4437_s26, [#allocation20], %s5459_s12, %s5459_s12, %s5461_s14  }
  0x7e   : > { %s4264_s16 = smov [#allocation22]   ;;  %s4265_s25 = smov [#allocation25]  }
  0x7f   : > { %s587_s18 = sshll.u32 %s4264_s16, 4  ;;  %s611_s17 = sshll.u32 %s4265_s25, 4  ;;  %s588_s18 = int_to_ptr.vmem [resolvable:$true] %s587_s18  ;;  %s612_s17 = int_to_ptr.vmem [resolvable:$true] %s611_s17 }
  0x80   : > { %s5511_s11 = sld [smem:[#allocation62_spill]] }
  0x86   : > { %s3709_s23 = scalar_lea.hbm %s5511_s11, 256 }
  0x87   : > { %p3710_p7 = scmp.ne.s32.totalorder %s5511_s11, %s3709_s23  ;;  %p3716_p1 = scmp.lt.u32.totalorder %s3709_s23, %s5511_s11 }
  0x89   : > { %p3712_p9 = pnand %p3710_p7, %p4447_p8 }
  0x8b   : > { %p3713_p4 = pneg %p3712_p9 }
  0x8d   : > { %p3718_p3 = pnand %p3716_p1, %p3713_p4 }
  0x8f   : > { %3721 = shalt.err (!%p3718_p3)
}
  0x90   : > { %s3722_s26 = scalar_lea.vmem %s588_s18, 256  ;;  %p3730_p13 = scmp.lt.s32.totalorder %s588_s18, %s588_s18 }
  0x91   : > { %p3723_p10 = scmp.ne.s32.totalorder %s588_s18, %s3722_s26  ;;  %p3731_p0 = scmp.lt.s32.totalorder %s3722_s26, %s3722_s26 }
  0x93   : > { %p3725_p11 = pnand %p3723_p10, %p4447_p8  ;;  %p3732_p2 = por %p3731_p0, %p3730_p13 }
  0x95   : > { %p3726_p12 = pneg %p3725_p11 }
  0x97   : > { %p3733_p5 = pnand %p3732_p2, %p3726_p12 }
  0x99   : > { %3736 = shalt.err (!%p3733_p5)
}
  0x9a   : > { %3370 = dma.hbm_to_vmem [thread:$0]  (!%p4431_p6), %s5511_s11, 256, %s588_s18, [#allocation23], %s5459_s12, %s5459_s12, %s5461_s14  }
  0x9b   : > { %s5512_s13 = sld [smem:[#allocation64_spill]] }
  0xa1   : > { %s3737_s20 = scalar_lea.hbm %s5512_s13, 256 }
  0xa2   : > { %p3738_p7 = scmp.ne.s32.totalorder %s5512_s13, %s3737_s20  ;;  %p3744_p1 = scmp.lt.u32.totalorder %s3737_s20, %s5512_s13 }
  0xa4   : > { %p3740_p9 = pnand %p3738_p7, %p4447_p8 }
  0xa6   : > { %p3741_p4 = pneg %p3740_p9 }
  0xa8   : > { %p3746_p3 = pnand %p3744_p1, %p3741_p4 }
  0xaa   : > { %3749 = shalt.err (!%p3746_p3)
}
  0xab   : > { %s3750_s22 = scalar_lea.vmem %s612_s17, 256  ;;  %p3758_p13 = scmp.lt.s32.totalorder %s612_s17, %s612_s17 }
  0xac   : > { %p3751_p10 = scmp.ne.s32.totalorder %s612_s17, %s3750_s22  ;;  %p3759_p0 = scmp.lt.s32.totalorder %s3750_s22, %s3750_s22 }
  0xae   : > { %p3753_p11 = pnand %p3751_p10, %p4447_p8  ;;  %p3760_p2 = por %p3759_p0, %p3758_p13 }
  0xb0   : > { %p3754_p12 = pneg %p3753_p11 }
  0xb2   : > { %p3761_p5 = pnand %p3760_p2, %p3754_p12 }
  0xb4   : > { %3764 = shalt.err (!%p3761_p5)
}
  0xb5   : > { %3376 = dma.hbm_to_vmem [thread:$0]  (!%p4431_p6), %s5512_s13, 256, %s612_s17, [#allocation26], %s5459_s12, %s5459_s12, %s5461_s14  }
  0xb6   : > { %s4266_s26 = smov [#allocation28]   ;;  %s5513_s15 = sld [smem:[#allocation66_spill]] }
  0xb7   : > { %s635_s5 = sshll.u32 %s4266_s26, 4  ;;  %s636_s5 = int_to_ptr.vmem [resolvable:$true] %s635_s5 }
  0xbc   : > { %s3765_s10 = scalar_lea.hbm %s5513_s15, 1024 }
  0xbd   : > { %p3766_p7 = scmp.ne.s32.totalorder %s5513_s15, %s3765_s10  ;;  %p3772_p1 = scmp.lt.u32.totalorder %s3765_s10, %s5513_s15 }
  0xbf   : > { %p3768_p9 = pnand %p3766_p7, %p4447_p8 }
  0xc1   : > { %p3769_p4 = pneg %p3768_p9 }
  0xc3   : > { %p3774_p3 = pnand %p3772_p1, %p3769_p4 }
  0xc5   : > { %3777 = shalt.err (!%p3774_p3)
}
  0xc6   : > { %s3778_s17 = scalar_lea.vmem %s636_s5, 1024  ;;  %p3786_p13 = scmp.lt.s32.totalorder %s636_s5, %s636_s5 }
  0xc7   : > { %p3779_p10 = scmp.ne.s32.totalorder %s636_s5, %s3778_s17  ;;  %p3787_p0 = scmp.lt.s32.totalorder %s3778_s17, %s3778_s17 }
  0xc9   : > { %p3781_p11 = pnand %p3779_p10, %p4447_p8  ;;  %p3788_p2 = por %p3787_p0, %p3786_p13 }
  0xcb   : > { %p3782_p12 = pneg %p3781_p11 }
  0xcd   : > { %p3789_p5 = pnand %p3788_p2, %p3782_p12 }
  0xcf   : > { %3792 = shalt.err (!%p3789_p5)
}
  0xd0   : > { %3382 = dma.hbm_to_vmem [thread:$0]  (!%p4431_p6), %s5513_s15, 1024, %s636_s5, [#allocation29], %s5459_s12, %s5459_s12, %s5461_s14  }
  0xd1   : > { %s3068_s18 = sadd.s32 4294967294, %s4257_s19   ;;  %s62_s23 = sadd.s32 1, %s4253_s0 }
  0xd2   : > { %p64_p7 = scmp.ge.s32.totalorder %s62_s23, 2  ;;  %s71_s26 = sadd.s32 1, %s4245_s29 }
  0xd3   : > { %p78_p9 = scmp.ne.s32.totalorder %s4245_s29, %s4241_s28  ;;  %p79_p4 = scmp.eq.s32.totalorder %s4257_s19, 0 }
  0xd4   : > { %s5579_s23 = smov (%p64_p7, %s62_s23), 0  ;;  %p84_p3 = scmp.ne.s32.totalorder %s4241_s28, %s4237_s27 }
  0xd5   : > { %5514 = sst [smem:[#allocation49_spill]] %s5579_s23  ;;  %p4584_p1 = por %p79_p4, %p78_p9 }
  0xd6   : > { %s66_s5 = ssub.s32 %s4253_s0, %s5579_s23  ;;  %p466_p10 = scmp.eq.s32.totalorder %s4417_s1, 1 }
  0xd7   : > { %p69_p11 = scmp.eq.s32.totalorder %s66_s5, 0  ;;  %p5516_p12 = scmp.eq.s32.totalorder %s4417_s1, 0 }
  0xd8   : > { %p4599_p0 = por %p466_p10, %p78_p9  ;;  %p472_p2 = scmp.eq.s32.totalorder %s3068_s18, 1 }
  0xd9   : > { %p4595_p13 = por %p5516_p12, %p84_p3  ;;  %p3421_p7 = scmp.lt.s32.totalorder %s4257_s19, 2 }
  0xda   : > { %s5518_s10 = scalar_select %p4599_p0, 1, 0 }
  0xdb   : > { %s5517_s8 = scalar_select %p4595_p13, 1, 0 }
  0xdc   : > { %s4604_s20 = scalar_select %p69_p11, %s4245_s29, %s71_s26  }
  0xdd   : > { %p4606_p5 = por %p472_p2, %p84_p3  ;;  %s4612_s16 = sand.u32 1, %s4245_s29  }
  0xde   : > { %5519 = sst [smem:[#allocation50_spill]] %s4604_s20  ;;  %p4617_p4 = pnand %p3421_p7, %p4584_p1 }
  0xdf   : > { %s5520_s21 = scalar_select %p4606_p5, 1, 0 }
  0xe0   : > { %s5522_s17 = scalar_select %p4617_p4, 1, 0 }
  0xe1   : > { %5521 = sst [smem:[#allocation51_spill]] %s5520_s21  ;;  %s5463_s30 = smul.u32 272, %s4612_s16 }
  0xe2   : > { %s5464_s22 = smul.u32 4352, %s4253_s0  ;;  %s5523_s5 = sld [smem:[#allocation53_spill]] }
  0xe3   : > { %s683_s14 = scalar_lea.vmem [#allocation7], %s5463_s30  ;;  %s5524_s9 = sand.u32 1, %s4257_s19  }
  0xe4   : > { %s690_s7 = sshll.u32 %s683_s14, 4  ;;  %s4637_s11 = scalar_lea.sflag [#allocation8], %s5524_s9  ;;  %s4632_s7 = int_to_ptr.vmem [resolvable:$true] %s690_s7 }
  0xe5   : > { %p4643_p1 = pneg %p4617_p4 }
  0xe7   : > { %s5525_s18 = scalar_select %p4643_p1, 1, 0 }
  0xe8   : > { %s4628_s12 = scalar_lea.hbm %s5523_s5, %s5464_s22  ;;  %s3798_s14 = scalar_lea.hbm %s5523_s5, 8704 }
  0xe9   : > { %s3793_s13 = scalar_lea.hbm %s4628_s12, 4352  ;;  %p3799_p11 = scmp.lt.u32.totalorder %s4628_s12, %s5523_s5 }
  0xea   : > { %p3794_p9 = scmp.ne.s32.totalorder %s4628_s12, %s3793_s13  ;;  %p3800_p12 = scmp.lt.u32.totalorder %s3798_s14, %s3793_s13 }
  0xeb   : > { %p3802_p7 = scmp.lt.u32.totalorder %s3793_s13, %s4628_s12 }
  0xec   : > { %p3796_p3 = pnand %p4643_p1, %p3794_p9  ;;  %p3801_p2 = por %p3800_p12, %p3799_p11 }
  0xee   : > { %p3797_p10 = pneg %p3796_p3  ;;  %p3803_p5 = por %p3802_p7, %p3801_p2 }
  0xf0   : > { %p3804_p0 = pnand %p3803_p5, %p3797_p10 }
  0xf2   : > { %3807 = shalt.err (!%p3804_p0)
}
  0xf3   : > { %s3808_s9 = scalar_lea.vmem %s4632_s7, 4352  ;;  %s4267_s30 = smov [#allocation7]  }
  0xf4   : > { %p3809_p9 = scmp.ne.s32.totalorder %s4632_s7, %s3808_s9  ;;  %s3813_s26 = sshll.u32 %s4267_s30, 4  ;;  %s3814_s26 = int_to_ptr.vmem [resolvable:$false] %s3813_s26 }
  0xf5   : > { %s3815_s25 = scalar_lea.vmem %s3814_s26, 8704  ;;  %p3816_p6 = scmp.lt.s32.totalorder %s4632_s7, %s3814_s26 }
  0xf6   : > { %p3811_p3 = pnand %p3809_p9, %p4643_p1  ;;  %p3817_p8 = scmp.lt.s32.totalorder %s3815_s25, %s3808_s9 }
  0xf8   : > { %p3812_p13 = pneg %p3811_p3  ;;  %p3818_p11 = por %p3817_p8, %p3816_p6 }
  0xfa   : > { %p3819_p12 = pnand %p3818_p11, %p3812_p13 }
  0xfc   : > { %3822 = shalt.err (!%p3819_p12)
}
  0xfd   : > { %s5526_s13 = smov 4   ;;  %s5527_s22 = smov 64  }
  0xfe   : > { %3392 = dma.hbm_to_vmem [thread:$0]  (!%p4617_p4), %s4628_s12, 4352, %s4632_s7, %s4637_s11, %s5527_s22, %s5527_s22, %s5526_s13  }
  0xff   : > { %s5528_s14 = sshll.u32 %s4253_s0, 4  ;;  %s5529_s3 = sld [smem:[#allocation55_spill]] }
 0x100   : > { %s724_s25 = scalar_lea.vmem [#allocation10], %s4612_s16  ;;  %s5530_s15 = smov %s5528_s14 }
 0x101   : > { %s731_s5 = sshll.u32 %s724_s25, 4  ;;  %s4685_s29 = scalar_lea.hbm %s5430_s4, %s5530_s15  ;;  %s4678_s5 = int_to_ptr.vmem [resolvable:$true] %s731_s5 }
 0x102   : > { %s5531_s12 = sand.u32 1, %s4257_s19  }
 0x103   : > { %s4689_s7 = scalar_lea.sflag [#allocation11], %s5531_s12 }
 0x105   : > { %s4675_s26 = scalar_lea.hbm %s5529_s3, %s5528_s14  ;;  %s3828_s25 = scalar_lea.hbm %s5529_s3, 32 }
 0x106   : > { %s3823_s30 = scalar_lea.hbm %s4675_s26, 16  ;;  %p3829_p0 = scmp.lt.u32.totalorder %s4675_s26, %s5529_s3 }
 0x107   : > { %p3824_p6 = scmp.ne.s32.totalorder %s4675_s26, %s3823_s30  ;;  %p3830_p5 = scmp.lt.u32.totalorder %s3828_s25, %s3823_s30 }
 0x108   : > { %p3832_p2 = scmp.lt.u32.totalorder %s3823_s30, %s4675_s26 }
 0x109   : > { %p3826_p8 = pnand %p3824_p6, %p4643_p1  ;;  %p3831_p10 = por %p3830_p5, %p3829_p0 }
 0x10b   : > { %p3827_p13 = pneg %p3826_p8  ;;  %p3833_p7 = por %p3832_p2, %p3831_p10 }
 0x10d   : > { %p3834_p9 = pnand %p3833_p7, %p3827_p13 }
 0x10f   : > { %3837 = shalt.err (!%p3834_p9)
}
 0x110   : > { %s3838_s15 = scalar_lea.vmem %s4678_s5, 16  ;;  %s4268_s23 = smov [#allocation10]  }
 0x111   : > { %p3839_p3 = scmp.ne.s32.totalorder %s4678_s5, %s3838_s15  ;;  %s3843_s20 = sshll.u32 %s4268_s23, 4  ;;  %s3844_s20 = int_to_ptr.vmem [resolvable:$false] %s3843_s20 }
 0x112   : > { %s3845_s27 = scalar_lea.vmem %s3844_s20, 32  ;;  %p3846_p6 = scmp.lt.s32.totalorder %s4678_s5, %s3844_s20 }
 0x113   : > { %p3841_p11 = pnand %p3839_p3, %p4643_p1  ;;  %p3847_p8 = scmp.lt.s32.totalorder %s3845_s27, %s3838_s15 }
 0x115   : > { %p3842_p12 = pneg %p3841_p11  ;;  %p3848_p0 = por %p3847_p8, %p3846_p6 }
 0x117   : > { %p3849_p5 = pnand %p3848_p0, %p3842_p12 }
 0x119   : > { %3852 = shalt.err (!%p3849_p5)
}
 0x11a   : > { %3398 = dma.hbm_to_vmem [thread:$0]  (!%p4617_p4), %s4675_s26, 16, %s4678_s5, %s4689_s7  }
 0x11b   : > { %s4269_s21 = smov [#allocation15]   ;;  %s4270_s30 = smov [#allocation18]  }
 0x11c   : > { %s531_s12 = sshll.u32 %s4269_s21, 4  ;;  %s553_s14 = sshll.u32 %s4270_s30, 4  ;;  %s532_s12 = int_to_ptr.vmem [resolvable:$true] %s531_s12  ;;  %s4713_s14 = int_to_ptr.vmem [resolvable:$true] %s553_s14 }
 0x11d   : > { %s5532_s6 = sld [smem:[#allocation57_spill]]  ;;  %p5533_p10 = scmp.ne.s32.totalorder %s5508_s2, 0 }
 0x123   : > { %s3853_s15 = scalar_lea.hbm %s5532_s6, 16 }
 0x124   : > { %p3854_p13 = scmp.ne.s32.totalorder %s5532_s6, %s3853_s15  ;;  %p3860_p9 = scmp.lt.u32.totalorder %s3853_s15, %s5532_s6 }
 0x126   : > { %p3856_p2 = pnand %p3854_p13, %p5533_p10 }
 0x128   : > { %p3857_p7 = pneg %p3856_p2 }
 0x12a   : > { %p3862_p3 = pnand %p3860_p9, %p3857_p7 }
 0x12c   : > { %3865 = shalt.err (!%p3862_p3)
}
 0x12d   : > { %s3866_s26 = scalar_lea.vmem %s532_s12, 16  ;;  %s3873_s21 = scalar_lea.vmem %s532_s12, 32 }
 0x12e   : > { %p3867_p11 = scmp.ne.s32.totalorder %s532_s12, %s3866_s26  ;;  %p3874_p8 = scmp.lt.s32.totalorder %s532_s12, %s532_s12 }
 0x12f   : > { %p3875_p0 = scmp.lt.s32.totalorder %s3873_s21, %s3866_s26 }
 0x130   : > { %p3869_p12 = pnand %p3867_p11, %p5533_p10 }
 0x131   : > { %p3876_p5 = por %p3875_p0, %p3874_p8 }
 0x132   : > { %p3870_p6 = pneg %p3869_p12 }
 0x134   : > { %p3877_p4 = pnand %p3876_p5, %p3870_p6 }
 0x136   : > { %3880 = shalt.err (!%p3877_p4)
}
 0x137   : > { %p5534_p13 = scmp.ne.s32.totalorder %s5506_s24, 0  ;;  %s5535_s23 = sld [smem:[#allocation59_spill]] }
 0x139   : > { %3355 = dma.hbm_to_vmem [thread:$0]  (!%p5534_p13), %s5532_s6, 16, %s532_s12, [#allocation14]  }
 0x13d   : > { %s3881_s20 = scalar_lea.hbm %s5535_s23, 16 }
 0x13e   : > { %p3882_p2 = scmp.ne.s32.totalorder %s5535_s23, %s3881_s20  ;;  %p3888_p4 = scmp.lt.u32.totalorder %s3881_s20, %s5535_s23 }
 0x140   : > { %p3884_p7 = pnand %p3882_p2, %p5533_p10 }
 0x142   : > { %p3885_p9 = pneg %p3884_p7 }
 0x144   : > { %p3890_p3 = pnand %p3888_p4, %p3885_p9 }
 0x146   : > { %3893 = shalt.err (!%p3890_p3)
}
 0x147   : > { %s3894_s12 = scalar_lea.vmem %s4713_s14, 16  ;;  %s3901_s30 = scalar_lea.vmem %s4713_s14, 32 }
 0x148   : > { %p3895_p11 = scmp.ne.s32.totalorder %s4713_s14, %s3894_s12  ;;  %p3902_p8 = scmp.lt.s32.totalorder %s4713_s14, %s4713_s14 }
 0x149   : > { %p3903_p0 = scmp.lt.s32.totalorder %s3901_s30, %s3894_s12 }
 0x14a   : > { %p3897_p12 = pnand %p3895_p11, %p5533_p10 }
 0x14b   : > { %p3904_p5 = por %p3903_p0, %p3902_p8 }
 0x14c   : > { %p3898_p6 = pneg %p3897_p12 }
 0x14e   : > { %p3905_p2 = pnand %p3904_p5, %p3898_p6 }
 0x150   : > { %3908 = shalt.err (!%p3905_p2)
}
 0x151   : > { %3361 = dma.hbm_to_vmem [thread:$0]  (!%p5534_p13), %s5535_s23, 16, %s4713_s14, [#allocation17]  }
 0x152   : > { %s4271_s15 = smov [#allocation21]   ;;  %s4272_s27 = smov [#allocation24]  }
 0x153   : > { %s577_s20 = sshll.u32 %s4271_s15, 4  ;;  %s601_s5 = sshll.u32 %s4272_s27, 4  ;;  %s578_s20 = int_to_ptr.vmem [resolvable:$true] %s577_s20  ;;  %s4757_s5 = int_to_ptr.vmem [resolvable:$true] %s601_s5 }
 0x154   : > { %s5536_s12 = sld [smem:[#allocation61_spill]] }
 0x15a   : > { %s3909_s30 = scalar_lea.hbm %s5536_s12, 16 }
 0x15b   : > { %p3910_p7 = scmp.ne.s32.totalorder %s5536_s12, %s3909_s30  ;;  %p3916_p3 = scmp.lt.u32.totalorder %s3909_s30, %s5536_s12 }
 0x15d   : > { %p3912_p9 = pnand %p3910_p7, %p5533_p10 }
 0x15f   : > { %p3913_p4 = pneg %p3912_p9 }
 0x161   : > { %p3918_p11 = pnand %p3916_p3, %p3913_p4 }
 0x163   : > { %3921 = shalt.err (!%p3918_p11)
}
 0x164   : > { %s3922_s25 = scalar_lea.vmem %s578_s20, 16  ;;  %s3929_s15 = scalar_lea.vmem %s578_s20, 32 }
 0x165   : > { %p3923_p12 = scmp.ne.s32.totalorder %s578_s20, %s3922_s25  ;;  %p3930_p0 = scmp.lt.s32.totalorder %s578_s20, %s578_s20 }
 0x166   : > { %p3931_p5 = scmp.lt.s32.totalorder %s3929_s15, %s3922_s25 }
 0x167   : > { %p3925_p6 = pnand %p3923_p12, %p5533_p10 }
 0x168   : > { %p3932_p2 = por %p3931_p5, %p3930_p0 }
 0x169   : > { %p3926_p8 = pneg %p3925_p6 }
 0x16b   : > { %p3933_p1 = pnand %p3932_p2, %p3926_p8 }
 0x16d   : > { %3936 = shalt.err (!%p3933_p1)
}
 0x16e   : > { %3367 = dma.hbm_to_vmem [thread:$0]  (!%p5534_p13), %s5536_s12, 16, %s578_s20, [#allocation20]  }
 0x16f   : > { %s5537_s21 = sld [smem:[#allocation63_spill]] }
 0x175   : > { %s3937_s30 = scalar_lea.hbm %s5537_s21, 16 }
 0x176   : > { %p3938_p7 = scmp.ne.s32.totalorder %s5537_s21, %s3937_s30  ;;  %p3944_p1 = scmp.lt.u32.totalorder %s3937_s30, %s5537_s21 }
 0x178   : > { %p3940_p9 = pnand %p3938_p7, %p5533_p10 }
 0x17a   : > { %p3941_p4 = pneg %p3940_p9 }
 0x17c   : > { %p3946_p3 = pnand %p3944_p1, %p3941_p4 }
 0x17e   : > { %3949 = shalt.err (!%p3946_p3)
}
 0x17f   : > { %s3950_s20 = scalar_lea.vmem %s4757_s5, 16  ;;  %s3957_s3 = scalar_lea.vmem %s4757_s5, 32 }
 0x180   : > { %p3951_p11 = scmp.ne.s32.totalorder %s4757_s5, %s3950_s20  ;;  %p3958_p8 = scmp.lt.s32.totalorder %s4757_s5, %s4757_s5 }
 0x181   : > { %p3959_p0 = scmp.lt.s32.totalorder %s3957_s3, %s3950_s20 }
 0x182   : > { %p3953_p12 = pnand %p3951_p11, %p5533_p10 }
 0x183   : > { %p3960_p5 = por %p3959_p0, %p3958_p8 }
 0x184   : > { %p3954_p6 = pneg %p3953_p12 }
 0x186   : > { %p3961_p2 = pnand %p3960_p5, %p3954_p6 }
 0x188   : > { %3964 = shalt.err (!%p3961_p2)
}
 0x189   : > { %3373 = dma.hbm_to_vmem [thread:$0]  (!%p5534_p13), %s5537_s21, 16, %s4757_s5, [#allocation23]  }
 0x18a   : > { %s4273_s26 = smov [#allocation27]   ;;  %s4274_s9 = smov [#allocation30]  }
 0x18b   : > { %s625_s30 = sshll.u32 %s4273_s26, 4  ;;  %s649_s14 = sshll.u32 %s4274_s9, 4  ;;  %s626_s30 = int_to_ptr.vmem [resolvable:$true] %s625_s30  ;;  %s4801_s14 = int_to_ptr.vmem [resolvable:$true] %s649_s14 }
 0x18c   : > { %s5538_s20 = sld [smem:[#allocation65_spill]] }
 0x192   : > { %s3965_s3 = scalar_lea.hbm %s5538_s20, 16 }
 0x193   : > { %p3966_p7 = scmp.ne.s32.totalorder %s5538_s20, %s3965_s3  ;;  %p3972_p1 = scmp.lt.u32.totalorder %s3965_s3, %s5538_s20 }
 0x195   : > { %p3968_p9 = pnand %p3966_p7, %p5533_p10 }
 0x197   : > { %p3969_p4 = pneg %p3968_p9 }
 0x199   : > { %p3974_p3 = pnand %p3972_p1, %p3969_p4 }
 0x19b   : > { %3977 = shalt.err (!%p3974_p3)
}
 0x19c   : > { %s3978_s27 = scalar_lea.vmem %s626_s30, 16  ;;  %s3985_s26 = scalar_lea.vmem %s626_s30, 32 }
 0x19d   : > { %p3979_p11 = scmp.ne.s32.totalorder %s626_s30, %s3978_s27  ;;  %p3986_p8 = scmp.lt.s32.totalorder %s626_s30, %s626_s30 }
 0x19e   : > { %p3987_p0 = scmp.lt.s32.totalorder %s3985_s26, %s3978_s27 }
 0x19f   : > { %p3981_p12 = pnand %p3979_p11, %p5533_p10 }
 0x1a0   : > { %p3988_p5 = por %p3987_p0, %p3986_p8 }
 0x1a1   : > { %p3982_p6 = pneg %p3981_p12 }
 0x1a3   : > { %p3989_p2 = pnand %p3988_p5, %p3982_p6 }
 0x1a5   : > { %3992 = shalt.err (!%p3989_p2)
}
 0x1a6   : > { %3379 = dma.hbm_to_vmem [thread:$0]  (!%p5534_p13), %s5538_s20, 16, %s626_s30, [#allocation26]  }
 0x1a7   : > { %s5539_s15 = sld [smem:[#allocation67_spill]] }
 0x1ad   : > { %s3993_s3 = scalar_lea.hbm %s5539_s15, 16 }
 0x1ae   : > { %p3994_p7 = scmp.ne.s32.totalorder %s5539_s15, %s3993_s3  ;;  %p4000_p1 = scmp.lt.u32.totalorder %s3993_s3, %s5539_s15 }
 0x1b0   : > { %p3996_p9 = pnand %p3994_p7, %p5533_p10 }
 0x1b2   : > { %p3997_p4 = pneg %p3996_p9 }
 0x1b4   : > { %p4002_p3 = pnand %p4000_p1, %p3997_p4 }
 0x1b6   : > { %4005 = shalt.err (!%p4002_p3)
}
 0x1b7   : > { %s4006_s30 = scalar_lea.vmem %s4801_s14, 16  ;;  %s4013_s23 = scalar_lea.vmem %s4801_s14, 32 }
 0x1b8   : > { %p4007_p11 = scmp.ne.s32.totalorder %s4801_s14, %s4006_s30  ;;  %p4014_p8 = scmp.lt.s32.totalorder %s4801_s14, %s4801_s14 }
 0x1b9   : > { %p4015_p0 = scmp.lt.s32.totalorder %s4013_s23, %s4006_s30 }
 0x1ba   : > { %p4009_p12 = pnand %p4007_p11, %p5533_p10 }
 0x1bb   : > { %p4016_p5 = por %p4015_p0, %p4014_p8 }
 0x1bc   : > { %p4010_p6 = pneg %p4009_p12 }
 0x1be   : > { %p4017_p2 = pnand %p4016_p5, %p4010_p6 }
 0x1c0   : > { %4020 = shalt.err (!%p4017_p2)
}
 0x1c1   : > { %3385 = dma.hbm_to_vmem [thread:$0]  (!%p5534_p13), %s5539_s15, 16, %s4801_s14, [#allocation29]  }
 0x1c2   : > { %s3083_s2 = sshll.u32 %s4612_s16, 3  ;;  %s3084_s25 = sshll.u32 %s4253_s0, 7 }
 0x1c3   : > { %s5540_s5 = sld [smem:[#allocation52_spill]]  ;;  %s664_s24 = scalar_lea.vmem [#allocation4], %s3083_s2 }
 0x1c4   : > { %s672_s26 = sshll.u32 %s664_s24, 4  ;;  %s661_s30 = scalar_lea.sflag [#allocation5], %s4612_s16  ;;  %s673_s26 = int_to_ptr.vmem [resolvable:$true] %s672_s26 }
 0x1c5   : > { %p5541_p7 = scmp.ne.s32.totalorder %s5525_s18, 0 }
 0x1c9   : > { %s4850_s27 = scalar_lea.hbm %s5540_s5, %s3084_s25  ;;  %s4026_s9 = scalar_lea.hbm %s5540_s5, 256 }
 0x1ca   : > { %s4021_s23 = scalar_lea.hbm %s4850_s27, 128  ;;  %p4027_p4 = scmp.lt.u32.totalorder %s4850_s27, %s5540_s5 }
 0x1cb   : > { %p4022_p10 = scmp.ne.s32.totalorder %s4850_s27, %s4021_s23  ;;  %p4028_p1 = scmp.lt.u32.totalorder %s4026_s9, %s4021_s23 }
 0x1cc   : > { %p4030_p11 = scmp.lt.u32.totalorder %s4021_s23, %s4850_s27 }
 0x1cd   : > { %p4024_p9 = pnand %p4022_p10, %p5541_p7  ;;  %p4029_p3 = por %p4028_p1, %p4027_p4 }
 0x1cf   : > { %p4025_p13 = pneg %p4024_p9  ;;  %p4031_p12 = por %p4030_p11, %p4029_p3 }
 0x1d1   : > { %p4032_p6 = pnand %p4031_p12, %p4025_p13 }
 0x1d3   : > { %4035 = shalt.err (!%p4032_p6)
}
 0x1d4   : > { %s4036_s2 = scalar_lea.vmem %s673_s26, 128  ;;  %s4275_s6 = smov [#allocation4]  }
 0x1d5   : > { %p4037_p8 = scmp.ne.s32.totalorder %s673_s26, %s4036_s2  ;;  %s4041_s24 = sshll.u32 %s4275_s6, 4  ;;  %s4042_s24 = int_to_ptr.vmem [resolvable:$false] %s4041_s24 }
 0x1d6   : > { %s4043_s14 = scalar_lea.vmem %s4042_s24, 256  ;;  %p4044_p2 = scmp.lt.s32.totalorder %s673_s26, %s4042_s24 }
 0x1d7   : > { %p4039_p0 = pnand %p4037_p8, %p5541_p7  ;;  %p4045_p10 = scmp.lt.s32.totalorder %s4043_s14, %s4036_s2 }
 0x1d9   : > { %p4040_p5 = pneg %p4039_p0  ;;  %p4046_p9 = por %p4045_p10, %p4044_p2 }
 0x1db   : > { %p4047_p1 = pnand %p4046_p9, %p4040_p5 }
 0x1dd   : > { %4050 = shalt.err (!%p4047_p1)
}
 0x1de   : > { %p5542_p4 = scmp.ne.s32.totalorder %s5522_s17, 0  ;;  %s5543_s23 = smul.u32 4352, %s4253_s0 }
 0x1df   : > { %s5544_s3 = sld [smem:[#allocation54_spill]]  ;;  %s5545_s6 = smul.u32 272, %s4612_s16 }
 0x1e0   : > { %3389 = dma.hbm_to_vmem [thread:$0]  (!%p5542_p4), %s4850_s27, 128, %s673_s26, %s661_s30  }
 0x1e1   : > { %s704_s2 = scalar_lea.vmem [#allocation9], %s5545_s6 }
 0x1e2   : > { %s711_s24 = sshll.u32 %s704_s2, 4  ;;  %s4879_s24 = int_to_ptr.vmem [resolvable:$true] %s711_s24 }
 0x1e5   : > { %s4875_s25 = scalar_lea.hbm %s5544_s3, %s5543_s23  ;;  %s4056_s30 = scalar_lea.hbm %s5544_s3, 8704 }
 0x1e6   : > { %s4051_s14 = scalar_lea.hbm %s4875_s25, 4352  ;;  %p4057_p12 = scmp.lt.u32.totalorder %s4875_s25, %s5544_s3 }
 0x1e7   : > { %p4052_p13 = scmp.ne.s32.totalorder %s4875_s25, %s4051_s14  ;;  %p4058_p6 = scmp.lt.u32.totalorder %s4056_s30, %s4051_s14 }
 0x1e8   : > { %p4060_p0 = scmp.lt.u32.totalorder %s4051_s14, %s4875_s25 }
 0x1e9   : > { %p4054_p3 = pnand %p4052_p13, %p5541_p7  ;;  %p4059_p8 = por %p4058_p6, %p4057_p12 }
 0x1eb   : > { %p4055_p11 = pneg %p4054_p3  ;;  %p4061_p5 = por %p4060_p0, %p4059_p8 }
 0x1ed   : > { %p4062_p2 = pnand %p4061_p5, %p4055_p11 }
 0x1ef   : > { %4065 = shalt.err (!%p4062_p2)
}
 0x1f0   : > { %s4066_s9 = scalar_lea.vmem %s4879_s24, 4352  ;;  %s4276_s6 = smov [#allocation9]  }
 0x1f1   : > { %p4067_p10 = scmp.ne.s32.totalorder %s4879_s24, %s4066_s9  ;;  %s4071_s2 = sshll.u32 %s4276_s6, 4  ;;  %s4072_s2 = int_to_ptr.vmem [resolvable:$false] %s4071_s2 }
 0x1f2   : > { %s4073_s27 = scalar_lea.vmem %s4072_s2, 8704  ;;  %p4074_p13 = scmp.lt.s32.totalorder %s4879_s24, %s4072_s2 }
 0x1f3   : > { %p4069_p9 = pnand %p4067_p10, %p5541_p7  ;;  %p4075_p3 = scmp.lt.s32.totalorder %s4073_s27, %s4066_s9 }
 0x1f5   : > { %p4070_p1 = pneg %p4069_p9  ;;  %p4076_p12 = por %p4075_p3, %p4074_p13 }
 0x1f7   : > { %p4077_p6 = pnand %p4076_p12, %p4070_p1 }
 0x1f9   : > { %4080 = shalt.err (!%p4077_p6)
}
 0x1fa   : > { %3395 = dma.hbm_to_vmem [thread:$0]  (!%p5542_p4), %s4875_s25, 4352, %s4879_s24, %s4637_s11, %s5527_s22, %s5527_s22, %s5526_s13  }
 0x1fb   : > { %s741_s14 = scalar_lea.vmem [#allocation12], %s4612_s16  ;;  %s4081_s30 = scalar_lea.hbm %s4685_s29, 16 }
 0x1fc   : > { %s748_s26 = sshll.u32 %s741_s14, 4  ;;  %p4082_p11 = scmp.ne.s32.totalorder %s4685_s29, %s4081_s30  ;;  %s749_s26 = int_to_ptr.vmem [resolvable:$true] %s748_s26 }
 0x1fd   : > { %s4086_s9 = scalar_lea.hbm %s5430_s4, 32  ;;  %p4087_p5 = scmp.lt.u32.totalorder %s4685_s29, %s5430_s4 }
 0x1fe   : > { %p4084_p8 = pnand %p4082_p11, %p5541_p7  ;;  %p4088_p2 = scmp.lt.u32.totalorder %s4086_s9, %s4081_s30 }
 0x1ff   : > { %p4090_p9 = scmp.lt.u32.totalorder %s4081_s30, %s4685_s29 }
 0x200   : > { %p4085_p0 = pneg %p4084_p8  ;;  %p4089_p10 = por %p4088_p2, %p4087_p5 }
 0x202   : > { %p4091_p1 = por %p4090_p9, %p4089_p10 }
 0x204   : > { %p4092_p13 = pnand %p4091_p1, %p4085_p0 }
 0x206   : > { %4095 = shalt.err (!%p4092_p13)
}
 0x207   : > { %s4096_s11 = scalar_lea.vmem %s749_s26, 16  ;;  %s4277_s16 = smov [#allocation12]  }
 0x208   : > { %p4097_p3 = scmp.ne.s32.totalorder %s749_s26, %s4096_s11  ;;  %s4101_s13 = sshll.u32 %s4277_s16, 4  ;;  %s4102_s13 = int_to_ptr.vmem [resolvable:$false] %s4101_s13 }
 0x209   : > { %s4103_s22 = scalar_lea.vmem %s4102_s13, 32  ;;  %p4104_p11 = scmp.lt.s32.totalorder %s749_s26, %s4102_s13 }
 0x20a   : > { %p4099_p12 = pnand %p4097_p3, %p5541_p7  ;;  %p4105_p8 = scmp.lt.s32.totalorder %s4103_s22, %s4096_s11 }
 0x20c   : > { %p4100_p6 = pneg %p4099_p12  ;;  %p4106_p4 = por %p4105_p8, %p4104_p11 }
 0x20e   : > { %p4107_p2 = pnand %p4106_p4, %p4100_p6 }
 0x210   : > { %4110 = shalt.err (!%p4107_p2)
}
 0x211   : > { %p5546_p5 = scmp.ne.s32.totalorder %s5522_s17, 0  ;;  %s5547_s25 = sld [smem:[#allocation48_spill]] }
 0x213   : > { %3401 = dma.hbm_to_vmem [thread:$0]  (!%p5546_p5), %s4685_s29, 16, %s749_s26, %s4689_s7  }
 0x217   : > { %p5548_p0 = scmp.ne.s32.totalorder %s5547_s25, 0 }
 0x218   : > { %s4928_s18 = sand.u32 (!%p5548_p0), 1, %s4241_s28   ;;  %p5549_p7 = scmp.ne.s32.totalorder (!%p5548_p0), %s5517_s8, 0 }
 0x219   : > { %757 = sbr.rel (%p5548_p0) target bundleno = 3227 (0xc9b), region = 88  ;;  %s4931_s24 = sshll.u32 (!%p5548_p0), %s4928_s18, 3 }
 0x21a   : > { %s760_s27 = scalar_lea.sflag (!%p5548_p0), [#allocation5], %s4928_s18  ;;  %s763_s14 = scalar_lea.vmem (!%p5548_p0), [#allocation4], %s4931_s24 }
 0x220   : > { %4192 = dma.done.wait (%p5549_p7), %s760_s27, 128  }
 0x221   : > { %4194 = vsyncadd (%p5549_p7), %s760_s27, 4294967168  ;;  %s768_s29 = sand.u32 1, %s4417_s1   ;;  %s3286_s17 = smul.u32 272, %s4928_s18 }
 0x222   : > { %s769_s7 = scalar_lea.sflag [#allocation8], %s768_s29 }
 0x223   : > { %s4941_s26 = scalar_lea.vmem [#allocation7], %s3286_s17 }
 0x224   : > { %4196 = dma.done.wait (%p5549_p7), %s769_s7, 8704  }
 0x225   : > { %4198 = vsyncadd (%p5549_p7), %s769_s7, 4294958592  ;;  %s4947_s30 = scalar_lea.vmem [#allocation9], %s3286_s17  ;;  %s787_s23 = scalar_lea.sflag [#allocation11], %s768_s29 }
 0x226   : > { %s789_s12 = scalar_lea.vmem [#allocation10], %s4928_s18 }
 0x227   : > { %4200 = dma.done.wait (%p5549_p7), %s787_s23, 32  }
 0x228   : > { %4202 = vsyncadd (%p5549_p7), %s787_s23, 4294967264  ;;  %s797_s9 = scalar_lea.vmem [#allocation12], %s4928_s18  ;;  %p5550_p4 = scmp.eq.s32.totalorder %s4417_s1, 0 }
 0x22a   : > { %4204 = dma.done.wait (%p5550_p4), [#allocation14], 32   ;;  %p5551_p10 = pmov %p5550_p4 }
 0x22b   : > { %p5552_p9 = pmov %p5550_p4 }
 0x22c   : > { %4206 = vsyncadd (%p5551_p10), [#allocation14], 4294967264 }
 0x22d   : > { %4208 = dma.done.wait (%p5552_p9), [#allocation17], 32   ;;  %p5553_p1 = pmov %p5550_p4 }
 0x22f   : > { %4210 = vsyncadd (%p5553_p1), [#allocation17], 4294967264  ;;  %p5554_p13 = pmov %p5553_p1 }
 0x230   : > { %p5555_p3 = pmov %p5553_p1 }
 0x231   : > { %4212 = dma.done.wait (%p5554_p13), [#allocation20], 272  }
 0x232   : > { %4214 = vsyncadd (%p5555_p3), [#allocation20], 4294967024  ;;  %p5556_p12 = pmov %p5553_p1 }
 0x233   : > { %p5557_p6 = pmov %p5553_p1 }
 0x234   : > { %4216 = dma.done.wait (%p5556_p12), [#allocation23], 272  }
 0x235   : > { %4218 = vsyncadd (%p5557_p6), [#allocation23], 4294967024  ;;  %p5558_p11 = pmov %p5553_p1 }
 0x236   : > { %p5559_p8 = pmov %p5553_p1 }
 0x237   : > { %4220 = dma.done.wait (%p5558_p11), [#allocation26], 272  }
 0x238   : > { %4222 = vsyncadd (%p5559_p8), [#allocation26], 4294967024  ;;  %p5560_p2 = pmov %p5553_p1 }
 0x239   : > { %p5561_p5 = pmov %p5553_p1 }
 0x23a   : > { %4224 = dma.done.wait (%p5560_p2), [#allocation29], 1040  }
 0x23b   : > { %4226 = vsyncadd (%p5561_p5), [#allocation29], 4294966256  ;;  %vm925_vm0 = vcmask 261120   ;;  %v922_v0 = vld [vmem:[%s763_s14] sm:$0xff]  ;;  %v4278_v8 = vmov 0.0   ;;  %vm4279_vm1 = vmmov 0  }
 0x23c   : > { %v926_v1 = vsel %vm925_vm0, %v922_v0, 0.0  ;;  %v3508_v7 = vld [vmem:[#allocation19] sm:$0xff]   ;;  %3238 = vmatprep.subr.bf16.mxu0 %v4278_v8  ;;  %1203 = vst.msk [vmem:[#allocation3] sm:$0xff] %vm925_vm0, %v4278_v8  ;;  %3242 = vmatprep.mubr.msk.bf16.mxu0 %vm4279_vm1, %v4278_v8  ;;  %v3509_v9 = vld [vmem:[#allocation19 + $0x8] sm:$0xff]   ;;  %v3105_v14 = vld [vmem:[#allocation13] ss:$0 sm:$0xff] }
 0x23d   : > { %927 = vadd.xlane.f32.xlu0 %v926_v1  ;;  %3239 = vmatpush3.bf16.msra.mxu0 %v3508_v7  ;;  %v3106_v16 = vld [vmem:[#allocation15] ss:$0 sm:$0xff]  ;;  %vm1393_vm2 = vcmask 64512   ;;  %v4280_v22 = vmov 0   ;;  %v3512_v25 = vld [vmem:[%s4941_s26 + $0x8] sm:$0xff]   ;;  %v3516_v33 = vld [vmem:[%s4941_s26 + $0x18] sm:$0xff]   ;;  %v1036_v1 = vlaneseq }
 0x23e   : > { %3240 = vmatprep.subr.bf16.mxu0 %v4278_v8  ;;  %v3510_v20 = vld [vmem:[%s4941_s26] sm:$0xff]   ;;  %1424 = vmatprep.subr.bf16.mxu1 %v4280_v22  ;;  %v3513_v26 = vld [vmem:[%s4941_s26 + $0x4c] sm:$0xff]   ;;  %v1401_v27 = vsel %vm1393_vm2, %v3512_v25, 0  ;;  %v3515_v30 = vld [vmem:[%s4941_s26 + $0x54] sm:$0xff]   ;;  %v1407_v35 = vsel %vm1393_vm2, %v3516_v33, 0  ;;  %s4281_s1 = smov 104  }
 0x23f   : > { %v3511_v21 = vld [vmem:[%s4941_s26 + $0x44] sm:$0xff]   ;;  %v1398_v23 = vsel %vm1393_vm2, %v3510_v20, 0  ;;  %1456 = vmatprep.mubr.bf16.mxu1 %v4280_v22  ;;  %v1515_v28 = vsel %vm1393_vm2, %v3513_v26, 0  ;;  %v3514_v29 = vld [vmem:[%s4941_s26 + $0x10] sm:$0xff]   ;;  %v1518_v32 = vsel %vm1393_vm2, %v3515_v30, 0  ;;  %v3517_v34 = vld [vmem:[%s4941_s26 + $0x5c] sm:$0xff]  }
 0x240   : > { %v1512_v24 = vsel %vm1393_vm2, %v3511_v21, 0  ;;  %1425 = vmatpush1.bf16.xpose.msra.mxu1 %v1398_v23  ;;  %v1404_v31 = vsel %vm1393_vm2, %v3514_v29, 0  ;;  %v1521_v36 = vsel %vm1393_vm2, %v3517_v34, 0  ;;  %v3518_v37 = vld [vmem:[%s4941_s26 + $0x20] sm:$0xff]   ;;  %v3520_v41 = vld [vmem:[%s4941_s26 + $0x28] sm:$0xff]   ;;  %v3522_v45 = vld [vmem:[%s4941_s26 + $0x30] sm:$0xff]  }
 0x241   : > { %3241 = vmatpush3.bf16.msra.mxu0 %v3509_v9  ;;  %1426 = vmatprep.subr.bf16.mxu1 %v4280_v22  ;;  %v3519_v38 = vld [vmem:[%s4941_s26 + $0x64] sm:$0xff]   ;;  %v1410_v39 = vsel %vm1393_vm2, %v3518_v37, 0  ;;  %v3521_v42 = vld [vmem:[%s4941_s26 + $0x6c] sm:$0xff]   ;;  %v1413_v43 = vsel %vm1393_vm2, %v3520_v41, 0  ;;  %v3523_v46 = vld [vmem:[%s4941_s26 + $0x74] sm:$0xff]   ;;  %v1416_v47 = vsel %vm1393_vm2, %v3522_v45, 0 }
 0x242   : > { %1538 = vmatprep.subr.bf16.mxu0 %v4280_v22  ;;  %v1524_v40 = vsel %vm1393_vm2, %v3519_v38, 0  ;;  %v1527_v44 = vsel %vm1393_vm2, %v3521_v42, 0  ;;  %v1530_v48 = vsel %vm1393_vm2, %v3523_v46, 0  ;;  %v3107_v49 = vld [vmem:[#allocation21] ss:$0 sm:$0xff]  ;;  %s4282_s8 = smov 120  }
 0x243   : > { %v3524_v55 = vld [vmem:[%s4941_s26 + $0x38] sm:$0xff]   ;;  %s4283_s6 = smov 112   ;;  %v3526_v59 = vld [vmem:[%s4941_s26 + $0x40] ss:$0 sps:$4 sm:$0xff]   ;;  %v3527_v60 = vld [vmem:[%s4941_s26 + $0x84] ss:$0 sps:$4 sm:$0xff]  }
 0x244   : > { %v3525_v56 = vld [vmem:[%s4941_s26 + $0x7c] sm:$0xff]   ;;  %v1419_v57 = vsel %vm1393_vm2, %v3524_v55, 0  ;;  %v1422_v61 = vsel %vm1393_vm2, %v3526_v59, 0  ;;  %v1536_v62 = vsel %vm1393_vm2, %v3527_v60, 0  ;;  %v4284_v63 = vmov 1983009808  }
 0x245   : > { %v1533_v58 = vsel %vm1393_vm2, %v3525_v56, 0  ;;  %vm1171_vm3 = vcmask 60416   ;;  %v3529_v55 = vld [vmem:[%s4941_s26 + $0xcc] sm:$0xff]   ;;  %vm1937_vm9 = vcmask 1043456   ;;  %s920_s2 = scalar_lea.vmem [#allocation32], %s4931_s24  ;;  %s4286_s11 = smov 16  }
 0x246   : > { %v3530_v60 = vld [vmem:[%s4941_s26 + $0x90] sm:$0xff]   ;;  %s4287_s16 = smov 8   ;;  %s4288_s13 = smov 24   ;;  %vm2421_vm10 = vcmask 130048   ;;  %vm2423_vm11 = vcmask 195584  }
 0x247   : > { %s5562_s22 = sld [smem:[#allocation47_spill]]  ;;  %s5563_s29 = sld [smem:[#allocation69_spill]] }
 0x248   : > { %1427 = vmatpush1.bf16.xpose.msra.mxu1 %v1401_v27  ;;  %p5565_p7 = scmp.ne.s32.totalorder %s5518_s10, 0 }
 0x249   : > { %1428 = vmatprep.subr.bf16.mxu1 %v4280_v22 }
 0x24d   : > { %s3216_s25 = sshll.u32 %s5562_s22, 7  ;;  %s5564_s17 = smov %s5563_s29 }
 0x24e   : > { %s5347_s7 = scalar_lea.hbm %s5563_s29, %s3216_s25 }
 0x250   : > { %1429 = vmatpush1.bf16.xpose.msra.mxu1 %v1404_v31 }
 0x251   : > { %1430 = vmatprep.subr.bf16.mxu1 %v4280_v22 }
 0x258   : > { %1431 = vmatpush1.bf16.xpose.msra.mxu1 %v1407_v35 }
 0x259   : > { %1432 = vmatprep.subr.bf16.mxu1 %v4280_v22 }
 0x260   : > { %1433 = vmatpush1.bf16.xpose.msra.mxu1 %v1410_v39 }
 0x261   : > { %1434 = vmatprep.subr.bf16.mxu1 %v4280_v22 }
 0x268   : > { %1435 = vmatpush1.bf16.xpose.msra.mxu1 %v1413_v43 }
 0x269   : > { %1436 = vmatprep.subr.bf16.mxu1 %v4280_v22 }
 0x270   : > { %1437 = vmatpush1.bf16.xpose.msra.mxu1 %v1416_v47 }
 0x271   : > { %1438 = vmatprep.subr.bf16.mxu1 %v4280_v22 }
 0x278   : > { %1439 = vmatpush1.bf16.xpose.msra.mxu1 %v1419_v57  ;;  %v1740_v57 = vsel %vm1393_vm2, %v3529_v55, 0 }
 0x279   : > { %1440 = vmatprep.subr.bf16.mxu1 %v4280_v22 }
 0x280   : > { %1441 = vmatpush1.bf16.xpose.msra.mxu1 %v1422_v61  ;;  %v3531_v61 = vld [vmem:[%s4941_s26 + $0xd4] sm:$0xff]  }
 0x281   : > { %1652 = vmatprep.subr.bf16.mxu1 %v4280_v22 }
 0x2ca   : > { %v928_v2 = vpop.xlane.xlu0 %927 }
 0x2cb   : > { %v930_v3 = vmul.f32 0.03125, %v928_v2  ;;  %v4285_v2 = vmov 1934713408  }
 0x2cd   : > { %v931_v4 = vsub.f32 %v922_v0, %v930_v3  ;;  %v1034_v0 = vunpack.c.l.s4 %v4284_v63  ;;  %v1066_v3 = vunpack.c.l.s4 %v4285_v2  ;;  %v1743_v63 = vsel %vm1393_vm2, %v3531_v61, 0  ;;  %v3533_v2 = vld [vmem:[%s4941_s26 + $0xdc] sm:$0xff]  }
 0x2cf   : > { %v932_v5 = vmul.f32 %v931_v4, %v931_v4  ;;  %v1067_v9 = vunpack.c.0.s8 %v1066_v3 }
 0x2d1   : > { %v933_v6 = vsel %vm925_vm0, %v932_v5, 0.0  ;;  %v5049_v5 = vshrl.u32 %v1036_v1, 7 }
 0x2d2   : > { %934 = vadd.xlane.f32.xlu0 %v933_v6 }
 0x35f   : > { %v935_v10 = vpop.xlane.xlu0 %934 }
 0x360   : > { %v936_v11 = vmul.f32 0.03125, %v935_v10 }
 0x362   : > { %v937_v12 = vadd.f32 1e-05, %v936_v11 }
 0x364   : > { %3594 = vrsqrt.f32 %v937_v12 }
 0x36e   : > { %v3595_v13 = vpop.eup %3594 }
 0x36f   : > { %v939_v15 = vmul.f32 %v3595_v13, %v931_v4  ;;  %v1035_v4 = vunpack.c.0.s8 %v1034_v0  ;;  %v3532_v0 = vld [vmem:[%s4941_s26 + $0x98] sm:$0xff]  }
 0x370   : > { %v1632_v3 = vsel %vm1393_vm2, %v3532_v0, 0 }
 0x371   : > { %v946_v17 = vmul.f32 %v3105_v14, %v939_v15  ;;  %v5052_v10 = vsub.s32 %v1035_v4, %v5049_v5  ;;  %v1746_v4 = vsel %vm1393_vm2, %v3533_v2, 0 }
 0x373   : > { %v953_v18 = vadd.f32 %v3106_v16, %v946_v17  ;;  %v5055_v16 = vsub.s32 %v1067_v9, %v5049_v5 }
 0x375   : > { %v954_v19 = vpack.c.bf16 %v953_v18, %v953_v18 }
 0x377   : > { %3243 = vmatmul.mubr.msk.bf16.vlgmr.msra.gmra.mrb[0].mxu0 %vm925_vm0, %v954_v19 }
 0x378   : > { %1570 = vmatprep.mubr.bf16.mxu0 %v4280_v22  ;;  %1539 = vmatpush1.bf16.xpose.msra.mxu0 %v1512_v24 }
 0x379   : > { %1540 = vmatprep.subr.bf16.mxu0 %v4280_v22 }
 0x380   : > { %1541 = vmatpush1.bf16.xpose.msra.mxu0 %v1515_v28 }
 0x381   : > { %1542 = vmatprep.subr.bf16.mxu0 %v4280_v22 }
 0x388   : > { %1543 = vmatpush1.bf16.xpose.msra.mxu0 %v1518_v32 }
 0x389   : > { %1544 = vmatprep.subr.bf16.mxu0 %v4280_v22 }
 0x390   : > { %1545 = vmatpush1.bf16.xpose.msra.mxu0 %v1521_v36 }
 0x391   : > { %1546 = vmatprep.subr.bf16.mxu0 %v4280_v22 }
 0x398   : > { %1547 = vmatpush1.bf16.xpose.msra.mxu0 %v1524_v40 }
 0x399   : > { %1548 = vmatprep.subr.bf16.mxu0 %v4280_v22 }
 0x3a0   : > { %1549 = vmatpush1.bf16.xpose.msra.mxu0 %v1527_v44 }
 0x3a1   : > { %1550 = vmatprep.subr.bf16.mxu0 %v4280_v22 }
 0x3a8   : > { %1551 = vmatpush1.bf16.xpose.msra.mxu0 %v1530_v48 }
 0x3a9   : > { %1552 = vmatprep.subr.bf16.mxu0 %v4280_v22 }
 0x3b0   : > { %1553 = vmatpush1.bf16.xpose.msra.mxu0 %v1533_v58 }
 0x3b1   : > { %1554 = vmatprep.subr.bf16.mxu0 %v4280_v22 }
 0x3b8   : > { %1555 = vmatpush1.bf16.xpose.msra.mxu0 %v1536_v62  ;;  %v1629_v62 = vsel %vm1393_vm2, %v3530_v60, 0 }
 0x3b9   : > { %1766 = vmatprep.subr.bf16.mxu0 %v4280_v22 }
 0x44a   : > { %v1015_v50 = vpop.f32.mrb[0].mxu0 }
 0x44b   : > { %v1016_v51 = vadd.f32 %v3107_v49, %v1015_v50  ;;  %v3244_v52 = vpop.f32.mrb[1].mxu0 }
 0x44c   : > { %v1018_v53 = vpop.f32.mrb[2].mxu0 }
 0x44d   : > { %1028 = vrot.lane.b32.xlu0 %v1016_v51, %s4281_s1  ;;  %1022 = vrot.lane.b32.xlu1 %v1016_v51, %s4282_s8  ;;  %v3245_v54 = vpop.f32.mrb[3].mxu0 }
 0x44e   : > { %v3528_v54 = vld [vmem:[%s4941_s26 + $0x88] sm:$0xff]  }
 0x44f   : > { %v1626_v56 = vsel %vm1393_vm2, %v3528_v54, 0 }
 0x451   : > { %1025 = vrot.lane.b32.xlu1 %v1016_v51, %s4283_s6 }
 0x4bf   : > { %v1029_v6 = vpop.permute.xlu0 %1028  ;;  %v1023_v7 = vpop.permute.xlu1 %1022 }
 0x4c0   : > { %v1047_v11 = vcombine.low %v1023_v7, %v1029_v6  ;;  %v1048_v12 = vcombine.high %v1023_v7, %v1029_v6  ;;  %v3534_v6 = vld [vmem:[%s4941_s26 + $0xa0] sm:$0xff]  }
 0x4c1   : > { %v3535_v7 = vld [vmem:[%s4941_s26 + $0xe4] sm:$0xff]   ;;  %v1635_v9 = vsel %vm1393_vm2, %v3534_v6, 0 }
 0x4c2   : > { %v1055_v17 = vrot.slane %v1047_v11, %v5052_v10  ;;  %v1062_v18 = vrot.slane %v1048_v12, %v5052_v10  ;;  %v1749_v11 = vsel %vm1393_vm2, %v3535_v7, 0  ;;  %v3536_v12 = vld [vmem:[%s4941_s26 + $0xa8] sm:$0xff]  }
 0x4c3   : > { %v1026_v13 = vpop.permute.xlu1 %1025 }
 0x4c4   : > { %v1031_v14 = vcombine.low %v1016_v51, %v1026_v13  ;;  %v1032_v15 = vcombine.high %v1016_v51, %v1026_v13  ;;  %v3537_v13 = vld [vmem:[%s4941_s26 + $0xec] sm:$0xff]  }
 0x4c6   : > { %v1039_v19 = vrot.slane %v1031_v14, %v5052_v10  ;;  %v1046_v20 = vrot.slane %v1032_v15, %v5052_v10  ;;  %v1638_v14 = vsel %vm1393_vm2, %v3536_v12, 0  ;;  %v1752_v15 = vsel %vm1393_vm2, %v3537_v13, 0 }
 0x4c8   : > { %v1063_v21 = vcombine.low %v1039_v19, %v1055_v17  ;;  %v1064_v23 = vcombine.high %v1039_v19, %v1055_v17  ;;  %v1079_v24 = vcombine.low %v1046_v20, %v1062_v18  ;;  %v1080_v25 = vcombine.high %v1046_v20, %v1062_v18  ;;  %v3538_v17 = vld [vmem:[%s4941_s26 + $0xb0] sm:$0xff]  }
 0x4c9   : > { %v3539_v18 = vld [vmem:[%s4941_s26 + $0xf4] sm:$0xff]   ;;  %v1641_v19 = vsel %vm1393_vm2, %v3538_v17, 0  ;;  %v3548_v17 = vld [vmem:[%s4947_s30 + $0x44] sm:$0xff]  }
 0x4ca   : > { %v1071_v26 = vrot.slane %v1063_v21, %v5055_v16  ;;  %v1078_v27 = vrot.slane %v1064_v23, %v5055_v16  ;;  %v1087_v28 = vrot.slane %v1079_v24, %v5055_v16  ;;  %v1094_v29 = vrot.slane %v1080_v25, %v5055_v16  ;;  %v3540_v21 = vld [vmem:[%s4941_s26 + $0xb8] sm:$0xff]  }
 0x4cb   : > { %v1755_v20 = vsel %vm1393_vm2, %v3539_v18, 0  ;;  %v3541_v23 = vld [vmem:[%s4941_s26 + $0xfc] sm:$0xff]   ;;  %v1644_v24 = vsel %vm1393_vm2, %v3540_v21, 0  ;;  %v3547_v18 = vld [vmem:[%s4947_s30 + $0x8] sm:$0xff]   ;;  %v3552_v21 = vld [vmem:[%s4947_s30 + $0x54] sm:$0xff]  }
 0x4cc   : > { %v1099_v30 = vcombine.low %v1071_v26, %v1078_v27  ;;  %v3111_v31 = vcombine.high %v1071_v26, %v1078_v27  ;;  %v1115_v32 = vcombine.low %v1087_v28, %v1094_v29  ;;  %v3112_v33 = vcombine.high %v1087_v28, %v1094_v29  ;;  %v3542_v26 = vld [vmem:[%s4941_s26 + $0xc0] sm:$0xff]  }
 0x4cd   : > { %v1758_v25 = vsel %vm1393_vm2, %v3541_v23, 0  ;;  %v3543_v27 = vld [vmem:[%s4941_s26 + $0x104] sm:$0xff]   ;;  %v1647_v28 = vsel %vm1393_vm2, %v3542_v26, 0  ;;  %v3551_v23 = vld [vmem:[%s4947_s30 + $0x18] sm:$0xff]  }
 0x4ce   : > { %v1106_v34 = vrot.slane %v1099_v30, %v5052_v10  ;;  %v1114_v35 = vrot.slane %v3111_v31, %v5052_v10  ;;  %v1122_v36 = vrot.slane %v1115_v32, %v5052_v10  ;;  %v1130_v37 = vrot.slane %v3112_v33, %v5052_v10  ;;  %v3544_v30 = vld [vmem:[%s4941_s26 + $0xc8] ss:$0 sps:$4 sm:$0xff]   ;;  %v3545_v31 = vld [vmem:[%s4941_s26 + $0x10c] ss:$0 sps:$4 sm:$0xff]   ;;  %s2760_s26 = sshll.u32 %s920_s2, 4  ;;  %s2761_s26 = int_to_ptr.vmem [resolvable:$true] %s2760_s26 }
 0x4cf   : > { %v1761_v29 = vsel %vm1393_vm2, %v3543_v27, 0  ;;  %v1650_v32 = vsel %vm1393_vm2, %v3544_v30, 0  ;;  %v1764_v33 = vsel %vm1393_vm2, %v3545_v31, 0  ;;  %s4111_s23 = scalar_lea.vmem %s2761_s26, 128 }
 0x4d0   : > { %v1131_v38 = vcombine.low %v1106_v34, %v1114_v35  ;;  %v1132_v39 = vcombine.high %v1106_v34, %v1114_v35  ;;  %v1147_v40 = vcombine.low %v1122_v36, %v1130_v37  ;;  %v1148_v41 = vcombine.high %v1122_v36, %v1130_v37  ;;  %v1193_v36 = vld [vmem:[%s797_s9] sm:$0x1]  ;;  %p4112_p0 = scmp.ne.s32.totalorder %s2761_s26, %s4111_s23 }
 0x4d1   : > { %vm1194_vm4 = vcmp.gt.f32.partialorder %v1193_v36, 0.5  ;;  %v1182_v37 = vsub.s32 0, %v5049_v5 }
 0x4d2   : > { %v1139_v42 = vrot.slane %v1131_v38, %v5055_v16  ;;  %v1146_v43 = vrot.slane %v1132_v39, %v5055_v16  ;;  %v1155_v44 = vrot.slane %v1147_v40, %v5055_v16  ;;  %v1162_v45 = vrot.slane %v1148_v41, %v5055_v16  ;;  %v1176_v41 = vld [vmem:[%s789_s12] sm:$0x1]  ;;  %p4113_p4 = pnand %p4112_p0, %p5565_p7  ;;  %s4289_s12 = smov [#allocation32]  }
 0x4d3   : > { %v1195_v38 = vsel %vm1194_vm4, 1, %v4280_v22  ;;  %v1191_v39 = vand.u32 127, %v1036_v1  ;;  %vm1177_vm5 = vcmp.gt.f32.partialorder %v1176_v41, 0.5  ;;  %s4115_s9 = sshll.u32 %s4289_s12, 4  ;;  %s4116_s9 = int_to_ptr.vmem [resolvable:$false] %s4115_s9 }
 0x4d4   : > { %v1163_v46 = vcombine.low %v1139_v42, %v1155_v44  ;;  %v1164_v47 = vcombine.high %v1139_v42, %v1155_v44  ;;  %v1165_v48 = vcombine.low %v1146_v43, %v1162_v45  ;;  %v1166_v49 = vcombine.high %v1146_v43, %v1162_v45  ;;  %p4114_p10 = pneg %p4113_p4  ;;  %s4117_s1 = scalar_lea.vmem %s4116_s9, 256 }
 0x4d5   : > { %v1199_v40 = vrot.slane %v1195_v38, %v1182_v37  ;;  %vm1192_vm6 = vcmp.gt.s32.totalorder %v1191_v39, %v5049_v5  ;;  %v1178_v42 = vsel %vm1177_vm5, -1e+09, %v4278_v8  ;;  %p4118_p9 = scmp.lt.s32.totalorder %s2761_s26, %s4116_s9  ;;  %p4119_p1 = scmp.lt.s32.totalorder %s4117_s1, %s4111_s23 }
 0x4d6   : > { %v1167_v50 = vpack.c.bf16 %v1163_v46, %v1163_v46  ;;  %v1168_v51 = vpack.c.bf16 %v1164_v47, %v1164_v47  ;;  %v1169_v52 = vpack.c.bf16 %v1165_v48, %v1165_v48  ;;  %v1170_v53 = vpack.c.bf16 %v1166_v49, %v1166_v49 }
 0x4d7   : > { %vm1200_vm7 = vcmp.eq.s32.totalorder %v1199_v40, 1  ;;  %v1183_v43 = vrot.slane %v1178_v42, %v1182_v37  ;;  %p4120_p13 = por %p4119_p1, %p4118_p9 }
 0x4d8   : > { %1172 = vst.msk [vmem:[#allocation2] sm:$0xf] %vm1171_vm3, %v1167_v50  ;;  %1173 = vst.msk [vmem:[#allocation2 + $0x4] sm:$0xf] %vm1171_vm3, %v1168_v51 }
 0x4d9   : > { %1174 = vst.msk [vmem:[#allocation2 + $0x8] sm:$0xf] %vm1171_vm3, %v1169_v52  ;;  %1175 = vst.msk [vmem:[#allocation2 + $0xc] sm:$0xf] %vm1171_vm3, %v1170_v53  ;;  %p4121_p3 = pnand %p4120_p13, %p4114_p10 }
 0x4da   : > { %vm1201_vm8 = vmor %vm1192_vm6, %vm1200_vm7 }
 0x4db   : > { %v1202_v44 = vsel %vm1201_vm8, -1e+09, %v4278_v8 }
 0x4df   : > { %v1205_v58 = vld [vmem:[#allocation2] sm:$0xf]  ;;  %v1206_v59 = vld [vmem:[#allocation2 + $0x4] sm:$0xf] }
 0x4e0   : > { %3122 = vmatmul.mubr.msk.bf16.vlgmr.msra.gmra.mrb[0].mxu1 %vm1393_vm2, %v1205_v58  ;;  %3132 = vmatmul.mubr.msk.bf16.vlgmr.msra.gmra.mrb[4].mxu0 %vm1393_vm2, %v1206_v59  ;;  %v1207_v34 = vld [vmem:[#allocation2 + $0x8] sm:$0xf]  ;;  %v1208_v35 = vld [vmem:[#allocation2 + $0xc] sm:$0xf] }
 0x4e1   : > { %1653 = vmatpush1.bf16.xpose.msra.mxu1 %v1626_v56  ;;  %1767 = vmatpush1.bf16.xpose.msra.mxu0 %v1740_v57 }
 0x4e2   : > { %1654 = vmatprep.subr.bf16.mxu1 %v4280_v22  ;;  %1768 = vmatprep.subr.bf16.mxu0 %v4280_v22 }
 0x4e3   : > { %1684 = vmatprep.mubr.bf16.mxu1 %v4280_v22  ;;  %1798 = vmatprep.mubr.bf16.mxu0 %v4280_v22 }
 0x4e9   : > { %1655 = vmatpush1.bf16.xpose.msra.mxu1 %v1629_v62  ;;  %1769 = vmatpush1.bf16.xpose.msra.mxu0 %v1743_v63 }
 0x4ea   : > { %1656 = vmatprep.subr.bf16.mxu1 %v4280_v22  ;;  %1770 = vmatprep.subr.bf16.mxu0 %v4280_v22 }
 0x4f1   : > { %1657 = vmatpush1.bf16.xpose.msra.mxu1 %v1632_v3  ;;  %1771 = vmatpush1.bf16.xpose.msra.mxu0 %v1746_v4 }
 0x4f2   : > { %1658 = vmatprep.subr.bf16.mxu1 %v4280_v22  ;;  %1772 = vmatprep.subr.bf16.mxu0 %v4280_v22 }
 0x4f9   : > { %1659 = vmatpush1.bf16.xpose.msra.mxu1 %v1635_v9  ;;  %1773 = vmatpush1.bf16.xpose.msra.mxu0 %v1749_v11 }
 0x4fa   : > { %1660 = vmatprep.subr.bf16.mxu1 %v4280_v22  ;;  %1774 = vmatprep.subr.bf16.mxu0 %v4280_v22 }
 0x501   : > { %1661 = vmatpush1.bf16.xpose.msra.mxu1 %v1638_v14  ;;  %1775 = vmatpush1.bf16.xpose.msra.mxu0 %v1752_v15  ;;  %v3546_v15 = vld [vmem:[%s4947_s30] sm:$0xff]  }
 0x502   : > { %1662 = vmatprep.subr.bf16.mxu1 %v4280_v22  ;;  %1776 = vmatprep.subr.bf16.mxu0 %v4280_v22 }
 0x509   : > { %1663 = vmatpush1.bf16.xpose.msra.mxu1 %v1641_v19  ;;  %1777 = vmatpush1.bf16.xpose.msra.mxu0 %v1755_v20  ;;  %v3550_v19 = vld [vmem:[%s4947_s30 + $0x4c] sm:$0xff]  }
 0x50a   : > { %1664 = vmatprep.subr.bf16.mxu1 %v4280_v22  ;;  %1778 = vmatprep.subr.bf16.mxu0 %v4280_v22  ;;  %v3549_v20 = vld [vmem:[%s4947_s30 + $0x10] sm:$0xff]  }
 0x511   : > { %1665 = vmatpush1.bf16.xpose.msra.mxu1 %v1644_v24  ;;  %1779 = vmatpush1.bf16.xpose.msra.mxu0 %v1758_v25  ;;  %v3554_v24 = vld [vmem:[%s4947_s30 + $0x5c] sm:$0xff]  }
 0x512   : > { %1666 = vmatprep.subr.bf16.mxu1 %v4280_v22  ;;  %1780 = vmatprep.subr.bf16.mxu0 %v4280_v22  ;;  %v3553_v25 = vld [vmem:[%s4947_s30 + $0x20] sm:$0xff]  }
 0x519   : > { %1667 = vmatpush1.bf16.xpose.msra.mxu1 %v1647_v28  ;;  %1781 = vmatpush1.bf16.xpose.msra.mxu0 %v1761_v29 }
 0x51a   : > { %1668 = vmatprep.subr.bf16.mxu1 %v4280_v22  ;;  %1782 = vmatprep.subr.bf16.mxu0 %v4280_v22 }
 0x521   : > { %1669 = vmatpush1.bf16.xpose.msra.mxu1 %v1650_v32  ;;  %1783 = vmatpush1.bf16.xpose.msra.mxu0 %v1764_v33 }
 0x522   : > { %1941 = vmatprep.subr.bf16.mxu1 %v4280_v22  ;;  %2038 = vmatprep.subr.bf16.mxu0 %v4280_v22 }
 0x528   : > { %3142 = vmatmul.mubr.msk.bf16.vlgmr.msra.gmra.mrb[4].mxu1 %vm1393_vm2, %v1207_v34  ;;  %3152 = vmatmul.mubr.msk.bf16.vlgmr.msra.gmra.mrb[8].mxu0 %vm1393_vm2, %v1208_v35 }
 0x529   : > { %1942 = vmatpush1.bf16.msra.mxu1 %v3546_v15  ;;  %2039 = vmatpush1.bf16.msra.mxu0 %v3548_v17 }
 0x52a   : > { %1943 = vmatprep.subr.bf16.mxu1 %v4280_v22  ;;  %2040 = vmatprep.subr.bf16.mxu0 %v4280_v22 }
 0x52d   : > { %1944 = vmatpush1.bf16.msra.mxu1 %v3547_v18  ;;  %2041 = vmatpush1.bf16.msra.mxu0 %v3550_v19  ;;  %v3564_v19 = vld [vmem:[%s4947_s30 + $0x88] sm:$0xff]  }
 0x52e   : > { %1945 = vmatprep.subr.bf16.mxu1 %v4280_v22  ;;  %2042 = vmatprep.subr.bf16.mxu0 %v4280_v22 }
 0x531   : > { %1946 = vmatpush1.bf16.msra.mxu1 %v3549_v20  ;;  %2043 = vmatpush1.bf16.msra.mxu0 %v3552_v21 }
 0x532   : > { %1947 = vmatprep.subr.bf16.mxu1 %v4280_v22  ;;  %2044 = vmatprep.subr.bf16.mxu0 %v4280_v22 }
 0x535   : > { %1948 = vmatpush1.bf16.msra.mxu1 %v3551_v23  ;;  %2045 = vmatpush1.bf16.msra.mxu0 %v3554_v24 }
 0x536   : > { %1949 = vmatprep.subr.bf16.mxu1 %v4280_v22  ;;  %2046 = vmatprep.subr.bf16.mxu0 %v4280_v22 }
 0x539   : > { %1950 = vmatpush1.bf16.msra.mxu1 %v3553_v25 }
 0x53a   : > { %1951 = vmatprep.subr.bf16.mxu1 %v4280_v22 }
 0x5b3   : > { %v1458_v45 = vpop.f32.mrb[0].mxu1  ;;  %v1572_v46 = vpop.f32.mrb[4].mxu0 }
 0x5b4   : > { %v1460_v47 = vpop.f32.mrb[1].mxu1  ;;  %v1574_v48 = vpop.f32.mrb[5].mxu0  ;;  %v1459_v52 = vadd.f32 %v1458_v45, %v1183_v43  ;;  %v5147_v53 = vadd.f32 %v1572_v46, %v1183_v43  ;;  %v3556_v45 = vld [vmem:[%s4947_s30 + $0x64] sm:$0xff]   ;;  %v3557_v46 = vld [vmem:[%s4947_s30 + $0x30] sm:$0xff]  }
 0x5b5   : > { %v5143_v49 = vadd.f32 %v1460_v47, %v1202_v44  ;;  %v5145_v1 = vadd.f32 %v1574_v48, %v1202_v44  ;;  %v1462_v50 = vpop.f32.mrb[2].mxu1  ;;  %v1576_v51 = vpop.f32.mrb[6].mxu0  ;;  %2047 = vmatpush1.bf16.msra.mxu0 %v3556_v45  ;;  %v3558_v47 = vld [vmem:[%s4947_s30 + $0x6c] sm:$0xff]   ;;  %v3559_v48 = vld [vmem:[%s4947_s30 + $0x38] sm:$0xff]  }
 0x5b6   : > { %v1463_v5 = vpop.f32.mrb[3].mxu1  ;;  %v1577_v54 = vpop.f32.mrb[7].mxu0  ;;  %2048 = vmatprep.subr.bf16.mxu0 %v4280_v22  ;;  %v3562_v50 = vld [vmem:[%s4947_s30 + $0x7c] sm:$0xff]  }
 0x5b7   : > { %v1807_v55 = vsel %vm1393_vm2, %v5143_v49, -inf  ;;  %v1811_v56 = vsel %vm1393_vm2, %v5145_v1, -inf }
 0x5b8   : > { %v1808_v57 = vmax.f32 %v1459_v52, %v1807_v55  ;;  %v1812_v58 = vmax.f32 %v5147_v53, %v1811_v56 }
 0x5b9   : > { %2049 = vmatpush1.bf16.msra.mxu0 %v3558_v47 }
 0x5ba   : > { %1809 = vmax.xlane.f32.xlu1 %v1808_v57  ;;  %1813 = vmax.xlane.f32.xlu0 %v1812_v58 }
 0x5bb   : > { %2050 = vmatprep.subr.bf16.mxu0 %v4280_v22 }
 0x5fb   : > { %v1686_v59 = vpop.f32.mrb[4].mxu1  ;;  %v1800_v60 = vpop.f32.mrb[8].mxu0 }
 0x5fc   : > { %v1688_v61 = vpop.f32.mrb[5].mxu1  ;;  %v1802_v62 = vpop.f32.mrb[9].mxu0  ;;  %v5158_v4 = vadd.f32 %v1686_v59, %v1183_v43  ;;  %v5165_v13 = vadd.f32 %v1800_v60, %v1183_v43 }
 0x5fd   : > { %v5154_v63 = vadd.f32 %v1688_v61, %v1202_v44  ;;  %v5156_v0 = vadd.f32 %v1802_v62, %v1202_v44  ;;  %v1690_v2 = vpop.f32.mrb[6].mxu1  ;;  %v1804_v3 = vpop.f32.mrb[10].mxu0  ;;  %v3555_v44 = vld [vmem:[%s4947_s30 + $0x28] sm:$0xff]  }
 0x5fe   : > { %v1691_v6 = vpop.f32.mrb[7].mxu1  ;;  %v1805_v7 = vpop.f32.mrb[11].mxu0  ;;  %1952 = vmatpush1.bf16.msra.mxu1 %v3555_v44  ;;  %v3581_v44 = vld [vmem:[%s4947_s30 + $0x10c] ss:$0 sps:$4 sm:$0xff]  }
 0x5ff   : > { %v1815_v9 = vsel %vm1393_vm2, %v5154_v63, -inf  ;;  %v1819_v12 = vsel %vm1393_vm2, %v5156_v0, -inf  ;;  %1953 = vmatprep.subr.bf16.mxu1 %v4280_v22  ;;  %v2230_v45 = vsel %vm1937_vm9, %v3581_v44, 0 }
 0x600   : > { %v1816_v11 = vmax.f32 %v5158_v4, %v1815_v9  ;;  %v1820_v14 = vmax.f32 %v5165_v13, %v1819_v12 }
 0x602   : > { %1817 = vmax.xlane.f32.xlu1 %v1816_v11  ;;  %1954 = vmatpush1.bf16.msra.mxu1 %v3557_v46 }
 0x603   : > { %1955 = vmatprep.subr.bf16.mxu1 %v4280_v22 }
 0x606   : > { %1821 = vmax.xlane.f32.xlu1 %v1820_v14  ;;  %1956 = vmatpush1.bf16.msra.mxu1 %v3559_v48 }
 0x607   : > { %1957 = vmatprep.subr.bf16.mxu1 %v4280_v22 }
 0x647   : > { %v1810_v26 = vpop.xlane.xlu1 %1809  ;;  %v1814_v27 = vpop.xlane.xlu0 %1813 }
 0x648   : > { %v1823_v28 = vsub.f32 %v1459_v52, %v1810_v26  ;;  %v1824_v29 = vsub.f32 %v5143_v49, %v1810_v26  ;;  %v1825_v30 = vsub.f32 %v5147_v53, %v1814_v27  ;;  %v1826_v31 = vsub.f32 %v5145_v1, %v1814_v27  ;;  %v3560_v49 = vld [vmem:[%s4947_s30 + $0x74] sm:$0xff]   ;;  %v3561_v1 = vld [vmem:[%s4947_s30 + $0x40] ss:$0 sps:$4 sm:$0xff]   ;;  %v3563_v52 = vld [vmem:[%s4947_s30 + $0x84] ss:$0 sps:$4 sm:$0xff]  }
 0x649   : > { %2051 = vmatpush1.bf16.msra.mxu0 %v3560_v49  ;;  %v1939_v51 = vsel %vm1937_vm9, %v3561_v1, 0  ;;  %v2036_v53 = vsel %vm1937_vm9, %v3563_v52, 0  ;;  %v3565_v27 = vld [vmem:[%s4947_s30 + $0x90] sm:$0xff]  }
 0x64a   : > { %v1831_v32 = vmul.f32 1.442695, %v1823_v28  ;;  %v1833_v33 = vmul.f32 1.442695, %v1824_v29  ;;  %v1837_v34 = vmul.f32 1.442695, %v1826_v31  ;;  %2052 = vmatprep.subr.bf16.mxu0 %v4280_v22  ;;  %1958 = vmatpush1.bf16.msra.mxu1 %v1939_v51 }
 0x64b   : > { %v1835_v35 = vmul.f32 1.442695, %v1825_v30  ;;  %2135 = vmatprep.subr.bf16.mxu1 %v4280_v22  ;;  %v3566_v28 = vld [vmem:[%s4947_s30 + $0xcc] sm:$0xff]   ;;  %v3567_v29 = vld [vmem:[%s4947_s30 + $0x98] sm:$0xff]   ;;  %v3569_v31 = vld [vmem:[%s4947_s30 + $0xa0] sm:$0xff]  }
 0x64c   : > { %3596 = vpow2.f32 %v1831_v32  ;;  %v3568_v30 = vld [vmem:[%s4947_s30 + $0xd4] sm:$0xff]   ;;  %v3570_v32 = vld [vmem:[%s4947_s30 + $0xdc] sm:$0xff]  }
 0x64d   : > { %3598 = vpow2.f32 %v1833_v33  ;;  %2053 = vmatpush1.bf16.msra.mxu0 %v3562_v50  ;;  %v3571_v33 = vld [vmem:[%s4947_s30 + $0xa8] sm:$0xff]  }
 0x64e   : > { %3600 = vpow2.f32 %v1837_v34  ;;  %2054 = vmatprep.subr.bf16.mxu0 %v4280_v22  ;;  %v3572_v34 = vld [vmem:[%s4947_s30 + $0xe4] sm:$0xff]  }
 0x64f   : > { %3602 = vpow2.f32 %v1835_v35  ;;  %v3573_v35 = vld [vmem:[%s4947_s30 + $0xb0] sm:$0xff]  }
 0x651   : > { %2055 = vmatpush1.bf16.msra.mxu0 %v2036_v53 }
 0x652   : > { %2232 = vmatprep.subr.bf16.mxu0 %v4280_v22 }
 0x656   : > { %v5189_v36 = vpop.eup %3596 }
 0x657   : > { %v5191_v37 = vpop.eup %3598 }
 0x658   : > { %v1847_v38 = vsel %vm1393_vm2, %v5191_v37, 0.0  ;;  %v5195_v39 = vpop.eup %3600 }
 0x659   : > { %v1848_v40 = vadd.f32 %v5189_v36, %v1847_v38  ;;  %v5198_v41 = vpop.eup %3602  ;;  %v1851_v42 = vsel %vm1393_vm2, %v5195_v39, 0.0  ;;  %v3576_v38 = vld [vmem:[%s4947_s30 + $0xf4] sm:$0xff]  }
 0x65a   : > { %v1852_v43 = vadd.f32 %v5198_v41, %v1851_v42  ;;  %v3580_v42 = vld [vmem:[%s4947_s30 + $0x104] sm:$0xff]  }
 0x65b   : > { %1849 = vadd.xlane.f32.xlu1 %v1848_v40  ;;  %v3578_v40 = vld [vmem:[%s4947_s30 + $0xfc] sm:$0xff]  }
 0x65f   : > { %1853 = vadd.xlane.f32.xlu1 %v1852_v43 }
 0x68f   : > { %v1818_v5 = vpop.xlane.xlu1 %1817 }
 0x690   : > { %v1827_v54 = vsub.f32 %v5158_v4, %v1818_v5  ;;  %v1828_v55 = vsub.f32 %v5154_v63, %v1818_v5 }
 0x692   : > { %v1839_v56 = vmul.f32 1.442695, %v1827_v54  ;;  %v1841_v57 = vmul.f32 1.442695, %v1828_v55 }
 0x693   : > { %v1822_v58 = vpop.xlane.xlu1 %1821 }
 0x694   : > { %3604 = vpow2.f32 %v1839_v56  ;;  %v1829_v59 = vsub.f32 %v5165_v13, %v1822_v58  ;;  %v1830_v60 = vsub.f32 %v5156_v0, %v1822_v58  ;;  %v3582_v58 = vld [vmem:[#allocation22] sm:$0xff]  }
 0x695   : > { %3606 = vpow2.f32 %v1841_v57 }
 0x696   : > { %v1843_v61 = vmul.f32 1.442695, %v1829_v59  ;;  %v1845_v62 = vmul.f32 1.442695, %v1830_v60 }
 0x698   : > { %3608 = vpow2.f32 %v1843_v61 }
 0x699   : > { %3610 = vpow2.f32 %v1845_v62 }
 0x69e   : > { %v5227_v2 = vpop.eup %3604 }
 0x69f   : > { %v5229_v3 = vpop.eup %3606 }
 0x6a0   : > { %v1855_v63 = vsel %vm1393_vm2, %v5229_v3, 0.0 }
 0x6a1   : > { %v1856_v4 = vadd.f32 %v5227_v2, %v1855_v63 }
 0x6a2   : > { %v5234_v6 = vpop.eup %3608 }
 0x6a3   : > { %v5236_v7 = vpop.eup %3610  ;;  %1857 = vadd.xlane.f32.xlu1 %v1856_v4 }
 0x6a4   : > { %v1859_v0 = vsel %vm1393_vm2, %v5236_v7, 0.0 }
 0x6a5   : > { %v1860_v9 = vadd.f32 %v5234_v6, %v1859_v0 }
 0x6a7   : > { %1861 = vadd.xlane.f32.xlu0 %v1860_v9 }
 0x6e8   : > { %v1850_v11 = vpop.xlane.xlu1 %1849 }
 0x6e9   : > { %3612 = vrcp.f32 %v1850_v11 }
 0x6ec   : > { %v1854_v12 = vpop.xlane.xlu1 %1853 }
 0x6ed   : > { %3614 = vrcp.f32 %v1854_v12 }
 0x6f3   : > { %v3613_v13 = vpop.eup %3612 }
 0x6f4   : > { %v1868_v14 = vmul.f32 %v3613_v13, %v5191_v37  ;;  %v1867_v15 = vmul.f32 %v3613_v13, %v5189_v36  ;;  %v3574_v36 = vld [vmem:[%s4947_s30 + $0xec] sm:$0xff]   ;;  %v3575_v37 = vld [vmem:[%s4947_s30 + $0xb8] sm:$0xff]  }
 0x6f6   : > { %v1876_v17 = vpack.c.bf16 %v1868_v14, %v1868_v14  ;;  %v1875_v18 = vpack.c.bf16 %v1867_v15, %v1867_v15 }
 0x6f7   : > { %v3615_v20 = vpop.eup %3614 }
 0x6f8   : > { %3162 = vmatprep.mubr.msk.bf16.mxu1 %vm1393_vm2, %v1876_v17  ;;  %v1870_v21 = vmul.f32 %v3615_v20, %v5195_v39  ;;  %v1869_v23 = vmul.f32 %v3615_v20, %v5198_v41  ;;  %v3577_v39 = vld [vmem:[%s4947_s30 + $0xc0] sm:$0xff]   ;;  %v3579_v41 = vld [vmem:[%s4947_s30 + $0xc8] ss:$0 sps:$4 sm:$0xff]   ;;  %s2732_s30 = scalar_lea.sflag [#allocation33], %s4928_s18 }
 0x6f9   : > { %1974 = vmatmul.mubr.bf16.vlgmr.msra.gmra.mrb[8].mxu1 %v1875_v18  ;;  %v2133_v43 = vsel %vm1937_vm9, %v3579_v41, 0 }
 0x6fa   : > { %v1878_v24 = vpack.c.bf16 %v1870_v21, %v1870_v21  ;;  %v1877_v25 = vpack.c.bf16 %v1869_v23, %v1869_v23  ;;  %v5247_v26 = vadd.f32 %v1869_v23, %v1867_v15  ;;  %2136 = vmatpush1.bf16.msra.mxu1 %v3564_v19 }
 0x6fb   : > { %2137 = vmatprep.subr.bf16.mxu1 %v4280_v22 }
 0x6fc   : > { %3172 = vmatprep.mubr.msk.bf16.mxu0 %vm1393_vm2, %v1878_v24 }
 0x6fd   : > { %2071 = vmatmul.mubr.bf16.vlgmr.msra.gmra.mrb[12].mxu0 %v1877_v25 }
 0x6fe   : > { %2138 = vmatpush1.bf16.msra.mxu1 %v3565_v27  ;;  %2233 = vmatpush1.bf16.msra.mxu0 %v3566_v28 }
 0x6ff   : > { %2139 = vmatprep.subr.bf16.mxu1 %v4280_v22  ;;  %2234 = vmatprep.subr.bf16.mxu0 %v4280_v22 }
 0x702   : > { %2140 = vmatpush1.bf16.msra.mxu1 %v3567_v29  ;;  %2235 = vmatpush1.bf16.msra.mxu0 %v3568_v30  ;;  %v3583_v29 = vld [vmem:[#allocation22 + $0x8] sm:$0xff]  }
 0x703   : > { %2141 = vmatprep.subr.bf16.mxu1 %v4280_v22  ;;  %2236 = vmatprep.subr.bf16.mxu0 %v4280_v22 }
 0x706   : > { %2142 = vmatpush1.bf16.msra.mxu1 %v3569_v31  ;;  %2237 = vmatpush1.bf16.msra.mxu0 %v3570_v32 }
 0x707   : > { %2143 = vmatprep.subr.bf16.mxu1 %v4280_v22  ;;  %2238 = vmatprep.subr.bf16.mxu0 %v4280_v22 }
 0x70a   : > { %2144 = vmatpush1.bf16.msra.mxu1 %v3571_v33  ;;  %2239 = vmatpush1.bf16.msra.mxu0 %v3572_v34 }
 0x70b   : > { %2145 = vmatprep.subr.bf16.mxu1 %v4280_v22  ;;  %2240 = vmatprep.subr.bf16.mxu0 %v4280_v22 }
 0x70e   : > { %2146 = vmatpush1.bf16.msra.mxu1 %v3573_v35  ;;  %2241 = vmatpush1.bf16.msra.mxu0 %v3574_v36 }
 0x70f   : > { %2147 = vmatprep.subr.bf16.mxu1 %v4280_v22  ;;  %2242 = vmatprep.subr.bf16.mxu0 %v4280_v22 }
 0x712   : > { %2148 = vmatpush1.bf16.msra.mxu1 %v3575_v37  ;;  %2243 = vmatpush1.bf16.msra.mxu0 %v3576_v38 }
 0x713   : > { %2149 = vmatprep.subr.bf16.mxu1 %v4280_v22  ;;  %2244 = vmatprep.subr.bf16.mxu0 %v4280_v22 }
 0x716   : > { %2150 = vmatpush1.bf16.msra.mxu1 %v3577_v39  ;;  %2245 = vmatpush1.bf16.msra.mxu0 %v3578_v40 }
 0x717   : > { %2151 = vmatprep.subr.bf16.mxu1 %v4280_v22  ;;  %2246 = vmatprep.subr.bf16.mxu0 %v4280_v22 }
 0x71a   : > { %2152 = vmatpush1.bf16.msra.mxu1 %v2133_v43  ;;  %2247 = vmatpush1.bf16.msra.mxu0 %v3580_v42 }
 0x71b   : > { %2248 = vmatprep.subr.bf16.mxu0 %v4280_v22  ;;  %3262 = vmatprep.subr.bf16.mxu1 %v4278_v8 }
 0x71e   : > { %2249 = vmatpush1.bf16.msra.mxu0 %v2230_v45 }
 0x71f   : > { %3246 = vmatprep.subr.bf16.mxu0 %v4278_v8 }
 0x730   : > { %v1858_v46 = vpop.xlane.xlu1 %1857 }
 0x731   : > { %3616 = vrcp.f32 %v1858_v46 }
 0x734   : > { %v1862_v47 = vpop.xlane.xlu0 %1861 }
 0x735   : > { %3618 = vrcp.f32 %v1862_v47 }
 0x73b   : > { %v3617_v48 = vpop.eup %3616 }
 0x73c   : > { %v1872_v49 = vmul.f32 %v3617_v48, %v5229_v3  ;;  %v1871_v1 = vmul.f32 %v3617_v48, %v5227_v2 }
 0x73e   : > { %v1880_v50 = vpack.c.bf16 %v1872_v49, %v1872_v49  ;;  %v1879_v51 = vpack.c.bf16 %v1871_v1, %v1871_v1  ;;  %v2490_v52 = vadd.f32 %v5247_v26, %v1871_v1 }
 0x73f   : > { %v3619_v22 = vpop.eup %3618 }
 0x740   : > { %3182 = vmatprep.mubr.msk.bf16.mxu1 %vm1393_vm2, %v1880_v50  ;;  %v1874_v53 = vmul.f32 %v3619_v22, %v5236_v7  ;;  %v1873_v5 = vmul.f32 %v3619_v22, %v5234_v6 }
 0x741   : > { %2168 = vmatmul.mubr.bf16.vlgmr.msra.gmra.mrb[12].mxu1 %v1879_v51 }
 0x742   : > { %v1882_v54 = vpack.c.bf16 %v1874_v53, %v1874_v53  ;;  %v1881_v55 = vpack.c.bf16 %v1873_v5, %v1873_v5  ;;  %v2491_v56 = vadd.f32 %v2490_v52, %v1873_v5  ;;  %3278 = vmatprep.mubr.msk.bf16.mxu1 %vm4279_vm1, %v4278_v8 }
 0x744   : > { %3192 = vmatprep.mubr.msk.bf16.mxu0 %vm1393_vm2, %v1882_v54  ;;  %v2724_v57 = vmul.f32 0.25, %v2491_v56  ;;  %v2430_v56 = vld [vmem:[#allocation3] sm:$0xff] }
 0x745   : > { %2265 = vmatmul.mubr.bf16.vlgmr.msra.gmra.mrb[16].mxu0 %v1881_v55 }
 0x746   : > { %3250 = vmatprep.mubr.msk.bf16.mxu0 %vm4279_vm1, %v4278_v8  ;;  %2725 = vst [vmem:[%s920_s2] sm:$0xff] %v2724_v57  ;;  %3247 = vmatpush3.bf16.msra.mxu0 %v3582_v58 }
 0x747   : > { %3248 = vmatprep.subr.bf16.mxu0 %v4278_v8 }
 0x74a   : > { %3249 = vmatpush3.bf16.msra.mxu0 %v3583_v29  ;;  %v3588_v29 = vld [vmem:[#allocation28 + $0x10] sm:$0xff]  }
 0x74b   : > { %3254 = vmatprep.subr.bf16.mxu0 %v4278_v8 }
 0x7cc   : > { %v1975_v59 = vpop.f32.mrb[8].mxu1 }
 0x7cd   : > { %v1977_v60 = vpop.f32.mrb[9].mxu1 }
 0x7ce   : > { %v1978_v61 = vpop.f32.mrb[10].mxu1 }
 0x7cf   : > { %v1979_v62 = vpop.f32.mrb[11].mxu1 }
 0x7d0   : > { %v2072_v2 = vpop.f32.mrb[12].mxu0  ;;  %v3198_v62 = vld [vmem:[#allocation24] ss:$0 sm:$0xff] }
 0x7d1   : > { %v2074_v3 = vpop.f32.mrb[13].mxu0 }
 0x7d2   : > { %v2075_v63 = vpop.f32.mrb[14].mxu0 }
 0x7d3   : > { %v2076_v4 = vpop.f32.mrb[15].mxu0  ;;  %v3624_v63 = vld [vmem:[%s763_s14] sm:$0xff] }
 0x814   : > { %v2169_v6 = vpop.f32.mrb[12].mxu1 }
 0x815   : > { %v2272_v7 = vcombine.low %v1975_v59, %v2169_v6  ;;  %v2273_v0 = vcombine.high %v1975_v59, %v2169_v6  ;;  %v2171_v9 = vpop.f32.mrb[13].mxu1 }
 0x816   : > { %v2172_v11 = vpop.f32.mrb[14].mxu1 }
 0x817   : > { %v2173_v12 = vpop.f32.mrb[15].mxu1  ;;  %v2280_v19 = vrot.slane %v2272_v7, %v5052_v10  ;;  %v2287_v20 = vrot.slane %v2273_v0, %v5052_v10 }
 0x818   : > { %v2266_v13 = vpop.f32.mrb[16].mxu0 }
 0x819   : > { %v2288_v14 = vcombine.low %v2072_v2, %v2266_v13  ;;  %v2289_v15 = vcombine.high %v2072_v2, %v2266_v13  ;;  %v2268_v17 = vpop.f32.mrb[17].mxu0  ;;  %v3584_v13 = vld [vmem:[#allocation25] sm:$0xff]  }
 0x81a   : > { %v2269_v18 = vpop.f32.mrb[18].mxu0 }
 0x81b   : > { %v2296_v21 = vrot.slane %v2288_v14, %v5052_v10  ;;  %v2303_v23 = vrot.slane %v2289_v15, %v5052_v10  ;;  %v2270_v24 = vpop.f32.mrb[19].mxu0  ;;  %v3585_v14 = vld [vmem:[#allocation25 + $0x8] sm:$0xff]  }
 0x81d   : > { %v2304_v25 = vcombine.low %v2280_v19, %v2296_v21  ;;  %v2305_v26 = vcombine.high %v2280_v19, %v2296_v21  ;;  %v2320_v27 = vcombine.low %v2287_v20, %v2303_v23  ;;  %v2321_v28 = vcombine.high %v2287_v20, %v2303_v23  ;;  %v3199_v20 = vld [vmem:[#allocation16] ss:$0 sm:$0xff]  ;;  %v3200_v23 = vld [vmem:[#allocation18] ss:$0 sm:$0xff] }
 0x81f   : > { %v2312_v30 = vrot.slane %v2304_v25, %v5055_v16  ;;  %v2319_v31 = vrot.slane %v2305_v26, %v5055_v16  ;;  %v2328_v32 = vrot.slane %v2320_v27, %v5055_v16  ;;  %v2335_v33 = vrot.slane %v2321_v28, %v5055_v16  ;;  %v3586_v27 = vld [vmem:[#allocation28] sm:$0xff]   ;;  %v3587_v28 = vld [vmem:[#allocation28 + $0x8] sm:$0xff]  }
 0x820   : > { %3263 = vmatpush3.bf16.msra.mxu1 %v3586_v27 }
 0x821   : > { %v2340_v34 = vcombine.low %v2312_v30, %v2319_v31  ;;  %v3193_v35 = vcombine.high %v2312_v30, %v2319_v31  ;;  %v2356_v36 = vcombine.low %v2328_v32, %v2335_v33  ;;  %v3194_v37 = vcombine.high %v2328_v32, %v2335_v33  ;;  %3264 = vmatprep.subr.bf16.mxu1 %v4278_v8  ;;  %v3589_v30 = vld [vmem:[#allocation28 + $0x18] sm:$0xff]   ;;  %v3590_v31 = vld [vmem:[#allocation28 + $0x20] sm:$0xff]   ;;  %v3591_v32 = vld [vmem:[#allocation28 + $0x28] sm:$0xff]  }
 0x822   : > { %v3592_v33 = vld [vmem:[#allocation28 + $0x30] sm:$0xff]  }
 0x823   : > { %v2347_v38 = vrot.slane %v2340_v34, %v5052_v10  ;;  %v2355_v39 = vrot.slane %v3193_v35, %v5052_v10  ;;  %v2363_v40 = vrot.slane %v2356_v36, %v5052_v10  ;;  %v2371_v41 = vrot.slane %v3194_v37, %v5052_v10  ;;  %v3593_v34 = vld [vmem:[#allocation28 + $0x38] sm:$0xff]  }
 0x824   : > { %3265 = vmatpush3.bf16.msra.mxu1 %v3587_v28  ;;  %v3201_v35 = vld [vmem:[#allocation27] ss:$0 sm:$0xff] }
 0x825   : > { %v2373_v42 = vcombine.high %v2347_v38, %v2355_v39  ;;  %v2389_v43 = vcombine.high %v2363_v40, %v2371_v41  ;;  %v2372_v44 = vcombine.low %v2347_v38, %v2355_v39  ;;  %v2388_v45 = vcombine.low %v2363_v40, %v2371_v41  ;;  %3266 = vmatprep.subr.bf16.mxu1 %v4278_v8 }
 0x827   : > { %v2387_v46 = vrot.slane %v2373_v42, %v5055_v16  ;;  %v2403_v47 = vrot.slane %v2389_v43, %v5055_v16  ;;  %v2380_v48 = vrot.slane %v2372_v44, %v5055_v16  ;;  %v2396_v49 = vrot.slane %v2388_v45, %v5055_v16 }
 0x828   : > { %3267 = vmatpush3.bf16.msra.mxu1 %v3588_v29 }
 0x829   : > { %v2406_v1 = vcombine.low %v2387_v46, %v2403_v47  ;;  %v2405_v50 = vcombine.high %v2380_v48, %v2396_v49  ;;  %v2407_v51 = vcombine.high %v2387_v46, %v2403_v47  ;;  %v2404_v22 = vcombine.low %v2380_v48, %v2396_v49  ;;  %3268 = vmatprep.subr.bf16.mxu1 %v4278_v8 }
 0x82b   : > { %2413 = vrot.lane.b32.xlu0 %v2406_v1, %s4286_s11  ;;  %2409 = vrot.lane.b32.xlu1 %v2405_v50, %s4287_s16 }
 0x82c   : > { %3269 = vmatpush3.bf16.msra.mxu1 %v3589_v30 }
 0x82d   : > { %3270 = vmatprep.subr.bf16.mxu1 %v4278_v8 }
 0x82f   : > { %2417 = vrot.lane.b32.xlu1 %v2407_v51, %s4288_s13 }
 0x830   : > { %3271 = vmatpush3.bf16.msra.mxu1 %v3590_v31 }
 0x831   : > { %3272 = vmatprep.subr.bf16.mxu1 %v4278_v8 }
 0x834   : > { %3273 = vmatpush3.bf16.msra.mxu1 %v3591_v32 }
 0x835   : > { %3274 = vmatprep.subr.bf16.mxu1 %v4278_v8 }
 0x838   : > { %3275 = vmatpush3.bf16.msra.mxu1 %v3592_v33 }
 0x839   : > { %3276 = vmatprep.subr.bf16.mxu1 %v4278_v8 }
 0x83c   : > { %3277 = vmatpush3.bf16.msra.mxu1 %v3593_v34 }
 0x89d   : > { %v2410_v10 = vpop.permute.xlu1 %2409  ;;  %v2414_v52 = vpop.permute.xlu0 %2413 }
 0x89e   : > { %v2420_v53 = vsel %vm1393_vm2, %v2404_v22, %v2410_v10 }
 0x89f   : > { %v2422_v54 = vsel %vm2421_vm10, %v2420_v53, %v2414_v52 }
 0x8a1   : > { %v2418_v5 = vpop.permute.xlu1 %2417 }
 0x8a2   : > { %v2424_v16 = vsel %vm2423_vm11, %v2422_v54, %v2418_v5 }
 0x8a3   : > { %v2425_v55 = vpack.c.bf16 %v2424_v16, %v2424_v16 }
 0x8a5   : > { %3251 = vmatmul.mubr.msk.bf16.vlgmr.msra.gmra.mrb[20].mxu0 %vm925_vm0, %v2425_v55 }
 0x8a6   : > { %3258 = vmatprep.mubr.msk.bf16.mxu0 %vm4279_vm1, %v4278_v8  ;;  %3255 = vmatpush3.bf16.msra.mxu0 %v3584_v13 }
 0x8a7   : > { %3256 = vmatprep.subr.bf16.mxu0 %v4278_v8 }
 0x8aa   : > { %3257 = vmatpush3.bf16.msra.mxu0 %v3585_v14 }
 0x978   : > { %v2480_v57 = vpop.f32.mrb[20].mxu0 }
 0x979   : > { %v2486_v58 = vadd.f32 %v2480_v57, %v2430_v56  ;;  %v3252_v59 = vpop.f32.mrb[21].mxu0 }
 0x97a   : > { %v2483_v60 = vpop.f32.mrb[22].mxu0 }
 0x97b   : > { %2487 = vst.msk [vmem:[#allocation3] sm:$0xff] %vm925_vm0, %v2486_v58  ;;  %v3253_v61 = vpop.f32.mrb[23].mxu0 }
 0x982   : > { %v2494_v2 = vld [vmem:[#allocation3] sm:$0xff] }
 0x983   : > { %v2502_v3 = vadd.f32 %v3198_v62, %v2494_v2 }
 0x985   : > { %v5326_v4 = vadd.f32 %v3624_v63, %v2502_v3 }
 0x987   : > { %v2506_v6 = vsel %vm925_vm0, %v5326_v4, 0.0 }
 0x988   : > { %2507 = vadd.xlane.f32.xlu1 %v2506_v6 }
 0xa15   : > { %v2508_v7 = vpop.xlane.xlu1 %2507 }
 0xa16   : > { %v2509_v0 = vmul.f32 0.03125, %v2508_v7 }
 0xa18   : > { %v2510_v9 = vsub.f32 %v5326_v4, %v2509_v0 }
 0xa1a   : > { %v2511_v11 = vmul.f32 %v2510_v9, %v2510_v9 }
 0xa1c   : > { %v2512_v12 = vsel %vm925_vm0, %v2511_v11, 0.0 }
 0xa1d   : > { %2513 = vadd.xlane.f32.xlu0 %v2512_v12 }
 0xaaa   : > { %v2514_v15 = vpop.xlane.xlu0 %2513 }
 0xaab   : > { %v2515_v17 = vmul.f32 0.03125, %v2514_v15 }
 0xaad   : > { %v2516_v18 = vadd.f32 1e-05, %v2515_v17 }
 0xaaf   : > { %3620 = vrsqrt.f32 %v2516_v18 }
 0xab9   : > { %v3621_v19 = vpop.eup %3620 }
 0xaba   : > { %v2518_v21 = vmul.f32 %v3621_v19, %v2510_v9 }
 0xabc   : > { %v2525_v24 = vmul.f32 %v3199_v20, %v2518_v21 }
 0xabe   : > { %v2532_v25 = vadd.f32 %v3200_v23, %v2525_v24 }
 0xac0   : > { %v2533_v26 = vpack.c.bf16 %v2532_v25, %v2532_v25 }
 0xac2   : > { %3259 = vmatmul.mubr.msk.bf16.vlgmr.msra.gmra.mrb[24].mxu0 %vm925_vm0, %v2533_v26 }
 0xb95   : > { %v2594_v36 = vpop.f32.mrb[24].mxu0 }
 0xb96   : > { %v2595_v37 = vadd.f32 %v3201_v35, %v2594_v36  ;;  %v3260_v38 = vpop.f32.mrb[25].mxu0 }
 0xb97   : > { %v2597_v39 = vpop.f32.mrb[26].mxu0 }
 0xb98   : > { %v2600_v40 = vmul.f32 %v2595_v37, %v2595_v37  ;;  %v3261_v41 = vpop.f32.mrb[27].mxu0 }
 0xb9a   : > { %v2601_v42 = vmul.f32 %v2600_v40, %v2595_v37 }
 0xb9c   : > { %v2602_v43 = vmul.f32 0.044715, %v2601_v42 }
 0xb9e   : > { %v2603_v44 = vadd.f32 %v2602_v43, %v2595_v37 }
 0xba0   : > { %v2604_v45 = vmul.f32 0.7978846, %v2603_v44 }
 0xba2   : > { %3622 = vtanh.f32 %v2604_v45 }
 0xbac   : > { %v3623_v46 = vpop.eup %3622 }
 0xbad   : > { %v2606_v8 = vadd.f32 1.0, %v3623_v46 }
 0xbaf   : > { %v2607_v47 = vmul.f32 0.5, %v2606_v8 }
 0xbb1   : > { %v2608_v48 = vmul.f32 %v2607_v47, %v2595_v37 }
 0xbb3   : > { %v2609_v49 = vpack.c.bf16 %v2608_v48, %v2608_v48 }
 0xbb5   : > { %3279 = vmatmul.mubr.bf16.vlgmr.msra.gmra.mrb[16].mxu1 %v2609_v49 }
 0xbb6   : > { %4124 = shalt.err (!%p4121_p3)
}
 0xbb7   : > { %s4125_s8 = scalar_lea.hbm %s5347_s7, 128  ;;  %s4129_s11 = scalar_lea.hbm %s5564_s17, 256 }
 0xbb8   : > { %p4126_p12 = scmp.ne.s32.totalorder %s5347_s7, %s4125_s8  ;;  %p4130_p8 = scmp.lt.u32.totalorder %s5347_s7, %s5564_s17 }
 0xbb9   : > { %p4131_p2 = scmp.lt.u32.totalorder %s4129_s11, %s4125_s8  ;;  %p4133_p0 = scmp.lt.u32.totalorder %s4125_s8, %s5347_s7 }
 0xbba   : > { %p4127_p6 = pnand %p4126_p12, %p5565_p7 }
 0xbbb   : > { %p4132_p5 = por %p4131_p2, %p4130_p8 }
 0xbbc   : > { %p4128_p11 = pneg %p4127_p6 }
 0xbbd   : > { %p4134_p4 = por %p4133_p0, %p4132_p5 }
 0xbbf   : > { %p4135_p10 = pnand %p4134_p4, %p4128_p11 }
 0xbc1   : > { %4138 = shalt.err (!%p4135_p10)
}
 0xbc2   : > { %3346 = dma.vmem_to_hbm [thread:$0]  (%p5565_p7), %s2761_s26, 128, %s5347_s7, %s2732_s30   ;;  %v3205_v1 = vld [vmem:[#allocation30] ss:$0 sm:$0xff] }
 0xbc3   : > { %s913_s27 = scalar_lea.vmem [#allocation31], %s4931_s24  ;;  %s5566_s12 = sld [smem:[#allocation68_spill]] }
 0xbc4   : > { %s2746_s14 = sshll.u32 %s913_s27, 4  ;;  %s2727_s24 = scalar_lea.sflag [#allocation6], %s4928_s18  ;;  %s5378_s14 = int_to_ptr.vmem [resolvable:$true] %s2746_s14 }
 0xbc5   : > { %s4139_s7 = scalar_lea.vmem %s5378_s14, 128  ;;  %s4290_s26 = smov [#allocation31]  }
 0xbc6   : > { %p4140_p9 = scmp.ne.s32.totalorder %s5378_s14, %s4139_s7  ;;  %s4143_s22 = sshll.u32 %s4290_s26, 4  ;;  %s4144_s22 = int_to_ptr.vmem [resolvable:$false] %s4143_s22 }
 0xbc7   : > { %s4145_s30 = scalar_lea.vmem %s4144_s22, 256  ;;  %p4146_p3 = scmp.lt.s32.totalorder %s5378_s14, %s4144_s22 }
 0xbc8   : > { %p4141_p1 = pnand %p4140_p9, %p5565_p7  ;;  %p4147_p12 = scmp.lt.s32.totalorder %s4145_s30, %s4139_s7 }
 0xbc9   : > { %s5376_s9 = scalar_lea.hbm %s5566_s12, %s3216_s25 }
 0xbca   : > { %p4142_p13 = pneg %p4141_p1  ;;  %p4148_p6 = por %p4147_p12, %p4146_p3 }
 0xbcc   : > { %p4149_p11 = pnand %p4148_p6, %p4142_p13 }
 0xc88   : > { %v2715_v50 = vpop.f32.mrb[16].mxu1 }
 0xc89   : > { %v2716_v51 = vadd.f32 %v3205_v1, %v2715_v50  ;;  %v3280_v22 = vpop.f32.mrb[17].mxu1 }
 0xc8a   : > { %v2718_v10 = vpop.f32.mrb[18].mxu1 }
 0xc8b   : > { %v2721_v52 = vadd.f32 %v2716_v51, %v5326_v4  ;;  %v3281_v53 = vpop.f32.mrb[19].mxu1 }
 0xc8d   : > { %2722 = vst.msk [vmem:[%s913_s27] sm:$0xff] %vm925_vm0, %v2721_v52 }
 0xc8e   : > { %4152 = shalt.err (!%p4149_p11)
}
 0xc8f   : > { %s4153_s18 = scalar_lea.hbm %s5376_s9, 128  ;;  %s4157_s8 = scalar_lea.hbm %s5566_s12, 256 }
 0xc90   : > { %p4154_p8 = scmp.ne.s32.totalorder %s5376_s9, %s4153_s18  ;;  %p4158_p0 = scmp.lt.u32.totalorder %s5376_s9, %s5566_s12 }
 0xc91   : > { %p4159_p4 = scmp.lt.u32.totalorder %s4157_s8, %s4153_s18  ;;  %p4161_p9 = scmp.lt.u32.totalorder %s4153_s18, %s5376_s9 }
 0xc92   : > { %p4155_p2 = pnand %p4154_p8, %p5565_p7 }
 0xc93   : > { %p4160_p10 = por %p4159_p4, %p4158_p0 }
 0xc94   : > { %p4156_p5 = pneg %p4155_p2 }
 0xc95   : > { %p4162_p1 = por %p4161_p9, %p4160_p10 }
 0xc97   : > { %p4163_p13 = pnand %p4162_p1, %p4156_p5 }
 0xc99   : > { %4166 = shalt.err (!%p4163_p13)
}
 0xc9a   : > { %3345 = dma.vmem_to_hbm [thread:$0]  (%p5565_p7), %s5378_s14, 128, %s5376_s9, %s2727_s24  }
 0xc9b PF: > { %s5567_s11 = sld [smem:[#allocation45_spill]]  ;;  %s5568_s16 = sld [smem:[#allocation51_spill]] }
 0xc9c   : > { %p5570_p12 = scmp.ge.s32.totalorder %s4257_s19, 2 }
 0xca1   : > { %s2772_s13 = sand.u32 1, %s5567_s11   ;;  %p5569_p3 = scmp.ne.s32.totalorder %s5568_s16, 0 }
 0xca2   : > { %s2773_s27 = scalar_lea.sflag [#allocation6], %s2772_s13 }
 0xca3   : > { %p3403_p6 = pnand %p5570_p12, %p5569_p3 }
 0xca5   : > { %4228 = dma.done.wait (!%p3403_p6), %s2773_s27, 128  }
 0xca6   : > { %4230 = vsyncadd (!%p3403_p6), %s2773_s27, 4294967168  ;;  %s2782_s29 = scalar_lea.sflag [#allocation33], %s2772_s13 }
 0xca7   : > { %4232 = dma.done.wait (!%p3403_p6), %s2782_s29, 128  }
 0xca8   : > { %4234 = vsyncadd (!%p3403_p6), %s2782_s29, 4294967168  ;;  %s50_s19 = sadd.s32 1, %s4257_s19   ;;  %s5571_s10 = sld [smem:[#allocation46_spill]] }
 0xca9   : > { %p47_p11 = scmp.ge.s32.totalorder %s50_s19, 4   ;;  %s5572_s29 = sld [smem:[#allocation50_spill]] }
 0xcaa   : > { %s5573_s14 = sld [smem:[#allocation49_spill]]  ;;  %s5574_s27 = smov %s4241_s28 }
 0xcab   : > { %s5576_s30 = smov %s4253_s0  ;;  %49 = sbr.rel (!%p47_p11) target bundleno = 37 (0x25), region = 248 }
 0xcae   : > { %s5575_s28 = smov %s5571_s10 }
 0xcb0   : > { %s5577_s0 = smov %s5573_s14 }
 0xcb2   :  { %2787 = vsyncpa [#allocation5], 1 }
 0xcb3   :  { %2789 = vsyncpa [#allocation5 + $0x1], 1 }
 0xcb4   :  { %2790 = vsyncpa [#allocation8], 1 }
 0xcb5   :  { %2792 = vsyncpa [#allocation8 + $0x1], 1 }
 0xcb6   :  { %2793 = vsyncpa [#allocation11], 1 }
 0xcb7   :  { %2795 = vsyncpa [#allocation11 + $0x1], 1 }
 0xcb8   :  { %2796 = vsyncpa [#allocation14], 1 }
 0xcb9   :  { %2797 = vsyncpa [#allocation17], 1 }
 0xcba   :  { %2798 = vsyncpa [#allocation20], 1 }
 0xcbb   :  { %2799 = vsyncpa [#allocation23], 1 }
 0xcbc   :  { %2800 = vsyncpa [#allocation26], 1 }
 0xcbd   :  { %2801 = vsyncpa [#allocation29], 1 }
 0xcbe   :  { %2802 = vsyncpa [#allocation6], 1 }
 0xcbf   :  { %2804 = vsyncpa [#allocation6 + $0x1], 1 }
 0xcc0   :  { %2805 = vsyncpa [#allocation33], 1 }
 0xcc1   :  { %2807 = vsyncpa [#allocation33 + $0x1], 1 }

</bundles_post_ra>
